<compile_context>
chip_gen: v7x
topology: tpu7x:2x2x1
jax: 0.10.0
libtpu: 0.0.40
codegen_flags: <defaults>
</compile_context>

<pallas_src>
import jax
import jax.numpy as jnp
from jax.experimental import pallas as pl
from jax.experimental.pallas import tpu as pltpu


# ----------------------------- configuration -----------------------------
BATCH = 256               # scaled up per perf review (fills MXU M dimension)
BATCH_TILE = 128          # rows per grid step; "parallel" axis -> v7x 2 TCs
CONTEXT_LEN = 64          # context_length
PRED_LEN = 32             # prediction_length
WIDTH = 128               # widths[i] (all stacks equal so weights stack)
EXP_LEN = 32              # expansion_coefficient_lengths[i]
STATE_W = 128             # lane-dense carried state width (>= C + P)
NUM_STACKS = 4
NUM_BLOCKS_PER_STACK = 1
NUM_BLOCK_LAYERS = 4      # num_block_layers[i]
NUM_HIDDEN = NUM_BLOCK_LAYERS - 1          # Linear(width,width) layers after the first
NUM_TOTAL_BLOCKS = NUM_STACKS * NUM_BLOCKS_PER_STACK


# ------------------------------ Pallas kernel -----------------------------
def _nbeats_kernel(x_ref,      # (TB, 128)          f32  [backcast | forecast | 0]
                   w1_ref,     # (nb, 128, W)       bf16 rows C.. zero-padded
                   b1_ref,     # (nb, 1, W)         f32
                   wh_ref,     # (nb, nh, W, W)     bf16
                   bh_ref,     # (nb, nh, 1, W)     f32
                   wt_ref,     # (nb, W, 2E)        bf16 [theta_b | theta_f] fused
                   wp_ref,     # (nb, 2E, 128)      bf16 sign-folded block-diag
                   bp_ref,     # (nb, 1, 128)       f32  sign-folded concat bias
                   out_ref):   # (TB, 128)          f32  final state
    nb = w1_ref.shape[0]
    nh = wh_ref.shape[1]

    # Hot state lives in vregs; lane-dense (128 wide), never sliced in-kernel.
    state = x_ref[...]

    for i in range(nb):  # static unroll: residual chain is strictly serial
        # fc_stack: Linear + ReLU, then (num_block_layers - 1) x [Linear + ReLU].
        # Padded w1 rows zero out the forecast/pad lanes of `state`.
        h = jnp.dot(state.astype(jnp.bfloat16), w1_ref[i],
                    preferred_element_type=jnp.float32) + b1_ref[i]
        h = jnp.maximum(h, 0.0)
        for j in range(nh):  # static unroll
            h = jnp.dot(h.astype(jnp.bfloat16), wh_ref[i, j],
                        preferred_element_type=jnp.float32) + bh_ref[i, j]
            h = jnp.maximum(h, 0.0)

        # Fused theta heads (bias-free) + ReLU:  [theta_b | theta_f]  (TB, 2E)
        theta = jnp.maximum(
            jnp.dot(h.astype(jnp.bfloat16), wt_ref[i],
                    preferred_element_type=jnp.float32), 0.0)

        # Sign-folded block-diagonal projection straight into the state:
        #   state[:, :C]    += -(theta_b @ wbk) - bbk     (backcast residual)
        #   state[:, C:C+P] +=  theta_f @ wfc + bfc       (forecast accumulate)
        #   state[:, C+P:]  +=  0                         (pad lanes)
        state = state + jnp.dot(theta.astype(jnp.bfloat16), wp_ref[i],
                                preferred_element_type=jnp.float32) + bp_ref[i]

    out_ref[...] = state


# --------------------------- operand preparation ---------------------------
def prepare_operands(params, context_len=CONTEXT_LEN, pred_len=PRED_LEN,
                     state_w=STATE_W):
    """Fuse / sign-fold / pad / cast the per-block f32 weights."""
    nb, C, W = params["w1"].shape
    E = params["wtb"].shape[-1]
    P = params["wfc"].shape[-1]
    assert C == context_len and P == pred_len and C + P <= state_w

    # First-layer weight padded to (state_w, W): rows >= C are zero so the
    # forecast/pad lanes of the carried state never leak into the fc stack.
    w1p = jnp.zeros((nb, state_w, W), jnp.float32).at[:, :C, :].set(params["w1"])

    # theta_b_fc | theta_f_fc fused along the output dim: (nb, W, 2E)
    wt = jnp.concatenate([params["wtb"], params["wtf"]], axis=-1)

    # Sign-folded, lane-padded block-diagonal projection (nb, 2E, state_w):
    #   rows 0..E-1  (theta_b), cols 0..C-1     : -wbk   -> backcast -= ...
    #   rows E..2E-1 (theta_f), cols C..C+P-1   : +wfc   -> forecast += ...
    wp = jnp.zeros((nb, 2 * E, state_w), jnp.float32)
    wp = wp.at[:, :E, :C].set(-params["wbk"])
    wp = wp.at[:, E:, C:C + P].set(params["wfc"])

    # Matching sign-folded, lane-padded bias (nb, 1, state_w)
    bp = jnp.zeros((nb, 1, state_w), jnp.float32)
    bp = bp.at[:, :, :C].set(-params["bbk"])
    bp = bp.at[:, :, C:C + P].set(params["bfc"])

    return {
        "w1": w1p.astype(jnp.bfloat16),
        "b1": params["b1"],
        "wh": params["wh"].astype(jnp.bfloat16),
        "bh": params["bh"],
        "wt": wt.astype(jnp.bfloat16),
        "wp": wp.astype(jnp.bfloat16),
        "bp": bp,
    }


# ------------------------------- wrapper -----------------------------------
def nbeats_forward(past_target, ops, *, context_len=CONTEXT_LEN,
                   pred_len=PRED_LEN, batch_tile=BATCH_TILE, state_w=STATE_W):
    """past_target: (B, C) f32.  ops: fused/bf16 operands from prepare_operands."""
    B, C = past_target.shape
    P = pred_len
    nb, _, W = ops["w1"].shape
    nh = ops["wh"].shape[1]
    E2 = ops["wt"].shape[-1]

    # Pad batch to a multiple of the tile and embed the input into the
    # lane-dense 128-wide carried state: [backcast | forecast(=0) | pad(=0)].
    n_tiles = pl.cdiv(B, batch_tile)
    B_pad = n_tiles * batch_tile
    state0 = jnp.zeros((B_pad, state_w), jnp.float32)
    state0 = state0.at[:B, :C].set(past_target)

    const3 = lambda b: (0, 0, 0)
    const4 = lambda b: (0, 0, 0, 0)

    out = pl.pallas_call(
        _nbeats_kernel,
        out_shape=jax.ShapeDtypeStruct((B_pad, state_w), jnp.float32),
        grid=(n_tiles,),
        in_specs=[
            pl.BlockSpec((batch_tile, state_w), lambda b: (b, 0)),
            pl.BlockSpec((nb, state_w, W), const3),
            pl.BlockSpec((nb, 1, W), const3),
            pl.BlockSpec((nb, nh, W, W), const4),
            pl.BlockSpec((nb, nh, 1, W), const4),
            pl.BlockSpec((nb, W, E2), const3),
            pl.BlockSpec((nb, E2, state_w), const3),
            pl.BlockSpec((nb, 1, state_w), const3),
        ],
        out_specs=pl.BlockSpec((batch_tile, state_w), lambda b: (b, 0)),
        compiler_params=pltpu.CompilerParams(
            dimension_semantics=("parallel",)),
    )(state0, ops["w1"], ops["b1"], ops["wh"], ops["bh"],
      ops["wt"], ops["wp"], ops["bp"])

    # Forecast lives in lanes [C, C+P) of the final state.
    return out[:B, C:C + P]


# --------------------------- pure-JAX reference ---------------------------
def nbeats_reference(x, params):
    """Unfused f32 reference matching the PyTorch NBEATS forward."""
    nb = params["w1"].shape[0]
    backcast = x
    forecast = jnp.zeros((x.shape[0], params["wfc"].shape[-1]), jnp.float32)
    for i in range(nb):
        h = jax.nn.relu(backcast @ params["w1"][i] + params["b1"][i])
        for j in range(params["wh"].shape[1]):
            h = jax.nn.relu(h @ params["wh"][i, j] + params["bh"][i, j])
        tb = jax.nn.relu(h @ params["wtb"][i])
        tf = jax.nn.relu(h @ params["wtf"][i])
        b = tb @ params["wbk"][i] + params["bbk"][i]
        f = tf @ params["wfc"][i] + params["bfc"][i]
        backcast = backcast - b
        forecast = forecast + f
    return forecast


# --------------------------- deterministic init ---------------------------
def make_params(key):
    ks = jax.random.split(key, 11)
    s = 0.05
    return {
        "w1":  s * jax.random.normal(ks[0], (NUM_TOTAL_BLOCKS, CONTEXT_LEN, WIDTH), jnp.float32),
        "b1":  s * jax.random.normal(ks[1], (NUM_TOTAL_BLOCKS, 1, WIDTH), jnp.float32),
        "wh":  s * jax.random.normal(ks[2], (NUM_TOTAL_BLOCKS, NUM_HIDDEN, WIDTH, WIDTH), jnp.float32),
        "bh":  s * jax.random.normal(ks[3], (NUM_TOTAL_BLOCKS, NUM_HIDDEN, 1, WIDTH), jnp.float32),
        "wtb": s * jax.random.normal(ks[4], (NUM_TOTAL_BLOCKS, WIDTH, EXP_LEN), jnp.float32),
        "wtf": s * jax.random.normal(ks[5], (NUM_TOTAL_BLOCKS, WIDTH, EXP_LEN), jnp.float32),
        "wbk": s * jax.random.normal(ks[6], (NUM_TOTAL_BLOCKS, EXP_LEN, CONTEXT_LEN), jnp.float32),
        "bbk": s * jax.random.normal(ks[7], (NUM_TOTAL_BLOCKS, 1, CONTEXT_LEN), jnp.float32),
        "wfc": s * jax.random.normal(ks[8], (NUM_TOTAL_BLOCKS, EXP_LEN, PRED_LEN), jnp.float32),
        "bfc": s * jax.random.normal(ks[9], (NUM_TOTAL_BLOCKS, 1, PRED_LEN), jnp.float32),
    }


if __name__ == "__main__":
    key = jax.random.PRNGKey(0)
    kx, kp = jax.random.split(key)
    past_target = jax.random.normal(kx, (BATCH, CONTEXT_LEN), jnp.float32)
    params = make_params(kp)
    ops = prepare_operands(params)

    out = nbeats_forward(past_target, ops)
    out = jax.block_until_ready(out)

    ref = nbeats_reference(past_target, params)
    assert out.shape == (BATCH, PRED_LEN), out.shape
    # Kernel uses bf16 weights at the MXU inputs (f32 reference) -> allow
    # bf16-level quantization noise.
    assert jnp.allclose(out, ref, rtol=2e-2, atol=2e-2), \
        f"max abs err {jnp.max(jnp.abs(out - ref))}"

    print("KERNEL_OK")
</pallas_src>

<mosaic_0001>
module attributes {stable_mosaic.version = 11 : i64} {
  func.func @_nbeats_kernel(%arg0: i32, %arg1: memref<128x128xf32, #tpu.memory_space<vmem>>, %arg2: memref<4x128x128xbf16, #tpu.memory_space<vmem>>, %arg3: memref<4x1x128xf32, #tpu.memory_space<vmem>>, %arg4: memref<4x3x128x128xbf16, #tpu.memory_space<vmem>>, %arg5: memref<4x3x1x128xf32, #tpu.memory_space<vmem>>, %arg6: memref<4x128x64xbf16, #tpu.memory_space<vmem>>, %arg7: memref<4x64x128xbf16, #tpu.memory_space<vmem>>, %arg8: memref<4x1x128xf32, #tpu.memory_space<vmem>>, %arg9: memref<128x128xf32, #tpu.memory_space<vmem>>) attributes {dimension_semantics = [#tpu.dimension_semantics<parallel>], iteration_bounds = array<i64: 2>, scalar_prefetch = 0 : i64, scratch_operands = 0 : i64, tpu.core_type = #tpu.core_type<tc>, window_params = [{transform_indices = @transform_0, window_bounds = array<i64: 128, 128>}, {pipeline_mode = #tpu.pipeline_mode<synchronous>, transform_indices = @transform_1, window_bounds = array<i64: 4, 128, 128>}, {pipeline_mode = #tpu.pipeline_mode<synchronous>, transform_indices = @transform_2, window_bounds = array<i64: 4, 1, 128>}, {pipeline_mode = #tpu.pipeline_mode<synchronous>, transform_indices = @transform_3, window_bounds = array<i64: 4, 3, 128, 128>}, {pipeline_mode = #tpu.pipeline_mode<synchronous>, transform_indices = @transform_4, window_bounds = array<i64: 4, 3, 1, 128>}, {pipeline_mode = #tpu.pipeline_mode<synchronous>, transform_indices = @transform_5, window_bounds = array<i64: 4, 128, 64>}, {pipeline_mode = #tpu.pipeline_mode<synchronous>, transform_indices = @transform_6, window_bounds = array<i64: 4, 64, 128>}, {pipeline_mode = #tpu.pipeline_mode<synchronous>, transform_indices = @transform_7, window_bounds = array<i64: 4, 1, 128>}, {transform_indices = @transform_8, window_bounds = array<i64: 128, 128>}]} {
    %c0 = arith.constant 0 : index
    %c0_0 = arith.constant 0 : index
    %0 = vector.load %arg1[%c0, %c0_0] : memref<128x128xf32, #tpu.memory_space<vmem>>, vector<128x128xf32>
    %1 = arith.truncf %0 : vector<128x128xf32> to vector<128x128xbf16>
    %c0_1 = arith.constant 0 : index
    %c0_2 = arith.constant 0 : index
    %c0_3 = arith.constant 0 : index
    %2 = vector.load %arg2[%c0_1, %c0_2, %c0_3] : memref<4x128x128xbf16, #tpu.memory_space<vmem>>, vector<1x128x128xbf16>
    %3 = vector.shape_cast %2 : vector<1x128x128xbf16> to vector<128x128xbf16>
    %cst = arith.constant dense<0.000000e+00> : vector<128x128xf32>
    %4 = tpu.matmul %1, %3, %cst {dimension_numbers = #tpu.dot_dimension_numbers<[1], [0], [0], [1], [0, 0, 1, 1], [], []>} : vector<128x128xbf16>, vector<128x128xbf16>, vector<128x128xf32> -> vector<128x128xf32>
    %c0_4 = arith.constant 0 : index
    %c0_5 = arith.constant 0 : index
    %c0_6 = arith.constant 0 : index
    %5 = vector.load %arg3[%c0_4, %c0_5, %c0_6] : memref<4x1x128xf32, #tpu.memory_space<vmem>>, vector<1x1x128xf32>
    %6 = vector.shape_cast %5 : vector<1x1x128xf32> to vector<1x128xf32>
    %7 = vector.broadcast %6 : vector<1x128xf32> to vector<128x128xf32>
    %8 = arith.addf %4, %7 : vector<128x128xf32>
    %cst_7 = arith.constant 0.000000e+00 : f32
    %9 = vector.broadcast %cst_7 : f32 to vector<128x128xf32>
    %10 = arith.maximumf %8, %9 : vector<128x128xf32>
    %11 = arith.truncf %10 : vector<128x128xf32> to vector<128x128xbf16>
    %c0_8 = arith.constant 0 : index
    %c0_9 = arith.constant 0 : index
    %c0_10 = arith.constant 0 : index
    %c0_11 = arith.constant 0 : index
    %12 = vector.load %arg4[%c0_8, %c0_9, %c0_10, %c0_11] : memref<4x3x128x128xbf16, #tpu.memory_space<vmem>>, vector<1x1x128x128xbf16>
    %13 = vector.shape_cast %12 : vector<1x1x128x128xbf16> to vector<128x128xbf16>
    %cst_12 = arith.constant dense<0.000000e+00> : vector<128x128xf32>
    %14 = tpu.matmul %11, %13, %cst_12 {dimension_numbers = #tpu.dot_dimension_numbers<[1], [0], [0], [1], [0, 0, 1, 1], [], []>} : vector<128x128xbf16>, vector<128x128xbf16>, vector<128x128xf32> -> vector<128x128xf32>
    %c0_13 = arith.constant 0 : index
    %c0_14 = arith.constant 0 : index
    %c0_15 = arith.constant 0 : index
    %c0_16 = arith.constant 0 : index
    %15 = vector.load %arg5[%c0_13, %c0_14, %c0_15, %c0_16] : memref<4x3x1x128xf32, #tpu.memory_space<vmem>>, vector<1x1x1x128xf32>
    %16 = vector.shape_cast %15 : vector<1x1x1x128xf32> to vector<1x128xf32>
    %17 = vector.broadcast %16 : vector<1x128xf32> to vector<128x128xf32>
    %18 = arith.addf %14, %17 : vector<128x128xf32>
    %cst_17 = arith.constant 0.000000e+00 : f32
    %19 = vector.broadcast %cst_17 : f32 to vector<128x128xf32>
    %20 = arith.maximumf %18, %19 : vector<128x128xf32>
    %21 = arith.truncf %20 : vector<128x128xf32> to vector<128x128xbf16>
    %c0_18 = arith.constant 0 : index
    %c1 = arith.constant 1 : index
    %c0_19 = arith.constant 0 : index
    %c0_20 = arith.constant 0 : index
    %22 = vector.load %arg4[%c0_18, %c1, %c0_19, %c0_20] : memref<4x3x128x128xbf16, #tpu.memory_space<vmem>>, vector<1x1x128x128xbf16>
    %23 = vector.shape_cast %22 : vector<1x1x128x128xbf16> to vector<128x128xbf16>
    %cst_21 = arith.constant dense<0.000000e+00> : vector<128x128xf32>
    %24 = tpu.matmul %21, %23, %cst_21 {dimension_numbers = #tpu.dot_dimension_numbers<[1], [0], [0], [1], [0, 0, 1, 1], [], []>} : vector<128x128xbf16>, vector<128x128xbf16>, vector<128x128xf32> -> vector<128x128xf32>
    %c0_22 = arith.constant 0 : index
    %c1_23 = arith.constant 1 : index
    %c0_24 = arith.constant 0 : index
    %c0_25 = arith.constant 0 : index
    %25 = vector.load %arg5[%c0_22, %c1_23, %c0_24, %c0_25] : memref<4x3x1x128xf32, #tpu.memory_space<vmem>>, vector<1x1x1x128xf32>
    %26 = vector.shape_cast %25 : vector<1x1x1x128xf32> to vector<1x128xf32>
    %27 = vector.broadcast %26 : vector<1x128xf32> to vector<128x128xf32>
    %28 = arith.addf %24, %27 : vector<128x128xf32>
    %cst_26 = arith.constant 0.000000e+00 : f32
    %29 = vector.broadcast %cst_26 : f32 to vector<128x128xf32>
    %30 = arith.maximumf %28, %29 : vector<128x128xf32>
    %31 = arith.truncf %30 : vector<128x128xf32> to vector<128x128xbf16>
    %c0_27 = arith.constant 0 : index
    %c2 = arith.constant 2 : index
    %c0_28 = arith.constant 0 : index
    %c0_29 = arith.constant 0 : index
    %32 = vector.load %arg4[%c0_27, %c2, %c0_28, %c0_29] : memref<4x3x128x128xbf16, #tpu.memory_space<vmem>>, vector<1x1x128x128xbf16>
    %33 = vector.shape_cast %32 : vector<1x1x128x128xbf16> to vector<128x128xbf16>
    %cst_30 = arith.constant dense<0.000000e+00> : vector<128x128xf32>
    %34 = tpu.matmul %31, %33, %cst_30 {dimension_numbers = #tpu.dot_dimension_numbers<[1], [0], [0], [1], [0, 0, 1, 1], [], []>} : vector<128x128xbf16>, vector<128x128xbf16>, vector<128x128xf32> -> vector<128x128xf32>
    %c0_31 = arith.constant 0 : index
    %c2_32 = arith.constant 2 : index
    %c0_33 = arith.constant 0 : index
    %c0_34 = arith.constant 0 : index
    %35 = vector.load %arg5[%c0_31, %c2_32, %c0_33, %c0_34] : memref<4x3x1x128xf32, #tpu.memory_space<vmem>>, vector<1x1x1x128xf32>
    %36 = vector.shape_cast %35 : vector<1x1x1x128xf32> to vector<1x128xf32>
    %37 = vector.broadcast %36 : vector<1x128xf32> to vector<128x128xf32>
    %38 = arith.addf %34, %37 : vector<128x128xf32>
    %cst_35 = arith.constant 0.000000e+00 : f32
    %39 = vector.broadcast %cst_35 : f32 to vector<128x128xf32>
    %40 = arith.maximumf %38, %39 : vector<128x128xf32>
    %41 = arith.truncf %40 : vector<128x128xf32> to vector<128x128xbf16>
    %c0_36 = arith.constant 0 : index
    %c0_37 = arith.constant 0 : index
    %c0_38 = arith.constant 0 : index
    %42 = vector.load %arg6[%c0_36, %c0_37, %c0_38] : memref<4x128x64xbf16, #tpu.memory_space<vmem>>, vector<1x128x64xbf16>
    %43 = vector.shape_cast %42 : vector<1x128x64xbf16> to vector<128x64xbf16>
    %cst_39 = arith.constant dense<0.000000e+00> : vector<128x64xf32>
    %44 = tpu.matmul %41, %43, %cst_39 {dimension_numbers = #tpu.dot_dimension_numbers<[1], [0], [0], [1], [0, 0, 1, 1], [], []>} : vector<128x128xbf16>, vector<128x64xbf16>, vector<128x64xf32> -> vector<128x64xf32>
    %cst_40 = arith.constant 0.000000e+00 : f32
    %45 = vector.broadcast %cst_40 : f32 to vector<128x64xf32>
    %46 = arith.maximumf %44, %45 : vector<128x64xf32>
    %47 = arith.truncf %46 : vector<128x64xf32> to vector<128x64xbf16>
    %c0_41 = arith.constant 0 : index
    %c0_42 = arith.constant 0 : index
    %c0_43 = arith.constant 0 : index
    %48 = vector.load %arg7[%c0_41, %c0_42, %c0_43] : memref<4x64x128xbf16, #tpu.memory_space<vmem>>, vector<1x64x128xbf16>
    %49 = vector.shape_cast %48 : vector<1x64x128xbf16> to vector<64x128xbf16>
    %cst_44 = arith.constant dense<0.000000e+00> : vector<128x128xf32>
    %50 = tpu.matmul %47, %49, %cst_44 {dimension_numbers = #tpu.dot_dimension_numbers<[1], [0], [0], [1], [0, 0, 1, 1], [], []>} : vector<128x64xbf16>, vector<64x128xbf16>, vector<128x128xf32> -> vector<128x128xf32>
    %51 = arith.addf %0, %50 : vector<128x128xf32>
    %c0_45 = arith.constant 0 : index
    %c0_46 = arith.constant 0 : index
    %c0_47 = arith.constant 0 : index
    %52 = vector.load %arg8[%c0_45, %c0_46, %c0_47] : memref<4x1x128xf32, #tpu.memory_space<vmem>>, vector<1x1x128xf32>
    %53 = vector.shape_cast %52 : vector<1x1x128xf32> to vector<1x128xf32>
    %54 = vector.broadcast %53 : vector<1x128xf32> to vector<128x128xf32>
    %55 = arith.addf %51, %54 : vector<128x128xf32>
    %56 = arith.truncf %55 : vector<128x128xf32> to vector<128x128xbf16>
    %c1_48 = arith.constant 1 : index
    %c0_49 = arith.constant 0 : index
    %c0_50 = arith.constant 0 : index
    %57 = vector.load %arg2[%c1_48, %c0_49, %c0_50] : memref<4x128x128xbf16, #tpu.memory_space<vmem>>, vector<1x128x128xbf16>
    %58 = vector.shape_cast %57 : vector<1x128x128xbf16> to vector<128x128xbf16>
    %cst_51 = arith.constant dense<0.000000e+00> : vector<128x128xf32>
    %59 = tpu.matmul %56, %58, %cst_51 {dimension_numbers = #tpu.dot_dimension_numbers<[1], [0], [0], [1], [0, 0, 1, 1], [], []>} : vector<128x128xbf16>, vector<128x128xbf16>, vector<128x128xf32> -> vector<128x128xf32>
    %c1_52 = arith.constant 1 : index
    %c0_53 = arith.constant 0 : index
    %c0_54 = arith.constant 0 : index
    %60 = vector.load %arg3[%c1_52, %c0_53, %c0_54] : memref<4x1x128xf32, #tpu.memory_space<vmem>>, vector<1x1x128xf32>
    %61 = vector.shape_cast %60 : vector<1x1x128xf32> to vector<1x128xf32>
    %62 = vector.broadcast %61 : vector<1x128xf32> to vector<128x128xf32>
    %63 = arith.addf %59, %62 : vector<128x128xf32>
    %cst_55 = arith.constant 0.000000e+00 : f32
    %64 = vector.broadcast %cst_55 : f32 to vector<128x128xf32>
    %65 = arith.maximumf %63, %64 : vector<128x128xf32>
    %66 = arith.truncf %65 : vector<128x128xf32> to vector<128x128xbf16>
    %c1_56 = arith.constant 1 : index
    %c0_57 = arith.constant 0 : index
    %c0_58 = arith.constant 0 : index
    %c0_59 = arith.constant 0 : index
    %67 = vector.load %arg4[%c1_56, %c0_57, %c0_58, %c0_59] : memref<4x3x128x128xbf16, #tpu.memory_space<vmem>>, vector<1x1x128x128xbf16>
    %68 = vector.shape_cast %67 : vector<1x1x128x128xbf16> to vector<128x128xbf16>
    %cst_60 = arith.constant dense<0.000000e+00> : vector<128x128xf32>
    %69 = tpu.matmul %66, %68, %cst_60 {dimension_numbers = #tpu.dot_dimension_numbers<[1], [0], [0], [1], [0, 0, 1, 1], [], []>} : vector<128x128xbf16>, vector<128x128xbf16>, vector<128x128xf32> -> vector<128x128xf32>
    %c1_61 = arith.constant 1 : index
    %c0_62 = arith.constant 0 : index
    %c0_63 = arith.constant 0 : index
    %c0_64 = arith.constant 0 : index
    %70 = vector.load %arg5[%c1_61, %c0_62, %c0_63, %c0_64] : memref<4x3x1x128xf32, #tpu.memory_space<vmem>>, vector<1x1x1x128xf32>
    %71 = vector.shape_cast %70 : vector<1x1x1x128xf32> to vector<1x128xf32>
    %72 = vector.broadcast %71 : vector<1x128xf32> to vector<128x128xf32>
    %73 = arith.addf %69, %72 : vector<128x128xf32>
    %cst_65 = arith.constant 0.000000e+00 : f32
    %74 = vector.broadcast %cst_65 : f32 to vector<128x128xf32>
    %75 = arith.maximumf %73, %74 : vector<128x128xf32>
    %76 = arith.truncf %75 : vector<128x128xf32> to vector<128x128xbf16>
    %c1_66 = arith.constant 1 : index
    %c1_67 = arith.constant 1 : index
    %c0_68 = arith.constant 0 : index
    %c0_69 = arith.constant 0 : index
    %77 = vector.load %arg4[%c1_66, %c1_67, %c0_68, %c0_69] : memref<4x3x128x128xbf16, #tpu.memory_space<vmem>>, vector<1x1x128x128xbf16>
    %78 = vector.shape_cast %77 : vector<1x1x128x128xbf16> to vector<128x128xbf16>
    %cst_70 = arith.constant dense<0.000000e+00> : vector<128x128xf32>
    %79 = tpu.matmul %76, %78, %cst_70 {dimension_numbers = #tpu.dot_dimension_numbers<[1], [0], [0], [1], [0, 0, 1, 1], [], []>} : vector<128x128xbf16>, vector<128x128xbf16>, vector<128x128xf32> -> vector<128x128xf32>
    %c1_71 = arith.constant 1 : index
    %c1_72 = arith.constant 1 : index
    %c0_73 = arith.constant 0 : index
    %c0_74 = arith.constant 0 : index
    %80 = vector.load %arg5[%c1_71, %c1_72, %c0_73, %c0_74] : memref<4x3x1x128xf32, #tpu.memory_space<vmem>>, vector<1x1x1x128xf32>
    %81 = vector.shape_cast %80 : vector<1x1x1x128xf32> to vector<1x128xf32>
    %82 = vector.broadcast %81 : vector<1x128xf32> to vector<128x128xf32>
    %83 = arith.addf %79, %82 : vector<128x128xf32>
    %cst_75 = arith.constant 0.000000e+00 : f32
    %84 = vector.broadcast %cst_75 : f32 to vector<128x128xf32>
    %85 = arith.maximumf %83, %84 : vector<128x128xf32>
    %86 = arith.truncf %85 : vector<128x128xf32> to vector<128x128xbf16>
    %c1_76 = arith.constant 1 : index
    %c2_77 = arith.constant 2 : index
    %c0_78 = arith.constant 0 : index
    %c0_79 = arith.constant 0 : index
    %87 = vector.load %arg4[%c1_76, %c2_77, %c0_78, %c0_79] : memref<4x3x128x128xbf16, #tpu.memory_space<vmem>>, vector<1x1x128x128xbf16>
    %88 = vector.shape_cast %87 : vector<1x1x128x128xbf16> to vector<128x128xbf16>
    %cst_80 = arith.constant dense<0.000000e+00> : vector<128x128xf32>
    %89 = tpu.matmul %86, %88, %cst_80 {dimension_numbers = #tpu.dot_dimension_numbers<[1], [0], [0], [1], [0, 0, 1, 1], [], []>} : vector<128x128xbf16>, vector<128x128xbf16>, vector<128x128xf32> -> vector<128x128xf32>
    %c1_81 = arith.constant 1 : index
    %c2_82 = arith.constant 2 : index
    %c0_83 = arith.constant 0 : index
    %c0_84 = arith.constant 0 : index
    %90 = vector.load %arg5[%c1_81, %c2_82, %c0_83, %c0_84] : memref<4x3x1x128xf32, #tpu.memory_space<vmem>>, vector<1x1x1x128xf32>
    %91 = vector.shape_cast %90 : vector<1x1x1x128xf32> to vector<1x128xf32>
    %92 = vector.broadcast %91 : vector<1x128xf32> to vector<128x128xf32>
    %93 = arith.addf %89, %92 : vector<128x128xf32>
    %cst_85 = arith.constant 0.000000e+00 : f32
    %94 = vector.broadcast %cst_85 : f32 to vector<128x128xf32>
    %95 = arith.maximumf %93, %94 : vector<128x128xf32>
    %96 = arith.truncf %95 : vector<128x128xf32> to vector<128x128xbf16>
    %c1_86 = arith.constant 1 : index
    %c0_87 = arith.constant 0 : index
    %c0_88 = arith.constant 0 : index
    %97 = vector.load %arg6[%c1_86, %c0_87, %c0_88] : memref<4x128x64xbf16, #tpu.memory_space<vmem>>, vector<1x128x64xbf16>
    %98 = vector.shape_cast %97 : vector<1x128x64xbf16> to vector<128x64xbf16>
    %cst_89 = arith.constant dense<0.000000e+00> : vector<128x64xf32>
    %99 = tpu.matmul %96, %98, %cst_89 {dimension_numbers = #tpu.dot_dimension_numbers<[1], [0], [0], [1], [0, 0, 1, 1], [], []>} : vector<128x128xbf16>, vector<128x64xbf16>, vector<128x64xf32> -> vector<128x64xf32>
    %cst_90 = arith.constant 0.000000e+00 : f32
    %100 = vector.broadcast %cst_90 : f32 to vector<128x64xf32>
    %101 = arith.maximumf %99, %100 : vector<128x64xf32>
    %102 = arith.truncf %101 : vector<128x64xf32> to vector<128x64xbf16>
    %c1_91 = arith.constant 1 : index
    %c0_92 = arith.constant 0 : index
    %c0_93 = arith.constant 0 : index
    %103 = vector.load %arg7[%c1_91, %c0_92, %c0_93] : memref<4x64x128xbf16, #tpu.memory_space<vmem>>, vector<1x64x128xbf16>
    %104 = vector.shape_cast %103 : vector<1x64x128xbf16> to vector<64x128xbf16>
    %cst_94 = arith.constant dense<0.000000e+00> : vector<128x128xf32>
    %105 = tpu.matmul %102, %104, %cst_94 {dimension_numbers = #tpu.dot_dimension_numbers<[1], [0], [0], [1], [0, 0, 1, 1], [], []>} : vector<128x64xbf16>, vector<64x128xbf16>, vector<128x128xf32> -> vector<128x128xf32>
    %106 = arith.addf %55, %105 : vector<128x128xf32>
    %c1_95 = arith.constant 1 : index
    %c0_96 = arith.constant 0 : index
    %c0_97 = arith.constant 0 : index
    %107 = vector.load %arg8[%c1_95, %c0_96, %c0_97] : memref<4x1x128xf32, #tpu.memory_space<vmem>>, vector<1x1x128xf32>
    %108 = vector.shape_cast %107 : vector<1x1x128xf32> to vector<1x128xf32>
    %109 = vector.broadcast %108 : vector<1x128xf32> to vector<128x128xf32>
    %110 = arith.addf %106, %109 : vector<128x128xf32>
    %111 = arith.truncf %110 : vector<128x128xf32> to vector<128x128xbf16>
    %c2_98 = arith.constant 2 : index
    %c0_99 = arith.constant 0 : index
    %c0_100 = arith.constant 0 : index
    %112 = vector.load %arg2[%c2_98, %c0_99, %c0_100] : memref<4x128x128xbf16, #tpu.memory_space<vmem>>, vector<1x128x128xbf16>
    %113 = vector.shape_cast %112 : vector<1x128x128xbf16> to vector<128x128xbf16>
    %cst_101 = arith.constant dense<0.000000e+00> : vector<128x128xf32>
    %114 = tpu.matmul %111, %113, %cst_101 {dimension_numbers = #tpu.dot_dimension_numbers<[1], [0], [0], [1], [0, 0, 1, 1], [], []>} : vector<128x128xbf16>, vector<128x128xbf16>, vector<128x128xf32> -> vector<128x128xf32>
    %c2_102 = arith.constant 2 : index
    %c0_103 = arith.constant 0 : index
    %c0_104 = arith.constant 0 : index
    %115 = vector.load %arg3[%c2_102, %c0_103, %c0_104] : memref<4x1x128xf32, #tpu.memory_space<vmem>>, vector<1x1x128xf32>
    %116 = vector.shape_cast %115 : vector<1x1x128xf32> to vector<1x128xf32>
    %117 = vector.broadcast %116 : vector<1x128xf32> to vector<128x128xf32>
    %118 = arith.addf %114, %117 : vector<128x128xf32>
    %cst_105 = arith.constant 0.000000e+00 : f32
    %119 = vector.broadcast %cst_105 : f32 to vector<128x128xf32>
    %120 = arith.maximumf %118, %119 : vector<128x128xf32>
    %121 = arith.truncf %120 : vector<128x128xf32> to vector<128x128xbf16>
    %c2_106 = arith.constant 2 : index
    %c0_107 = arith.constant 0 : index
    %c0_108 = arith.constant 0 : index
    %c0_109 = arith.constant 0 : index
    %122 = vector.load %arg4[%c2_106, %c0_107, %c0_108, %c0_109] : memref<4x3x128x128xbf16, #tpu.memory_space<vmem>>, vector<1x1x128x128xbf16>
    %123 = vector.shape_cast %122 : vector<1x1x128x128xbf16> to vector<128x128xbf16>
    %cst_110 = arith.constant dense<0.000000e+00> : vector<128x128xf32>
    %124 = tpu.matmul %121, %123, %cst_110 {dimension_numbers = #tpu.dot_dimension_numbers<[1], [0], [0], [1], [0, 0, 1, 1], [], []>} : vector<128x128xbf16>, vector<128x128xbf16>, vector<128x128xf32> -> vector<128x128xf32>
    %c2_111 = arith.constant 2 : index
    %c0_112 = arith.constant 0 : index
    %c0_113 = arith.constant 0 : index
    %c0_114 = arith.constant 0 : index
    %125 = vector.load %arg5[%c2_111, %c0_112, %c0_113, %c0_114] : memref<4x3x1x128xf32, #tpu.memory_space<vmem>>, vector<1x1x1x128xf32>
    %126 = vector.shape_cast %125 : vector<1x1x1x128xf32> to vector<1x128xf32>
    %127 = vector.broadcast %126 : vector<1x128xf32> to vector<128x128xf32>
    %128 = arith.addf %124, %127 : vector<128x128xf32>
    %cst_115 = arith.constant 0.000000e+00 : f32
    %129 = vector.broadcast %cst_115 : f32 to vector<128x128xf32>
    %130 = arith.maximumf %128, %129 : vector<128x128xf32>
    %131 = arith.truncf %130 : vector<128x128xf32> to vector<128x128xbf16>
    %c2_116 = arith.constant 2 : index
    %c1_117 = arith.constant 1 : index
    %c0_118 = arith.constant 0 : index
    %c0_119 = arith.constant 0 : index
    %132 = vector.load %arg4[%c2_116, %c1_117, %c0_118, %c0_119] : memref<4x3x128x128xbf16, #tpu.memory_space<vmem>>, vector<1x1x128x128xbf16>
    %133 = vector.shape_cast %132 : vector<1x1x128x128xbf16> to vector<128x128xbf16>
    %cst_120 = arith.constant dense<0.000000e+00> : vector<128x128xf32>
    %134 = tpu.matmul %131, %133, %cst_120 {dimension_numbers = #tpu.dot_dimension_numbers<[1], [0], [0], [1], [0, 0, 1, 1], [], []>} : vector<128x128xbf16>, vector<128x128xbf16>, vector<128x128xf32> -> vector<128x128xf32>
    %c2_121 = arith.constant 2 : index
    %c1_122 = arith.constant 1 : index
    %c0_123 = arith.constant 0 : index
    %c0_124 = arith.constant 0 : index
    %135 = vector.load %arg5[%c2_121, %c1_122, %c0_123, %c0_124] : memref<4x3x1x128xf32, #tpu.memory_space<vmem>>, vector<1x1x1x128xf32>
    %136 = vector.shape_cast %135 : vector<1x1x1x128xf32> to vector<1x128xf32>
    %137 = vector.broadcast %136 : vector<1x128xf32> to vector<128x128xf32>
    %138 = arith.addf %134, %137 : vector<128x128xf32>
    %cst_125 = arith.constant 0.000000e+00 : f32
    %139 = vector.broadcast %cst_125 : f32 to vector<128x128xf32>
    %140 = arith.maximumf %138, %139 : vector<128x128xf32>
    %141 = arith.truncf %140 : vector<128x128xf32> to vector<128x128xbf16>
    %c2_126 = arith.constant 2 : index
    %c2_127 = arith.constant 2 : index
    %c0_128 = arith.constant 0 : index
    %c0_129 = arith.constant 0 : index
    %142 = vector.load %arg4[%c2_126, %c2_127, %c0_128, %c0_129] : memref<4x3x128x128xbf16, #tpu.memory_space<vmem>>, vector<1x1x128x128xbf16>
    %143 = vector.shape_cast %142 : vector<1x1x128x128xbf16> to vector<128x128xbf16>
    %cst_130 = arith.constant dense<0.000000e+00> : vector<128x128xf32>
    %144 = tpu.matmul %141, %143, %cst_130 {dimension_numbers = #tpu.dot_dimension_numbers<[1], [0], [0], [1], [0, 0, 1, 1], [], []>} : vector<128x128xbf16>, vector<128x128xbf16>, vector<128x128xf32> -> vector<128x128xf32>
    %c2_131 = arith.constant 2 : index
    %c2_132 = arith.constant 2 : index
    %c0_133 = arith.constant 0 : index
    %c0_134 = arith.constant 0 : index
    %145 = vector.load %arg5[%c2_131, %c2_132, %c0_133, %c0_134] : memref<4x3x1x128xf32, #tpu.memory_space<vmem>>, vector<1x1x1x128xf32>
    %146 = vector.shape_cast %145 : vector<1x1x1x128xf32> to vector<1x128xf32>
    %147 = vector.broadcast %146 : vector<1x128xf32> to vector<128x128xf32>
    %148 = arith.addf %144, %147 : vector<128x128xf32>
    %cst_135 = arith.constant 0.000000e+00 : f32
    %149 = vector.broadcast %cst_135 : f32 to vector<128x128xf32>
    %150 = arith.maximumf %148, %149 : vector<128x128xf32>
    %151 = arith.truncf %150 : vector<128x128xf32> to vector<128x128xbf16>
    %c2_136 = arith.constant 2 : index
    %c0_137 = arith.constant 0 : index
    %c0_138 = arith.constant 0 : index
    %152 = vector.load %arg6[%c2_136, %c0_137, %c0_138] : memref<4x128x64xbf16, #tpu.memory_space<vmem>>, vector<1x128x64xbf16>
    %153 = vector.shape_cast %152 : vector<1x128x64xbf16> to vector<128x64xbf16>
    %cst_139 = arith.constant dense<0.000000e+00> : vector<128x64xf32>
    %154 = tpu.matmul %151, %153, %cst_139 {dimension_numbers = #tpu.dot_dimension_numbers<[1], [0], [0], [1], [0, 0, 1, 1], [], []>} : vector<128x128xbf16>, vector<128x64xbf16>, vector<128x64xf32> -> vector<128x64xf32>
    %cst_140 = arith.constant 0.000000e+00 : f32
    %155 = vector.broadcast %cst_140 : f32 to vector<128x64xf32>
    %156 = arith.maximumf %154, %155 : vector<128x64xf32>
    %157 = arith.truncf %156 : vector<128x64xf32> to vector<128x64xbf16>
    %c2_141 = arith.constant 2 : index
    %c0_142 = arith.constant 0 : index
    %c0_143 = arith.constant 0 : index
    %158 = vector.load %arg7[%c2_141, %c0_142, %c0_143] : memref<4x64x128xbf16, #tpu.memory_space<vmem>>, vector<1x64x128xbf16>
    %159 = vector.shape_cast %158 : vector<1x64x128xbf16> to vector<64x128xbf16>
    %cst_144 = arith.constant dense<0.000000e+00> : vector<128x128xf32>
    %160 = tpu.matmul %157, %159, %cst_144 {dimension_numbers = #tpu.dot_dimension_numbers<[1], [0], [0], [1], [0, 0, 1, 1], [], []>} : vector<128x64xbf16>, vector<64x128xbf16>, vector<128x128xf32> -> vector<128x128xf32>
    %161 = arith.addf %110, %160 : vector<128x128xf32>
    %c2_145 = arith.constant 2 : index
    %c0_146 = arith.constant 0 : index
    %c0_147 = arith.constant 0 : index
    %162 = vector.load %arg8[%c2_145, %c0_146, %c0_147] : memref<4x1x128xf32, #tpu.memory_space<vmem>>, vector<1x1x128xf32>
    %163 = vector.shape_cast %162 : vector<1x1x128xf32> to vector<1x128xf32>
    %164 = vector.broadcast %163 : vector<1x128xf32> to vector<128x128xf32>
    %165 = arith.addf %161, %164 : vector<128x128xf32>
    %166 = arith.truncf %165 : vector<128x128xf32> to vector<128x128xbf16>
    %c3 = arith.constant 3 : index
    %c0_148 = arith.constant 0 : index
    %c0_149 = arith.constant 0 : index
    %167 = vector.load %arg2[%c3, %c0_148, %c0_149] : memref<4x128x128xbf16, #tpu.memory_space<vmem>>, vector<1x128x128xbf16>
    %168 = vector.shape_cast %167 : vector<1x128x128xbf16> to vector<128x128xbf16>
    %cst_150 = arith.constant dense<0.000000e+00> : vector<128x128xf32>
    %169 = tpu.matmul %166, %168, %cst_150 {dimension_numbers = #tpu.dot_dimension_numbers<[1], [0], [0], [1], [0, 0, 1, 1], [], []>} : vector<128x128xbf16>, vector<128x128xbf16>, vector<128x128xf32> -> vector<128x128xf32>
    %c3_151 = arith.constant 3 : index
    %c0_152 = arith.constant 0 : index
    %c0_153 = arith.constant 0 : index
    %170 = vector.load %arg3[%c3_151, %c0_152, %c0_153] : memref<4x1x128xf32, #tpu.memory_space<vmem>>, vector<1x1x128xf32>
    %171 = vector.shape_cast %170 : vector<1x1x128xf32> to vector<1x128xf32>
    %172 = vector.broadcast %171 : vector<1x128xf32> to vector<128x128xf32>
    %173 = arith.addf %169, %172 : vector<128x128xf32>
    %cst_154 = arith.constant 0.000000e+00 : f32
    %174 = vector.broadcast %cst_154 : f32 to vector<128x128xf32>
    %175 = arith.maximumf %173, %174 : vector<128x128xf32>
    %176 = arith.truncf %175 : vector<128x128xf32> to vector<128x128xbf16>
    %c3_155 = arith.constant 3 : index
    %c0_156 = arith.constant 0 : index
    %c0_157 = arith.constant 0 : index
    %c0_158 = arith.constant 0 : index
    %177 = vector.load %arg4[%c3_155, %c0_156, %c0_157, %c0_158] : memref<4x3x128x128xbf16, #tpu.memory_space<vmem>>, vector<1x1x128x128xbf16>
    %178 = vector.shape_cast %177 : vector<1x1x128x128xbf16> to vector<128x128xbf16>
    %cst_159 = arith.constant dense<0.000000e+00> : vector<128x128xf32>
    %179 = tpu.matmul %176, %178, %cst_159 {dimension_numbers = #tpu.dot_dimension_numbers<[1], [0], [0], [1], [0, 0, 1, 1], [], []>} : vector<128x128xbf16>, vector<128x128xbf16>, vector<128x128xf32> -> vector<128x128xf32>
    %c3_160 = arith.constant 3 : index
    %c0_161 = arith.constant 0 : index
    %c0_162 = arith.constant 0 : index
    %c0_163 = arith.constant 0 : index
    %180 = vector.load %arg5[%c3_160, %c0_161, %c0_162, %c0_163] : memref<4x3x1x128xf32, #tpu.memory_space<vmem>>, vector<1x1x1x128xf32>
    %181 = vector.shape_cast %180 : vector<1x1x1x128xf32> to vector<1x128xf32>
    %182 = vector.broadcast %181 : vector<1x128xf32> to vector<128x128xf32>
    %183 = arith.addf %179, %182 : vector<128x128xf32>
    %cst_164 = arith.constant 0.000000e+00 : f32
    %184 = vector.broadcast %cst_164 : f32 to vector<128x128xf32>
    %185 = arith.maximumf %183, %184 : vector<128x128xf32>
    %186 = arith.truncf %185 : vector<128x128xf32> to vector<128x128xbf16>
    %c3_165 = arith.constant 3 : index
    %c1_166 = arith.constant 1 : index
    %c0_167 = arith.constant 0 : index
    %c0_168 = arith.constant 0 : index
    %187 = vector.load %arg4[%c3_165, %c1_166, %c0_167, %c0_168] : memref<4x3x128x128xbf16, #tpu.memory_space<vmem>>, vector<1x1x128x128xbf16>
    %188 = vector.shape_cast %187 : vector<1x1x128x128xbf16> to vector<128x128xbf16>
    %cst_169 = arith.constant dense<0.000000e+00> : vector<128x128xf32>
    %189 = tpu.matmul %186, %188, %cst_169 {dimension_numbers = #tpu.dot_dimension_numbers<[1], [0], [0], [1], [0, 0, 1, 1], [], []>} : vector<128x128xbf16>, vector<128x128xbf16>, vector<128x128xf32> -> vector<128x128xf32>
    %c3_170 = arith.constant 3 : index
    %c1_171 = arith.constant 1 : index
    %c0_172 = arith.constant 0 : index
    %c0_173 = arith.constant 0 : index
    %190 = vector.load %arg5[%c3_170, %c1_171, %c0_172, %c0_173] : memref<4x3x1x128xf32, #tpu.memory_space<vmem>>, vector<1x1x1x128xf32>
    %191 = vector.shape_cast %190 : vector<1x1x1x128xf32> to vector<1x128xf32>
    %192 = vector.broadcast %191 : vector<1x128xf32> to vector<128x128xf32>
    %193 = arith.addf %189, %192 : vector<128x128xf32>
    %cst_174 = arith.constant 0.000000e+00 : f32
    %194 = vector.broadcast %cst_174 : f32 to vector<128x128xf32>
    %195 = arith.maximumf %193, %194 : vector<128x128xf32>
    %196 = arith.truncf %195 : vector<128x128xf32> to vector<128x128xbf16>
    %c3_175 = arith.constant 3 : index
    %c2_176 = arith.constant 2 : index
    %c0_177 = arith.constant 0 : index
    %c0_178 = arith.constant 0 : index
    %197 = vector.load %arg4[%c3_175, %c2_176, %c0_177, %c0_178] : memref<4x3x128x128xbf16, #tpu.memory_space<vmem>>, vector<1x1x128x128xbf16>
    %198 = vector.shape_cast %197 : vector<1x1x128x128xbf16> to vector<128x128xbf16>
    %cst_179 = arith.constant dense<0.000000e+00> : vector<128x128xf32>
    %199 = tpu.matmul %196, %198, %cst_179 {dimension_numbers = #tpu.dot_dimension_numbers<[1], [0], [0], [1], [0, 0, 1, 1], [], []>} : vector<128x128xbf16>, vector<128x128xbf16>, vector<128x128xf32> -> vector<128x128xf32>
    %c3_180 = arith.constant 3 : index
    %c2_181 = arith.constant 2 : index
    %c0_182 = arith.constant 0 : index
    %c0_183 = arith.constant 0 : index
    %200 = vector.load %arg5[%c3_180, %c2_181, %c0_182, %c0_183] : memref<4x3x1x128xf32, #tpu.memory_space<vmem>>, vector<1x1x1x128xf32>
    %201 = vector.shape_cast %200 : vector<1x1x1x128xf32> to vector<1x128xf32>
    %202 = vector.broadcast %201 : vector<1x128xf32> to vector<128x128xf32>
    %203 = arith.addf %199, %202 : vector<128x128xf32>
    %cst_184 = arith.constant 0.000000e+00 : f32
    %204 = vector.broadcast %cst_184 : f32 to vector<128x128xf32>
    %205 = arith.maximumf %203, %204 : vector<128x128xf32>
    %206 = arith.truncf %205 : vector<128x128xf32> to vector<128x128xbf16>
    %c3_185 = arith.constant 3 : index
    %c0_186 = arith.constant 0 : index
    %c0_187 = arith.constant 0 : index
    %207 = vector.load %arg6[%c3_185, %c0_186, %c0_187] : memref<4x128x64xbf16, #tpu.memory_space<vmem>>, vector<1x128x64xbf16>
    %208 = vector.shape_cast %207 : vector<1x128x64xbf16> to vector<128x64xbf16>
    %cst_188 = arith.constant dense<0.000000e+00> : vector<128x64xf32>
    %209 = tpu.matmul %206, %208, %cst_188 {dimension_numbers = #tpu.dot_dimension_numbers<[1], [0], [0], [1], [0, 0, 1, 1], [], []>} : vector<128x128xbf16>, vector<128x64xbf16>, vector<128x64xf32> -> vector<128x64xf32>
    %cst_189 = arith.constant 0.000000e+00 : f32
    %210 = vector.broadcast %cst_189 : f32 to vector<128x64xf32>
    %211 = arith.maximumf %209, %210 : vector<128x64xf32>
    %212 = arith.truncf %211 : vector<128x64xf32> to vector<128x64xbf16>
    %c3_190 = arith.constant 3 : index
    %c0_191 = arith.constant 0 : index
    %c0_192 = arith.constant 0 : index
    %213 = vector.load %arg7[%c3_190, %c0_191, %c0_192] : memref<4x64x128xbf16, #tpu.memory_space<vmem>>, vector<1x64x128xbf16>
    %214 = vector.shape_cast %213 : vector<1x64x128xbf16> to vector<64x128xbf16>
    %cst_193 = arith.constant dense<0.000000e+00> : vector<128x128xf32>
    %215 = tpu.matmul %212, %214, %cst_193 {dimension_numbers = #tpu.dot_dimension_numbers<[1], [0], [0], [1], [0, 0, 1, 1], [], []>} : vector<128x64xbf16>, vector<64x128xbf16>, vector<128x128xf32> -> vector<128x128xf32>
    %216 = arith.addf %165, %215 : vector<128x128xf32>
    %c3_194 = arith.constant 3 : index
    %c0_195 = arith.constant 0 : index
    %c0_196 = arith.constant 0 : index
    %217 = vector.load %arg8[%c3_194, %c0_195, %c0_196] : memref<4x1x128xf32, #tpu.memory_space<vmem>>, vector<1x1x128xf32>
    %218 = vector.shape_cast %217 : vector<1x1x128xf32> to vector<1x128xf32>
    %219 = vector.broadcast %218 : vector<1x128xf32> to vector<128x128xf32>
    %220 = arith.addf %216, %219 : vector<128x128xf32>
    %c0_197 = arith.constant 0 : index
    %c0_198 = arith.constant 0 : index
    %221 = vector.load %arg9[%c0_197, %c0_198] : memref<128x128xf32, #tpu.memory_space<vmem>>, vector<128x128xf32>
    tpu.vector_store %arg9[%c0_197, %c0_198], %220 {strides = array<i32>} : memref<128x128xf32, #tpu.memory_space<vmem>>, vector<128x128xf32>,
    return
  }
  func.func @transform_0(%arg0: i32) -> (i32, i32) {
    %c0_i32 = arith.constant 0 : i32
    %c0_i32_0 = arith.constant 0 : i32
    return %arg0, %c0_i32 : i32, i32
  }
  func.func @transform_1(%arg0: i32) -> (i32, i32, i32) {
    %c0_i32 = arith.constant 0 : i32
    %c0_i32_0 = arith.constant 0 : i32
    %c0_i32_1 = arith.constant 0 : i32
    %c0_i32_2 = arith.constant 0 : i32
    return %c0_i32, %c0_i32_0, %c0_i32_1 : i32, i32, i32
  }
  func.func @transform_2(%arg0: i32) -> (i32, i32, i32) {
    %c0_i32 = arith.constant 0 : i32
    %c0_i32_0 = arith.constant 0 : i32
    %c0_i32_1 = arith.constant 0 : i32
    %c0_i32_2 = arith.constant 0 : i32
    return %c0_i32, %c0_i32_0, %c0_i32_1 : i32, i32, i32
  }
  func.func @transform_3(%arg0: i32) -> (i32, i32, i32, i32) {
    %c0_i32 = arith.constant 0 : i32
    %c0_i32_0 = arith.constant 0 : i32
    %c0_i32_1 = arith.constant 0 : i32
    %c0_i32_2 = arith.constant 0 : i32
    %c0_i32_3 = arith.constant 0 : i32
    return %c0_i32, %c0_i32_0, %c0_i32_1, %c0_i32_2 : i32, i32, i32, i32
  }
  func.func @transform_4(%arg0: i32) -> (i32, i32, i32, i32) {
    %c0_i32 = arith.constant 0 : i32
    %c0_i32_0 = arith.constant 0 : i32
    %c0_i32_1 = arith.constant 0 : i32
    %c0_i32_2 = arith.constant 0 : i32
    %c0_i32_3 = arith.constant 0 : i32
    return %c0_i32, %c0_i32_0, %c0_i32_1, %c0_i32_2 : i32, i32, i32, i32
  }
  func.func @transform_5(%arg0: i32) -> (i32, i32, i32) {
    %c0_i32 = arith.constant 0 : i32
    %c0_i32_0 = arith.constant 0 : i32
    %c0_i32_1 = arith.constant 0 : i32
    %c0_i32_2 = arith.constant 0 : i32
    return %c0_i32, %c0_i32_0, %c0_i32_1 : i32, i32, i32
  }
  func.func @transform_6(%arg0: i32) -> (i32, i32, i32) {
    %c0_i32 = arith.constant 0 : i32
    %c0_i32_0 = arith.constant 0 : i32
    %c0_i32_1 = arith.constant 0 : i32
    %c0_i32_2 = arith.constant 0 : i32
    return %c0_i32, %c0_i32_0, %c0_i32_1 : i32, i32, i32
  }
  func.func @transform_7(%arg0: i32) -> (i32, i32, i32) {
    %c0_i32 = arith.constant 0 : i32
    %c0_i32_0 = arith.constant 0 : i32
    %c0_i32_1 = arith.constant 0 : i32
    %c0_i32_2 = arith.constant 0 : i32
    return %c0_i32, %c0_i32_0, %c0_i32_1 : i32, i32, i32
  }
  func.func @transform_8(%arg0: i32) -> (i32, i32) {
    %c0_i32 = arith.constant 0 : i32
    %c0_i32_0 = arith.constant 0 : i32
    return %arg0, %c0_i32 : i32, i32
  }
}

</mosaic_0001>

<bundles_post_ra>
// kernel: tpu_custom_call.1
= control target key start
LH: loop header
LB: loop body
LE: loop exit
PB: predicated region body
PF: predicated region fallthrough
CT: control target
= control target key end

     0   :  { %s7758_s0 = inlined_call_operand.vmem [shape: f32[256,128], index: 0, kind: input, shape index: {}]   ;;  %s7759_s1 = inlined_call_operand.hbm [shape: bf16[4,128,128], index: 1, kind: input, shape index: {}]   ;;  %s7760_s2 = inlined_call_operand.hbm [shape: f32[4,1,128], index: 2, kind: input, shape index: {}]   ;;  %s7761_s3 = inlined_call_operand.hbm [shape: bf16[4,3,128,128], index: 3, kind: input, shape index: {}]   ;;  %s7762_s4 = inlined_call_operand.vmem [shape: f32[4,3,1,128], index: 4, kind: input, shape index: {}]   ;;  %s7763_s5 = inlined_call_operand.vmem [shape: bf16[4,128,64], index: 5, kind: input, shape index: {}]   ;;  %s7764_s6 = inlined_call_operand.vmem [shape: bf16[4,64,128], index: 6, kind: input, shape index: {}]   ;;  %s7765_s7 = inlined_call_operand.vmem [shape: f32[4,1,128], index: 7, kind: input, shape index: {}]   ;;  %s7766_s8 = inlined_call_operand.hbm [shape: f32[256,128], index: 8, kind: output, shape index: {}]  }
   0x1   :  { %7773 = sst [smem:[#allocation15_spill]] %s7760_s2 }
   0x2   :  { %13 = vsyncpa [#allocation3], 0 }
   0x3   :  { %14 = vsyncpa [#allocation6], 0 }
   0x4   :  { %15 = vsyncpa [#allocation4], 0 }
   0x5   :  { %17 = vsyncpa [#allocation4 + $0x1], 0  ;;  %s7057_s27 = smov 0   ;;  %s7059_s28 = smov 0  }
   0x6   :  { %s7061_s29 = smov 0   ;;  %s7063_s30 = smov 0  }
   0x7 LB: > { %7774 = sst [smem:[#allocation12_spill]] %s6996_s29  ;;  %s7078_s9 = sadd.s32 4294967295, %s7000_s30   ;;  %s7000_s30 = sphi %s7063_s30, %s7790_s30   ;;  %s6996_s29 = sphi %s7061_s29, %s7795_s29   ;;  %s6992_s28 = sphi %s7059_s28, %s7794_s28   ;;  %s6988_s27 = sphi %s7057_s27, %s7793_s27  }
   0x8   : > { %s5141_s10 = sadd.s32 4294967294, %s7000_s30   ;;  %s7082_s11 = sadd.s32 1, %s7000_s30  }
   0x9   : > { %7775 = sst [smem:[#allocation13_spill]] %s7082_s11  ;;  %s203_s12 = sadd.s32 1, %s6996_s29 }
   0xa   : > { %s200_s13 = ssub.s32 %s7000_s30, %s7082_s11  ;;  %p213_p0 = scmp.ne.s32.totalorder %s6996_s29, %s6992_s28 }
   0xb   : > { %p201_p1 = scmp.eq.s32.totalorder %s200_s13, 0  ;;  %p214_p2 = scmp.eq.s32.totalorder %s7078_s9, 1 }
   0xc   : > { %p219_p3 = scmp.ne.s32.totalorder %s6992_s28, %s6988_s27  ;;  %p220_p4 = scmp.eq.s32.totalorder %s5141_s10, 1 }
   0xd   : > { %s7093_s14 = scalar_select %p201_p1, %s6996_s29, %s203_s12  }
   0xe   : > { %p7095_p5 = por %p214_p2, %p213_p0  ;;  %p7099_p6 = por %p220_p4, %p219_p3 }
   0xf   : > { %7776 = sst [smem:[#allocation14_spill]] %s7093_s14  ;;  %p5142_p7 = scmp.ge.s32.totalorder %s7000_s30, 1 }
  0x10   : > { %s7777_s15 = scalar_select %p7095_p5, 1, 0 }
  0x11   : > { %s7778_s16 = scalar_select %p7099_p6, 1, 0 }
  0x12   : > { %p227_p8 = scmp.lt.s32.totalorder %s7000_s30, 3  ;;  %p7767_p9 = scmp.eq.s32.totalorder %s7078_s9, 0 }
  0x13   : > { %s7002_s18 = smov [#allocation5]   ;;  %s7003_s21 = smov [#allocation2]  }
  0x14   : > { %p7106_p10 = pnand %p5142_p7, %p227_p8  ;;  %s252_s19 = sshll.u32 %s7002_s18, 4  ;;  %s253_s19 = int_to_ptr.vmem [resolvable:$true] %s252_s19 }
  0x15   : > { %s239_s22 = sshll.u32 %s7003_s21, 4  ;;  %s7781_s2 = sld [smem:[#allocation15_spill]]  ;;  %s7118_s22 = int_to_ptr.vmem [resolvable:$true] %s239_s22 }
  0x16   : > { %s7779_s17 = scalar_select %p7106_p10, 1, 0 }
  0x17   : > { %p6592_p11 = pneg %p7106_p10 }
  0x19   : > { %p7114_p12 = pnand %p7767_p9, %p6592_p11 }
  0x1b   : > { %s6846_s25 = scalar_lea.hbm %s7781_s2, 64  ;;  %p7128_p0 = pneg %p7114_p12 }
  0x1c   : > { %p6847_p13 = scmp.ne.s32.totalorder %s7781_s2, %s6846_s25  ;;  %p6853_p3 = scmp.lt.u32.totalorder %s6846_s25, %s7781_s2 }
  0x1e   : > { %p6849_p1 = pnand %p7128_p0, %p6847_p13 }
  0x20   : > { %p6850_p2 = pneg %p6849_p1 }
  0x22   : > { %p6855_p4 = pnand %p6853_p3, %p6850_p2 }
  0x24   : > { %6858 = shalt.err (!%p6855_p4)
}
  0x25   : > { %s6859_s21 = scalar_lea.vmem %s253_s19, 64  ;;  %p6867_p9 = scmp.lt.s32.totalorder %s253_s19, %s253_s19 }
  0x26   : > { %p6860_p7 = scmp.ne.s32.totalorder %s253_s19, %s6859_s21  ;;  %p6868_p6 = scmp.lt.s32.totalorder %s6859_s21, %s6859_s21 }
  0x28   : > { %p6862_p8 = pnand %p6860_p7, %p7128_p0  ;;  %p6869_p5 = por %p6868_p6, %p6867_p9 }
  0x2a   : > { %p6863_p11 = pneg %p6862_p8 }
  0x2c   : > { %p6870_p10 = pnand %p6869_p5, %p6863_p11 }
  0x2e   : > { %6873 = shalt.err (!%p6870_p10)
}
  0x2f   : > { %s7004_s23 = smov 16   ;;  %s7005_s24 = smov 1  }
  0x30   : > { %6598 = dma.hbm_to_vmem [thread:$0]  (!%p7114_p12), %s7781_s2, 64, %s253_s19, [#allocation6], %s7004_s23, %s7004_s23, %s7005_s24  }
  0x31   : > { %s6874_s18 = scalar_lea.hbm %s7759_s1, 4096 }
  0x32   : > { %p6875_p13 = scmp.ne.s32.totalorder %s7759_s1, %s6874_s18  ;;  %p6881_p9 = scmp.lt.u32.totalorder %s6874_s18, %s7759_s1 }
  0x34   : > { %p6877_p5 = pnand %p6875_p13, %p7128_p0 }
  0x36   : > { %p6878_p6 = pneg %p6877_p5 }
  0x38   : > { %p6883_p10 = pnand %p6881_p9, %p6878_p6 }
  0x3a   : > { %6886 = shalt.err (!%p6883_p10)
}
  0x3b   : > { %s6887_s19 = scalar_lea.vmem %s7118_s22, 4096  ;;  %p6895_p4 = scmp.lt.s32.totalorder %s7118_s22, %s7118_s22 }
  0x3c   : > { %p6888_p1 = scmp.ne.s32.totalorder %s7118_s22, %s6887_s19  ;;  %p6896_p7 = scmp.lt.s32.totalorder %s6887_s19, %s6887_s19 }
  0x3e   : > { %p6890_p2 = pnand %p6888_p1, %p7128_p0  ;;  %p6897_p8 = por %p6896_p7, %p6895_p4 }
  0x40   : > { %p6891_p3 = pneg %p6890_p2 }
  0x42   : > { %p6898_p11 = pnand %p6897_p8, %p6891_p3 }
  0x44   : > { %6901 = shalt.err (!%p6898_p11)
}
  0x45   : > { %s7006_s29 = smov 64   ;;  %s7007_s11 = smov 4  }
  0x46   : > { %6595 = dma.hbm_to_vmem [thread:$0]  (!%p7114_p12), %s7759_s1, 4096, %s7118_s22, [#allocation3], %s7006_s29, %s7006_s29, %s7007_s11  }
  0x47   : > { %s7008_s24 = smov [#allocation7]   ;;  %s6902_s13 = scalar_lea.hbm %s7761_s3, 12288 }
  0x48   : > { %s265_s26 = sshll.u32 %s7008_s24, 4  ;;  %p6903_p13 = scmp.ne.s32.totalorder %s7761_s3, %s6902_s13  ;;  %s266_s26 = int_to_ptr.vmem [resolvable:$true] %s265_s26 }
  0x49   : > { %p6909_p9 = scmp.lt.u32.totalorder %s6902_s13, %s7761_s3 }
  0x4a   : > { %p6905_p5 = pnand %p6903_p13, %p7128_p0 }
  0x4c   : > { %p6906_p6 = pneg %p6905_p5 }
  0x4e   : > { %p6911_p10 = pnand %p6909_p9, %p6906_p6 }
  0x50   : > { %6914 = shalt.err (!%p6911_p10)
}
  0x51   : > { %s6915_s22 = scalar_lea.vmem %s266_s26, 12288  ;;  %p6923_p4 = scmp.lt.s32.totalorder %s266_s26, %s266_s26 }
  0x52   : > { %p6916_p1 = scmp.ne.s32.totalorder %s266_s26, %s6915_s22  ;;  %p6924_p7 = scmp.lt.s32.totalorder %s6915_s22, %s6915_s22 }
  0x54   : > { %p6918_p2 = pnand %p6916_p1, %p7128_p0  ;;  %p6925_p8 = por %p6924_p7, %p6923_p4 }
  0x56   : > { %p6919_p3 = pneg %p6918_p2 }
  0x58   : > { %p6926_p11 = pnand %p6925_p8, %p6919_p3 }
  0x5a   : > { %6929 = shalt.err (!%p6926_p11)
}
  0x5b   : > { %6601 = dma.hbm_to_vmem [thread:$0]  (!%p7114_p12), %s7761_s3, 12288, %s266_s26, [#allocation6], %s7006_s29, %s7006_s29, %s7007_s11  }
  0x5c   : > { %p7783_p13 = scmp.ne.s32.totalorder %s7779_s17, 0 }
  0x5d   : > { %p7784_p5 = scmp.eq.s32.totalorder (!%p7783_p13), %s7078_s9, 0 }
  0x5e   : > { %302 = sbr.rel (%p7783_p13) target bundleno = 5495 (0x1577), region = 52 }
  0x65   : > { %6975 = dma.done.wait (%p7784_p5), [#allocation3], 4096   ;;  %p7785_p0 = pmov %p7784_p5 }
  0x67   : > { %6977 = vsyncadd (%p7785_p0), [#allocation3], 4294963200  ;;  %p7786_p6 = pmov %p7785_p0 }
  0x68   : > { %p7787_p9 = pmov %p7785_p0 }
  0x69   : > { %6979 = dma.done.wait (%p7786_p6), [#allocation6], 12352  }
  0x6a   : > { %6981 = vsyncadd (%p7787_p9), [#allocation6], 4294954944  ;;  %s5152_s2 = sshll.u32 %s7078_s9, 4  ;;  %v6654_v0 = vld [vmem:[#allocation2] sm:$0xff]   ;;  %v6655_v1 = vld [vmem:[#allocation2 + $0x8] sm:$0xff]   ;;  %vm1365_vm0 = vcmask 523264  }
  0x6b   : > { %p345_p10 = scmp.lt.s32.totalorder %s5152_s2, 31  ;;  %5842 = vmatprep.subr.bf16.mxu0 %v6654_v0  ;;  %v6656_v2 = vld [vmem:[#allocation2 + $0x10] sm:$0xff]   ;;  %v6657_v3 = vld [vmem:[#allocation2 + $0x18] sm:$0xff]   ;;  %v6658_v7 = vld [vmem:[#allocation2 + $0x20] sm:$0xff]   ;;  %s341_s19 = sand.u32 1, %s6992_s28  }
  0x6c   : > { %5843 = vmatpush3.bf16.msra.mxu0 %v6654_v0  ;;  %v6662_v8 = vld [vmem:[#allocation7] sm:$0xff]   ;;  %v6663_v9 = vld [vmem:[#allocation7 + $0x8] sm:$0xff]   ;;  %v6664_v11 = vld [vmem:[#allocation7 + $0x10] sm:$0xff]   ;;  %s5151_s22 = sshll.u32 %s341_s19, 7  ;;  %p7788_p1 = scmp.ne.s32.totalorder %s7777_s15, 0 }
  0x6d   : > { %s7797_s2 = smov (!%p345_p10, %s5152_s2), 31  ;;  %5844 = vmatprep.subr.bf16.mxu0 %v6655_v1  ;;  %v6659_v10 = vld [vmem:[#allocation2 + $0x28] sm:$0xff]   ;;  %5874 = vmatprep.subr.bf16.mxu1 %v6662_v8  ;;  %v6660_v12 = vld [vmem:[#allocation2 + $0x30] sm:$0xff]   ;;  %v6665_v13 = vld [vmem:[#allocation7 + $0x18] sm:$0xff]   ;;  %s7009_s26 = smov [#allocation8]  }
  0x6e   : > { %s5153_s17 = sshll.u32 %s7797_s2, 3  ;;  %5875 = vmatpush3.bf16.msra.mxu1 %v6662_v8  ;;  %v6661_v14 = vld [vmem:[#allocation2 + $0x38] sm:$0xff]   ;;  %v6666_v15 = vld [vmem:[#allocation7 + $0x20] sm:$0xff]   ;;  %v6667_v20 = vld [vmem:[#allocation7 + $0x28] sm:$0xff]   ;;  %s7662_s2 = scalar_lea.vmem [#allocation8], %s5151_s22 }
  0x6f   : > { %s7199_s29 = scalar_lea.vmem %s7758_s0, %s5153_s17  ;;  %5876 = vmatprep.subr.bf16.mxu1 %v6663_v9  ;;  %v6668_v38 = vld [vmem:[#allocation7 + $0x30] sm:$0xff]   ;;  %v6669_v39 = vld [vmem:[#allocation7 + $0x38] sm:$0xff]   ;;  %v6670_v40 = vld [vmem:[#allocation7 + $0x40] sm:$0xff]   ;;  %s5473_s17 = sshll.u32 %s7078_s9, 11 }
  0x70   : > { %5845 = vmatpush3.bf16.msra.mxu0 %v6655_v1  ;;  %v352_v4 = vld [vmem:[%s7199_s29] sm:$0xff]  ;;  %v353_v5 = vld [vmem:[%s7199_s29 + $0x8] sm:$0xff]  ;;  %v354_v16 = vld [vmem:[%s7199_s29 + $0x10] sm:$0xff]  ;;  %s5048_s20 = sshll.u32 %s7662_s2, 4  ;;  %s7707_s11 = scalar_lea.hbm %s7766_s8, %s5473_s17  ;;  %s7709_s20 = int_to_ptr.vmem [resolvable:$true] %s5048_s20 }
  0x71   : > { %5846 = vmatprep.subr.bf16.mxu0 %v6656_v2  ;;  %v368_v6 = vpack.c.bf16 %v353_v5, %v352_v4  ;;  %v355_v17 = vld [vmem:[%s7199_s29 + $0x18] sm:$0xff]  ;;  %v356_v18 = vld [vmem:[%s7199_s29 + $0x20] sm:$0xff]  ;;  %v357_v19 = vld [vmem:[%s7199_s29 + $0x28] sm:$0xff]  ;;  %s7717_s9 = scalar_lea.sflag [#allocation4], %s341_s19  ;;  %s6930_s24 = scalar_lea.vmem %s7709_s20, 2048 }
  0x72   : > { %5877 = vmatpush3.bf16.msra.mxu1 %v6663_v9  ;;  %v369_v21 = vpack.c.bf16 %v355_v17, %v354_v16  ;;  %v370_v22 = vpack.c.bf16 %v357_v19, %v356_v18  ;;  %v358_v23 = vld [vmem:[%s7199_s29 + $0x30] sm:$0xff]  ;;  %v359_v24 = vld [vmem:[%s7199_s29 + $0x38] sm:$0xff]  ;;  %v360_v25 = vld [vmem:[%s7199_s29 + $0x40] sm:$0xff]  ;;  %p6931_p12 = scmp.ne.s32.totalorder %s7709_s20, %s6930_s24  ;;  %s6934_s25 = sshll.u32 %s7009_s26, 4  ;;  %s6935_s25 = int_to_ptr.vmem [resolvable:$false] %s6934_s25 }
  0x73   : > { %5858 = vmatprep.mubr.bf16.mxu0 %v368_v6  ;;  %5878 = vmatprep.subr.bf16.mxu1 %v6664_v11  ;;  %v361_v26 = vld [vmem:[%s7199_s29 + $0x48] sm:$0xff]  ;;  %v371_v27 = vpack.c.bf16 %v359_v24, %v358_v23  ;;  %v362_v29 = vld [vmem:[%s7199_s29 + $0x50] sm:$0xff]  ;;  %v363_v30 = vld [vmem:[%s7199_s29 + $0x58] sm:$0xff]  ;;  %s6936_s10 = scalar_lea.vmem %s6935_s25, 4096  ;;  %p6937_p4 = scmp.lt.s32.totalorder %s7709_s20, %s6935_s25 }
  0x74   : > { %5847 = vmatpush3.bf16.msra.mxu0 %v6656_v2  ;;  %v372_v28 = vpack.c.bf16 %v361_v26, %v360_v25  ;;  %v364_v31 = vld [vmem:[%s7199_s29 + $0x60] sm:$0xff]  ;;  %v365_v32 = vld [vmem:[%s7199_s29 + $0x68] sm:$0xff]  ;;  %v373_v33 = vpack.c.bf16 %v363_v30, %v362_v29  ;;  %v366_v35 = vld [vmem:[%s7199_s29 + $0x70] sm:$0xff]  ;;  %p6932_p2 = pnand %p6931_p12, %p7788_p1  ;;  %p6938_p7 = scmp.lt.s32.totalorder %s6936_s10, %s6930_s24 }
  0x75   : > { %5848 = vmatprep.subr.bf16.mxu0 %v6657_v3  ;;  %v374_v34 = vpack.c.bf16 %v365_v32, %v364_v31  ;;  %v367_v36 = vld [vmem:[%s7199_s29 + $0x78] sm:$0xff]  ;;  %v6671_v41 = vld [vmem:[#allocation7 + $0x48] sm:$0xff]   ;;  %v6674_v44 = vld [vmem:[#allocation7 + $0x60] sm:$0xff]  }
  0x76   : > { %5879 = vmatpush3.bf16.msra.mxu1 %v6664_v11  ;;  %v375_v37 = vpack.c.bf16 %v367_v36, %v366_v35  ;;  %v6672_v42 = vld [vmem:[#allocation7 + $0x50] sm:$0xff]   ;;  %v6673_v43 = vld [vmem:[#allocation7 + $0x58] sm:$0xff]   ;;  %v6675_v45 = vld [vmem:[#allocation7 + $0x68] sm:$0xff]   ;;  %p6933_p3 = pneg %p6932_p2  ;;  %p6939_p8 = por %p6938_p7, %p6937_p4 }
  0x77   : > { %5880 = vmatprep.subr.bf16.mxu1 %v6665_v13  ;;  %v5154_v46 = vld [vmem:[#allocation5] ss:$0 sm:$0xff] }
  0x78   : > { %5849 = vmatpush3.bf16.msra.mxu0 %v6657_v3  ;;  %p6940_p11 = pnand %p6939_p8, %p6933_p3 }
  0x79   : > { %5850 = vmatprep.subr.bf16.mxu0 %v6658_v7 }
  0x7a   : > { %5881 = vmatpush3.bf16.msra.mxu1 %v6665_v13 }
  0x7b   : > { %5882 = vmatprep.subr.bf16.mxu1 %v6666_v15 }
  0x7c   : > { %5851 = vmatpush3.bf16.msra.mxu0 %v6658_v7 }
  0x7d   : > { %5852 = vmatprep.subr.bf16.mxu0 %v6659_v10 }
  0x7e   : > { %5883 = vmatpush3.bf16.msra.mxu1 %v6666_v15 }
  0x7f   : > { %5884 = vmatprep.subr.bf16.mxu1 %v6667_v20 }
  0x80   : > { %5853 = vmatpush3.bf16.msra.mxu0 %v6659_v10 }
  0x81   : > { %5854 = vmatprep.subr.bf16.mxu0 %v6660_v12 }
  0x82   : > { %5885 = vmatpush3.bf16.msra.mxu1 %v6667_v20 }
  0x83   : > { %5886 = vmatprep.subr.bf16.mxu1 %v6668_v38 }
  0x84   : > { %5855 = vmatpush3.bf16.msra.mxu0 %v6660_v12 }
  0x85   : > { %5856 = vmatprep.subr.bf16.mxu0 %v6661_v14 }
  0x86   : > { %5887 = vmatpush3.bf16.msra.mxu1 %v6668_v38 }
  0x87   : > { %5888 = vmatprep.subr.bf16.mxu1 %v6669_v39 }
  0x88   : > { %5857 = vmatpush3.bf16.msra.mxu0 %v6661_v14 }
  0x89   : > { %5906 = vmatprep.subr.bf16.mxu0 %v6670_v40 }
  0x8a   : > { %5889 = vmatpush3.bf16.msra.mxu1 %v6669_v39  ;;  %v6676_v39 = vld [vmem:[#allocation7 + $0x70] sm:$0xff]  }
  0x8b   : > { %5859 = vmatmul.mubr.bf16.vlgmr.msra.gmra.mrb[0].mxu0 %v369_v21 }
  0x8c   : > { %5862 = vmatprep.mubr.bf16.mxu0 %v370_v22  ;;  %5907 = vmatpush3.bf16.msra.mxu0 %v6670_v40  ;;  %v6677_v40 = vld [vmem:[#allocation7 + $0x78] sm:$0xff]  }
  0x8d   : > { %5908 = vmatprep.subr.bf16.mxu0 %v6671_v41 }
  0x90   : > { %5909 = vmatpush3.bf16.msra.mxu0 %v6671_v41  ;;  %v6678_v41 = vld [vmem:[#allocation7 + $0x80] sm:$0xff]  }
  0x91   : > { %5910 = vmatprep.subr.bf16.mxu0 %v6672_v42  ;;  %5938 = vmatprep.subr.bf16.mxu1 %v6678_v41 }
  0x93   : > { %5863 = vmatmul.mubr.bf16.gmra.mrb[4].mxu0 %v371_v27 }
  0x94   : > { %5866 = vmatprep.mubr.bf16.mxu0 %v372_v28  ;;  %5911 = vmatpush3.bf16.msra.mxu0 %v6672_v42  ;;  %v6679_v42 = vld [vmem:[#allocation7 + $0x88] sm:$0xff]  }
  0x95   : > { %5912 = vmatprep.subr.bf16.mxu0 %v6673_v43 }
  0x98   : > { %5913 = vmatpush3.bf16.msra.mxu0 %v6673_v43  ;;  %v6680_v43 = vld [vmem:[#allocation7 + $0x90] sm:$0xff]  }
  0x99   : > { %5914 = vmatprep.subr.bf16.mxu0 %v6674_v44 }
  0x9b   : > { %5867 = vmatmul.mubr.bf16.gmra.mrb[8].mxu0 %v373_v33 }
  0x9c   : > { %5870 = vmatprep.mubr.bf16.mxu0 %v374_v34  ;;  %5915 = vmatpush3.bf16.msra.mxu0 %v6674_v44  ;;  %v6681_v44 = vld [vmem:[#allocation7 + $0x98] sm:$0xff]  }
  0x9d   : > { %5916 = vmatprep.subr.bf16.mxu0 %v6675_v45 }
  0xa0   : > { %5917 = vmatpush3.bf16.msra.mxu0 %v6675_v45  ;;  %v6682_v45 = vld [vmem:[#allocation7 + $0xa0] sm:$0xff]  }
  0xa1   : > { %5918 = vmatprep.subr.bf16.mxu0 %v6676_v39 }
  0xa3   : > { %5871 = vmatmul.mubr.bf16.gmra.mrb[12].mxu0 %v375_v37 }
  0xa4   : > { %5919 = vmatpush3.bf16.msra.mxu0 %v6676_v39 }
  0xa5   : > { %5920 = vmatprep.subr.bf16.mxu0 %v6677_v40 }
  0xa8   : > { %5921 = vmatpush3.bf16.msra.mxu0 %v6677_v40  ;;  %v6684_v40 = vld [vmem:[#allocation7 + $0xb0] sm:$0xff]  }
 0x15e   : > { %v5860_v47 = vpop.f32.mrb[0].mxu0 }
 0x15f   : > { %v490_v48 = vadd.f32 %v5860_v47, %v5154_v46  ;;  %v481_v49 = vpop.f32.mrb[1].mxu0  ;;  %v5163_v47 = vld [vmem:[%s7762_s4] ss:$0 sm:$0xff] }
 0x160   : > { %v482_v50 = vadd.f32 %v5154_v46, %v481_v49  ;;  %v5861_v51 = vpop.f32.mrb[2].mxu0 }
 0x161   : > { %v493_v52 = vadd.f32 %v5861_v51, %v5154_v46  ;;  %v484_v53 = vpop.f32.mrb[3].mxu0  ;;  %v546_v55 = vmax.f32 %v490_v48, 0.0 }
 0x162   : > { %v485_v54 = vadd.f32 %v5154_v46, %v484_v53  ;;  %v544_v57 = vmax.f32 %v482_v50, 0.0 }
 0x163   : > { %v547_v56 = vmax.f32 %v493_v52, 0.0 }
 0x164   : > { %v545_v58 = vmax.f32 %v485_v54, 0.0 }
 0x165   : > { %v561_v59 = vpack.c.bf16 %v547_v56, %v546_v55 }
 0x166   : > { %v5864_v60 = vpop.f32.mrb[4].mxu0  ;;  %v560_v61 = vpack.c.bf16 %v545_v58, %v544_v57 }
 0x167   : > { %v506_v62 = vadd.f32 %v5864_v60, %v5154_v46  ;;  %v497_v63 = vpop.f32.mrb[5].mxu0 }
 0x168   : > { %v498_v0 = vadd.f32 %v5154_v46, %v497_v63  ;;  %v5865_v1 = vpop.f32.mrb[6].mxu0  ;;  %5890 = vmatprep.mubr.bf16.mxu1 %v560_v61 }
 0x169   : > { %v509_v2 = vadd.f32 %v5865_v1, %v5154_v46  ;;  %v500_v3 = vpop.f32.mrb[7].mxu0  ;;  %5891 = vmatmul.mubr.bf16.vlgmr.msra.gmra.mrb[0].mxu1 %v561_v59  ;;  %v550_v5 = vmax.f32 %v506_v62, 0.0 }
 0x16a   : > { %v501_v4 = vadd.f32 %v5154_v46, %v500_v3  ;;  %v548_v7 = vmax.f32 %v498_v0, 0.0  ;;  %5939 = vmatpush3.bf16.msra.mxu1 %v6678_v41  ;;  %v6685_v41 = vld [vmem:[#allocation7 + $0xb8] sm:$0xff]  }
 0x16b   : > { %v551_v6 = vmax.f32 %v509_v2, 0.0  ;;  %5940 = vmatprep.subr.bf16.mxu1 %v6679_v42 }
 0x16c   : > { %v549_v8 = vmax.f32 %v501_v4, 0.0 }
 0x16d   : > { %v563_v9 = vpack.c.bf16 %v551_v6, %v550_v5 }
 0x16e   : > { %v562_v10 = vpack.c.bf16 %v549_v8, %v548_v7  ;;  %v5868_v11 = vpop.f32.mrb[8].mxu0  ;;  %5941 = vmatpush3.bf16.msra.mxu1 %v6679_v42  ;;  %v6686_v42 = vld [vmem:[%s7763_s5] sm:$0xff]  }
 0x16f   : > { %v522_v12 = vadd.f32 %v5868_v11, %v5154_v46  ;;  %v513_v13 = vpop.f32.mrb[9].mxu0  ;;  %5942 = vmatprep.subr.bf16.mxu1 %v6680_v43  ;;  %5970 = vmatprep.subr.bf16.mxu0 %v6686_v42 }
 0x170   : > { %v514_v14 = vadd.f32 %v5154_v46, %v513_v13  ;;  %v5869_v15 = vpop.f32.mrb[10].mxu0  ;;  %5894 = vmatprep.mubr.bf16.mxu1 %v562_v10 }
 0x171   : > { %v525_v16 = vadd.f32 %v5869_v15, %v5154_v46  ;;  %v516_v17 = vpop.f32.mrb[11].mxu0  ;;  %5895 = vmatmul.mubr.bf16.gmra.mrb[4].mxu1 %v563_v9  ;;  %v554_v19 = vmax.f32 %v522_v12, 0.0 }
 0x172   : > { %v517_v18 = vadd.f32 %v5154_v46, %v516_v17  ;;  %v552_v21 = vmax.f32 %v514_v14, 0.0  ;;  %5943 = vmatpush3.bf16.msra.mxu1 %v6680_v43  ;;  %v6687_v43 = vld [vmem:[%s7763_s5 + $0x8] sm:$0xff]  }
 0x173   : > { %v555_v20 = vmax.f32 %v525_v16, 0.0  ;;  %5944 = vmatprep.subr.bf16.mxu1 %v6681_v44 }
 0x174   : > { %v553_v22 = vmax.f32 %v517_v18, 0.0 }
 0x175   : > { %v565_v23 = vpack.c.bf16 %v555_v20, %v554_v19 }
 0x176   : > { %v564_v24 = vpack.c.bf16 %v553_v22, %v552_v21  ;;  %v5872_v25 = vpop.f32.mrb[12].mxu0  ;;  %5945 = vmatpush3.bf16.msra.mxu1 %v6681_v44  ;;  %v6688_v44 = vld [vmem:[%s7763_s5 + $0x10] sm:$0xff]  }
 0x177   : > { %v538_v26 = vadd.f32 %v5872_v25, %v5154_v46  ;;  %v529_v27 = vpop.f32.mrb[13].mxu0  ;;  %5946 = vmatprep.subr.bf16.mxu1 %v6682_v45 }
 0x178   : > { %v530_v28 = vadd.f32 %v5154_v46, %v529_v27  ;;  %v5873_v29 = vpop.f32.mrb[14].mxu0  ;;  %5898 = vmatprep.mubr.bf16.mxu1 %v564_v24 }
 0x179   : > { %v541_v30 = vadd.f32 %v5873_v29, %v5154_v46  ;;  %v532_v31 = vpop.f32.mrb[15].mxu0  ;;  %5899 = vmatmul.mubr.bf16.gmra.mrb[8].mxu1 %v565_v23  ;;  %v558_v33 = vmax.f32 %v538_v26, 0.0 }
 0x17a   : > { %v533_v32 = vadd.f32 %v5154_v46, %v532_v31  ;;  %v556_v35 = vmax.f32 %v530_v28, 0.0  ;;  %v6683_v46 = vld [vmem:[#allocation7 + $0xa8] sm:$0xff]   ;;  %5947 = vmatpush3.bf16.msra.mxu1 %v6682_v45  ;;  %v6689_v45 = vld [vmem:[%s7763_s5 + $0x18] sm:$0xff]  }
 0x17b   : > { %v559_v34 = vmax.f32 %v541_v30, 0.0  ;;  %5948 = vmatprep.subr.bf16.mxu1 %v6683_v46 }
 0x17c   : > { %v557_v36 = vmax.f32 %v533_v32, 0.0 }
 0x17d   : > { %v567_v37 = vpack.c.bf16 %v559_v34, %v558_v33 }
 0x17e   : > { %v566_v38 = vpack.c.bf16 %v557_v36, %v556_v35  ;;  %5949 = vmatpush3.bf16.msra.mxu1 %v6683_v46  ;;  %v6690_v46 = vld [vmem:[%s7763_s5 + $0x20] sm:$0xff]  }
 0x17f   : > { %5950 = vmatprep.subr.bf16.mxu1 %v6684_v40 }
 0x180   : > { %5902 = vmatprep.mubr.bf16.mxu1 %v566_v38 }
 0x181   : > { %5903 = vmatmul.mubr.bf16.gmra.mrb[12].mxu1 %v567_v37 }
 0x182   : > { %5951 = vmatpush3.bf16.msra.mxu1 %v6684_v40 }
 0x183   : > { %5952 = vmatprep.subr.bf16.mxu1 %v6685_v41 }
 0x186   : > { %5953 = vmatpush3.bf16.msra.mxu1 %v6685_v41  ;;  %v6692_v41 = vld [vmem:[%s7763_s5 + $0x30] sm:$0xff]  }
 0x23c   : > { %v5892_v48 = vpop.f32.mrb[0].mxu1 }
 0x23d   : > { %v682_v49 = vadd.f32 %v5892_v48, %v5163_v47  ;;  %v673_v50 = vpop.f32.mrb[1].mxu1  ;;  %v5173_v48 = vld [vmem:[%s7762_s4 + $0x1] ss:$0 sm:$0xff] }
 0x23e   : > { %v674_v51 = vadd.f32 %v5163_v47, %v673_v50  ;;  %v5893_v52 = vpop.f32.mrb[2].mxu1 }
 0x23f   : > { %v685_v53 = vadd.f32 %v5893_v52, %v5163_v47  ;;  %v676_v54 = vpop.f32.mrb[3].mxu1  ;;  %v738_v56 = vmax.f32 %v682_v49, 0.0 }
 0x240   : > { %v677_v55 = vadd.f32 %v5163_v47, %v676_v54  ;;  %v736_v58 = vmax.f32 %v674_v51, 0.0 }
 0x241   : > { %v739_v57 = vmax.f32 %v685_v53, 0.0 }
 0x242   : > { %v737_v59 = vmax.f32 %v677_v55, 0.0 }
 0x243   : > { %v753_v60 = vpack.c.bf16 %v739_v57, %v738_v56 }
 0x244   : > { %v752_v61 = vpack.c.bf16 %v737_v59, %v736_v58  ;;  %v5896_v62 = vpop.f32.mrb[4].mxu1 }
 0x245   : > { %v698_v63 = vadd.f32 %v5896_v62, %v5163_v47  ;;  %v689_v0 = vpop.f32.mrb[5].mxu1 }
 0x246   : > { %v690_v1 = vadd.f32 %v5163_v47, %v689_v0  ;;  %v5897_v2 = vpop.f32.mrb[6].mxu1  ;;  %5922 = vmatprep.mubr.bf16.mxu0 %v752_v61 }
 0x247   : > { %v701_v3 = vadd.f32 %v5897_v2, %v5163_v47  ;;  %v692_v4 = vpop.f32.mrb[7].mxu1  ;;  %5923 = vmatmul.mubr.bf16.vlgmr.msra.gmra.mrb[16].mxu0 %v753_v60  ;;  %v742_v6 = vmax.f32 %v698_v63, 0.0 }
 0x248   : > { %v693_v5 = vadd.f32 %v5163_v47, %v692_v4  ;;  %v740_v8 = vmax.f32 %v690_v1, 0.0  ;;  %5971 = vmatpush3.bf16.msra.mxu0 %v6686_v42  ;;  %v6693_v42 = vld [vmem:[%s7763_s5 + $0x38] sm:$0xff]  }
 0x249   : > { %v743_v7 = vmax.f32 %v701_v3, 0.0  ;;  %5972 = vmatprep.subr.bf16.mxu0 %v6687_v43 }
 0x24a   : > { %v741_v9 = vmax.f32 %v693_v5, 0.0 }
 0x24b   : > { %v755_v10 = vpack.c.bf16 %v743_v7, %v742_v6 }
 0x24c   : > { %v754_v11 = vpack.c.bf16 %v741_v9, %v740_v8  ;;  %v5900_v12 = vpop.f32.mrb[8].mxu1  ;;  %5973 = vmatpush3.bf16.msra.mxu0 %v6687_v43  ;;  %v6694_v43 = vld [vmem:[%s7764_s6] sm:$0xff]  }
 0x24d   : > { %v714_v13 = vadd.f32 %v5900_v12, %v5163_v47  ;;  %v705_v14 = vpop.f32.mrb[9].mxu1  ;;  %5974 = vmatprep.subr.bf16.mxu0 %v6688_v44  ;;  %6002 = vmatprep.subr.bf16.mxu1 %v6694_v43 }
 0x24e   : > { %v706_v15 = vadd.f32 %v5163_v47, %v705_v14  ;;  %v5901_v16 = vpop.f32.mrb[10].mxu1  ;;  %5926 = vmatprep.mubr.bf16.mxu0 %v754_v11 }
 0x24f   : > { %v717_v17 = vadd.f32 %v5901_v16, %v5163_v47  ;;  %v708_v18 = vpop.f32.mrb[11].mxu1  ;;  %5927 = vmatmul.mubr.bf16.gmra.mrb[20].mxu0 %v755_v10  ;;  %v746_v20 = vmax.f32 %v714_v13, 0.0 }
 0x250   : > { %v709_v19 = vadd.f32 %v5163_v47, %v708_v18  ;;  %v744_v22 = vmax.f32 %v706_v15, 0.0  ;;  %5975 = vmatpush3.bf16.msra.mxu0 %v6688_v44  ;;  %v6695_v44 = vld [vmem:[%s7764_s6 + $0x8] sm:$0xff]  }
 0x251   : > { %v747_v21 = vmax.f32 %v717_v17, 0.0  ;;  %5976 = vmatprep.subr.bf16.mxu0 %v6689_v45 }
 0x252   : > { %v745_v23 = vmax.f32 %v709_v19, 0.0 }
 0x253   : > { %v757_v24 = vpack.c.bf16 %v747_v21, %v746_v20 }
 0x254   : > { %v756_v25 = vpack.c.bf16 %v745_v23, %v744_v22  ;;  %v5904_v26 = vpop.f32.mrb[12].mxu1  ;;  %5977 = vmatpush3.bf16.msra.mxu0 %v6689_v45  ;;  %v6696_v45 = vld [vmem:[%s7764_s6 + $0x10] sm:$0xff]  }
 0x255   : > { %v730_v27 = vadd.f32 %v5904_v26, %v5163_v47  ;;  %v721_v28 = vpop.f32.mrb[13].mxu1  ;;  %5978 = vmatprep.subr.bf16.mxu0 %v6690_v46 }
 0x256   : > { %v722_v29 = vadd.f32 %v5163_v47, %v721_v28  ;;  %v5905_v30 = vpop.f32.mrb[14].mxu1  ;;  %5930 = vmatprep.mubr.bf16.mxu0 %v756_v25 }
 0x257   : > { %v733_v31 = vadd.f32 %v5905_v30, %v5163_v47  ;;  %v724_v32 = vpop.f32.mrb[15].mxu1  ;;  %5931 = vmatmul.mubr.bf16.gmra.mrb[24].mxu0 %v757_v24  ;;  %v750_v34 = vmax.f32 %v730_v27, 0.0 }
 0x258   : > { %v725_v33 = vadd.f32 %v5163_v47, %v724_v32  ;;  %v748_v36 = vmax.f32 %v722_v29, 0.0  ;;  %v6691_v47 = vld [vmem:[%s7763_s5 + $0x28] sm:$0xff]   ;;  %5979 = vmatpush3.bf16.msra.mxu0 %v6690_v46  ;;  %v5183_v46 = vld [vmem:[%s7762_s4 + $0x2] ss:$0 sm:$0xff] }
 0x259   : > { %v751_v35 = vmax.f32 %v733_v31, 0.0  ;;  %5980 = vmatprep.subr.bf16.mxu0 %v6691_v47 }
 0x25a   : > { %v749_v37 = vmax.f32 %v725_v33, 0.0 }
 0x25b   : > { %v759_v38 = vpack.c.bf16 %v751_v35, %v750_v34 }
 0x25c   : > { %v758_v39 = vpack.c.bf16 %v749_v37, %v748_v36  ;;  %5981 = vmatpush3.bf16.msra.mxu0 %v6691_v47 }
 0x25d   : > { %5982 = vmatprep.subr.bf16.mxu0 %v6692_v41 }
 0x25e   : > { %5934 = vmatprep.mubr.bf16.mxu0 %v758_v39 }
 0x25f   : > { %5935 = vmatmul.mubr.bf16.gmra.mrb[28].mxu0 %v759_v38 }
 0x260   : > { %5983 = vmatpush3.bf16.msra.mxu0 %v6692_v41  ;;  %v6699_v41 = vld [vmem:[#allocation2 + $0x48] sm:$0xff]  }
 0x261   : > { %5984 = vmatprep.subr.bf16.mxu0 %v6693_v42 }
 0x264   : > { %5985 = vmatpush3.bf16.msra.mxu0 %v6693_v42  ;;  %v6700_v42 = vld [vmem:[#allocation2 + $0x50] sm:$0xff]  }
 0x31a   : > { %v5924_v49 = vpop.f32.mrb[16].mxu0 }
 0x31b   : > { %v876_v50 = vadd.f32 %v5924_v49, %v5173_v48  ;;  %v867_v51 = vpop.f32.mrb[17].mxu0 }
 0x31c   : > { %v868_v52 = vadd.f32 %v5173_v48, %v867_v51  ;;  %v5925_v53 = vpop.f32.mrb[18].mxu0 }
 0x31d   : > { %v879_v54 = vadd.f32 %v5925_v53, %v5173_v48  ;;  %v870_v55 = vpop.f32.mrb[19].mxu0  ;;  %v932_v57 = vmax.f32 %v876_v50, 0.0 }
 0x31e   : > { %v871_v56 = vadd.f32 %v5173_v48, %v870_v55  ;;  %v930_v59 = vmax.f32 %v868_v52, 0.0 }
 0x31f   : > { %v933_v58 = vmax.f32 %v879_v54, 0.0 }
 0x320   : > { %v931_v60 = vmax.f32 %v871_v56, 0.0 }
 0x321   : > { %v947_v61 = vpack.c.bf16 %v933_v58, %v932_v57 }
 0x322   : > { %v946_v62 = vpack.c.bf16 %v931_v60, %v930_v59  ;;  %v5928_v63 = vpop.f32.mrb[20].mxu0 }
 0x323   : > { %v892_v0 = vadd.f32 %v5928_v63, %v5173_v48  ;;  %v883_v1 = vpop.f32.mrb[21].mxu0 }
 0x324   : > { %v884_v2 = vadd.f32 %v5173_v48, %v883_v1  ;;  %v5929_v3 = vpop.f32.mrb[22].mxu0  ;;  %5954 = vmatprep.mubr.bf16.mxu1 %v946_v62 }
 0x325   : > { %v895_v4 = vadd.f32 %v5929_v3, %v5173_v48  ;;  %v886_v5 = vpop.f32.mrb[23].mxu0  ;;  %5955 = vmatmul.mubr.bf16.vlgmr.msra.gmra.mrb[16].mxu1 %v947_v61  ;;  %v936_v7 = vmax.f32 %v892_v0, 0.0 }
 0x326   : > { %v887_v6 = vadd.f32 %v5173_v48, %v886_v5  ;;  %v934_v9 = vmax.f32 %v884_v2, 0.0  ;;  %6003 = vmatpush3.bf16.msra.mxu1 %v6694_v43  ;;  %v6701_v43 = vld [vmem:[#allocation2 + $0x58] sm:$0xff]  }
 0x327   : > { %v937_v8 = vmax.f32 %v895_v4, 0.0  ;;  %6004 = vmatprep.subr.bf16.mxu1 %v6695_v44 }
 0x328   : > { %v935_v10 = vmax.f32 %v887_v6, 0.0 }
 0x329   : > { %v949_v11 = vpack.c.bf16 %v937_v8, %v936_v7 }
 0x32a   : > { %v948_v12 = vpack.c.bf16 %v935_v10, %v934_v9  ;;  %v5932_v13 = vpop.f32.mrb[24].mxu0  ;;  %6005 = vmatpush3.bf16.msra.mxu1 %v6695_v44  ;;  %v6702_v44 = vld [vmem:[#allocation2 + $0x60] sm:$0xff]  }
 0x32b   : > { %v908_v14 = vadd.f32 %v5932_v13, %v5173_v48  ;;  %v899_v15 = vpop.f32.mrb[25].mxu0  ;;  %6006 = vmatprep.subr.bf16.mxu1 %v6696_v45 }
 0x32c   : > { %v900_v16 = vadd.f32 %v5173_v48, %v899_v15  ;;  %v5933_v17 = vpop.f32.mrb[26].mxu0  ;;  %5958 = vmatprep.mubr.bf16.mxu1 %v948_v12 }
 0x32d   : > { %v911_v18 = vadd.f32 %v5933_v17, %v5173_v48  ;;  %v902_v19 = vpop.f32.mrb[27].mxu0  ;;  %5959 = vmatmul.mubr.bf16.gmra.mrb[20].mxu1 %v949_v11  ;;  %v940_v21 = vmax.f32 %v908_v14, 0.0 }
 0x32e   : > { %v903_v20 = vadd.f32 %v5173_v48, %v902_v19  ;;  %v938_v23 = vmax.f32 %v900_v16, 0.0  ;;  %6007 = vmatpush3.bf16.msra.mxu1 %v6696_v45  ;;  %v6703_v45 = vld [vmem:[#allocation2 + $0x68] sm:$0xff]  }
 0x32f   : > { %v941_v22 = vmax.f32 %v911_v18, 0.0 }
 0x330   : > { %v939_v24 = vmax.f32 %v903_v20, 0.0 }
 0x331   : > { %v951_v25 = vpack.c.bf16 %v941_v22, %v940_v21 }
 0x332   : > { %v950_v26 = vpack.c.bf16 %v939_v24, %v938_v23  ;;  %v5936_v27 = vpop.f32.mrb[28].mxu0 }
 0x333   : > { %v924_v28 = vadd.f32 %v5936_v27, %v5173_v48  ;;  %v915_v29 = vpop.f32.mrb[29].mxu0 }
 0x334   : > { %v916_v30 = vadd.f32 %v5173_v48, %v915_v29  ;;  %v5937_v31 = vpop.f32.mrb[30].mxu0  ;;  %5962 = vmatprep.mubr.bf16.mxu1 %v950_v26 }
 0x335   : > { %v927_v32 = vadd.f32 %v5937_v31, %v5173_v48  ;;  %v918_v33 = vpop.f32.mrb[31].mxu0  ;;  %5963 = vmatmul.mubr.bf16.gmra.mrb[24].mxu1 %v951_v25  ;;  %v944_v35 = vmax.f32 %v924_v28, 0.0 }
 0x336   : > { %v919_v34 = vadd.f32 %v5173_v48, %v918_v33  ;;  %v942_v37 = vmax.f32 %v916_v30, 0.0 }
 0x337   : > { %v945_v36 = vmax.f32 %v927_v32, 0.0 }
 0x338   : > { %v943_v38 = vmax.f32 %v919_v34, 0.0 }
 0x339   : > { %v953_v39 = vpack.c.bf16 %v945_v36, %v944_v35 }
 0x33a   : > { %v952_v40 = vpack.c.bf16 %v943_v38, %v942_v37 }
 0x33c   : > { %5966 = vmatprep.mubr.bf16.mxu1 %v952_v40  ;;  %v6698_v40 = vld [vmem:[#allocation2 + $0x40] sm:$0xff]  }
 0x33d   : > { %5967 = vmatmul.mubr.bf16.gmra.mrb[28].mxu1 %v953_v39  ;;  %v6697_v39 = vld [vmem:[%s7764_s6 + $0x18] sm:$0xff]   ;;  %6026 = vmatprep.subr.bf16.mxu0 %v6698_v40 }
 0x33e   : > { %6008 = vmatprep.subr.bf16.mxu1 %v6697_v39 }
 0x33f   : > { %6009 = vmatpush3.bf16.msra.mxu1 %v6697_v39 }
 0x3f8   : > { %v5956_v47 = vpop.f32.mrb[16].mxu1 }
 0x3f9   : > { %v1070_v48 = vadd.f32 %v5956_v47, %v5183_v46  ;;  %v1061_v49 = vpop.f32.mrb[17].mxu1 }
 0x3fa   : > { %v1062_v50 = vadd.f32 %v5183_v46, %v1061_v49  ;;  %v5957_v51 = vpop.f32.mrb[18].mxu1 }
 0x3fb   : > { %v1073_v52 = vadd.f32 %v5957_v51, %v5183_v46  ;;  %v1064_v53 = vpop.f32.mrb[19].mxu1  ;;  %v1126_v55 = vmax.f32 %v1070_v48, 0.0 }
 0x3fc   : > { %v1065_v54 = vadd.f32 %v5183_v46, %v1064_v53  ;;  %v1124_v57 = vmax.f32 %v1062_v50, 0.0 }
 0x3fd   : > { %v1127_v56 = vmax.f32 %v1073_v52, 0.0 }
 0x3fe   : > { %v1125_v58 = vmax.f32 %v1065_v54, 0.0 }
 0x3ff   : > { %v1141_v59 = vpack.c.bf16 %v1127_v56, %v1126_v55 }
 0x400   : > { %v1140_v60 = vpack.c.bf16 %v1125_v58, %v1124_v57  ;;  %v5960_v61 = vpop.f32.mrb[20].mxu1 }
 0x401   : > { %v1086_v62 = vadd.f32 %v5960_v61, %v5183_v46  ;;  %v1077_v63 = vpop.f32.mrb[21].mxu1 }
 0x402   : > { %v1078_v0 = vadd.f32 %v5183_v46, %v1077_v63  ;;  %v5961_v1 = vpop.f32.mrb[22].mxu1  ;;  %5986 = vmatprep.mubr.bf16.mxu0 %v1140_v60 }
 0x403   : > { %v1089_v2 = vadd.f32 %v5961_v1, %v5183_v46  ;;  %v1080_v3 = vpop.f32.mrb[23].mxu1  ;;  %5987 = vmatmul.mubr.bf16.vlgmr.msra.gmra.mrb[32].mxu0 %v1141_v59  ;;  %v1130_v5 = vmax.f32 %v1086_v62, 0.0 }
 0x404   : > { %v1081_v4 = vadd.f32 %v5183_v46, %v1080_v3  ;;  %v1128_v7 = vmax.f32 %v1078_v0, 0.0  ;;  %6027 = vmatpush3.bf16.msra.mxu0 %v6698_v40 }
 0x405   : > { %v1131_v6 = vmax.f32 %v1089_v2, 0.0  ;;  %6028 = vmatprep.subr.bf16.mxu0 %v6699_v41 }
 0x406   : > { %v1129_v8 = vmax.f32 %v1081_v4, 0.0 }
 0x407   : > { %v1143_v9 = vpack.c.bf16 %v1131_v6, %v1130_v5 }
 0x408   : > { %v1142_v10 = vpack.c.bf16 %v1129_v8, %v1128_v7  ;;  %v5964_v11 = vpop.f32.mrb[24].mxu1  ;;  %6029 = vmatpush3.bf16.msra.mxu0 %v6699_v41  ;;  %v6833_v41 = vld [vmem:[%s7199_s29 + $0x8] sm:$0xff] }
 0x409   : > { %v1102_v12 = vadd.f32 %v5964_v11, %v5183_v46  ;;  %v1093_v13 = vpop.f32.mrb[25].mxu1  ;;  %6030 = vmatprep.subr.bf16.mxu0 %v6700_v42 }
 0x40a   : > { %v1094_v14 = vadd.f32 %v5183_v46, %v1093_v13  ;;  %v5965_v15 = vpop.f32.mrb[26].mxu1  ;;  %5990 = vmatprep.mubr.bf16.mxu0 %v1142_v10 }
 0x40b   : > { %v1105_v16 = vadd.f32 %v5965_v15, %v5183_v46  ;;  %v1096_v17 = vpop.f32.mrb[27].mxu1  ;;  %5991 = vmatmul.mubr.bf16.gmra.mrb[36].mxu0 %v1143_v9  ;;  %v1134_v19 = vmax.f32 %v1102_v12, 0.0 }
 0x40c   : > { %v1097_v18 = vadd.f32 %v5183_v46, %v1096_v17  ;;  %v1132_v21 = vmax.f32 %v1094_v14, 0.0  ;;  %6031 = vmatpush3.bf16.msra.mxu0 %v6700_v42 }
 0x40d   : > { %v1135_v20 = vmax.f32 %v1105_v16, 0.0  ;;  %6032 = vmatprep.subr.bf16.mxu0 %v6701_v43 }
 0x40e   : > { %v1133_v22 = vmax.f32 %v1097_v18, 0.0 }
 0x40f   : > { %v1145_v23 = vpack.c.bf16 %v1135_v20, %v1134_v19 }
 0x410   : > { %v1144_v24 = vpack.c.bf16 %v1133_v22, %v1132_v21  ;;  %v5968_v25 = vpop.f32.mrb[28].mxu1  ;;  %6033 = vmatpush3.bf16.msra.mxu0 %v6701_v43  ;;  %v6704_v22 = vld [vmem:[#allocation2 + $0x70] sm:$0xff]  }
 0x411   : > { %v1118_v26 = vadd.f32 %v5968_v25, %v5183_v46  ;;  %v1109_v27 = vpop.f32.mrb[29].mxu1  ;;  %6034 = vmatprep.subr.bf16.mxu0 %v6702_v44  ;;  %v6707_v25 = vld [vmem:[#allocation7 + $0xc8] sm:$0xff]  }
 0x412   : > { %v1110_v28 = vadd.f32 %v5183_v46, %v1109_v27  ;;  %v5969_v29 = vpop.f32.mrb[30].mxu1  ;;  %5994 = vmatprep.mubr.bf16.mxu0 %v1144_v24  ;;  %v6706_v24 = vld [vmem:[#allocation7 + $0xc0] sm:$0xff]   ;;  %v6709_v27 = vld [vmem:[#allocation7 + $0xd8] sm:$0xff]  }
 0x413   : > { %v1121_v30 = vadd.f32 %v5969_v29, %v5183_v46  ;;  %v1112_v31 = vpop.f32.mrb[31].mxu1  ;;  %5995 = vmatmul.mubr.bf16.gmra.mrb[40].mxu0 %v1145_v23  ;;  %v1138_v33 = vmax.f32 %v1118_v26, 0.0  ;;  %v6705_v23 = vld [vmem:[#allocation2 + $0x78] sm:$0xff]   ;;  %6058 = vmatprep.subr.bf16.mxu1 %v6706_v24  ;;  %v6711_v29 = vld [vmem:[#allocation7 + $0xe8] sm:$0xff]  }
 0x414   : > { %v1113_v32 = vadd.f32 %v5183_v46, %v1112_v31  ;;  %v1136_v35 = vmax.f32 %v1110_v28, 0.0  ;;  %6035 = vmatpush3.bf16.msra.mxu0 %v6702_v44  ;;  %v6708_v26 = vld [vmem:[#allocation7 + $0xd0] sm:$0xff]   ;;  %v6710_v28 = vld [vmem:[#allocation7 + $0xe0] sm:$0xff]  }
 0x415   : > { %v1139_v34 = vmax.f32 %v1121_v30, 0.0  ;;  %6036 = vmatprep.subr.bf16.mxu0 %v6703_v45 }
 0x416   : > { %v1137_v36 = vmax.f32 %v1113_v32, 0.0  ;;  %v6830_v32 = vld [vmem:[%s7199_s29] sm:$0xff] }
 0x417   : > { %v1147_v37 = vpack.c.bf16 %v1139_v34, %v1138_v33 }
 0x418   : > { %v1146_v38 = vpack.c.bf16 %v1137_v36, %v1136_v35  ;;  %6037 = vmatpush3.bf16.msra.mxu0 %v6703_v45  ;;  %v6831_v35 = vld [vmem:[%s7199_s29 + $0x10] sm:$0xff] }
 0x419   : > { %6038 = vmatprep.subr.bf16.mxu0 %v6704_v22 }
 0x41a   : > { %5998 = vmatprep.mubr.bf16.mxu0 %v1146_v38  ;;  %v6832_v38 = vld [vmem:[%s7199_s29 + $0x18] sm:$0xff] }
 0x41b   : > { %5999 = vmatmul.mubr.bf16.gmra.mrb[44].mxu0 %v1147_v37  ;;  %v7275_v37 = vld [vmem:[%s7765_s7] ss:$0 sm:$0xff] }
 0x41c   : > { %6039 = vmatpush3.bf16.msra.mxu0 %v6704_v22 }
 0x41d   : > { %6040 = vmatprep.subr.bf16.mxu0 %v6705_v23 }
 0x420   : > { %6041 = vmatpush3.bf16.msra.mxu0 %v6705_v23  ;;  %v6842_v23 = vld [vmem:[%s7199_s29 + $0x60] sm:$0xff] }
 0x4d6   : > { %v5988_v46 = vpop.f32.mrb[32].mxu0 }
 0x4d7   : > { %v1246_v47 = vpop.f32.mrb[33].mxu0  ;;  %v1311_v49 = vmax.f32 %v5988_v46, 0.0 }
 0x4d8   : > { %v5989_v48 = vpop.f32.mrb[34].mxu0  ;;  %v1309_v52 = vmax.f32 %v1246_v47, 0.0 }
 0x4d9   : > { %v1312_v50 = vmax.f32 %v5989_v48, 0.0  ;;  %v1249_v51 = vpop.f32.mrb[35].mxu0 }
 0x4da   : > { %v1310_v53 = vmax.f32 %v1249_v51, 0.0  ;;  %v6834_v51 = vld [vmem:[%s7199_s29 + $0x20] sm:$0xff] }
 0x4db   : > { %v1326_v54 = vpack.c.bf16 %v1312_v50, %v1311_v49 }
 0x4dc   : > { %v1325_v55 = vpack.c.bf16 %v1310_v53, %v1309_v52 }
 0x4de   : > { %v5992_v56 = vpop.f32.mrb[36].mxu0  ;;  %6010 = vmatprep.mubr.msk.bf16.mxu1 %vm1365_vm0, %v1325_v55 }
 0x4df   : > { %v1262_v57 = vpop.f32.mrb[37].mxu0  ;;  %6011 = vmatmul.mubr.msk.bf16.vlgmr.msra.gmra.mrb[32].mxu1 %vm1365_vm0, %v1326_v54  ;;  %v1315_v59 = vmax.f32 %v5992_v56, 0.0  ;;  %v6835_v54 = vld [vmem:[%s7199_s29 + $0x30] sm:$0xff]  ;;  %v6836_v56 = vld [vmem:[%s7199_s29 + $0x38] sm:$0xff] }
 0x4e0   : > { %v5993_v58 = vpop.f32.mrb[38].mxu0  ;;  %v1313_v62 = vmax.f32 %v1262_v57, 0.0  ;;  %6059 = vmatpush3.bf16.msra.mxu1 %v6706_v24 }
 0x4e1   : > { %v1316_v60 = vmax.f32 %v5993_v58, 0.0  ;;  %v1265_v61 = vpop.f32.mrb[39].mxu0  ;;  %6060 = vmatprep.subr.bf16.mxu1 %v6707_v25 }
 0x4e2   : > { %v1314_v63 = vmax.f32 %v1265_v61, 0.0 }
 0x4e3   : > { %v1328_v0 = vpack.c.bf16 %v1316_v60, %v1315_v59  ;;  %v6837_v59 = vld [vmem:[%s7199_s29 + $0x28] sm:$0xff] }
 0x4e4   : > { %v1327_v1 = vpack.c.bf16 %v1314_v63, %v1313_v62  ;;  %6061 = vmatpush3.bf16.msra.mxu1 %v6707_v25 }
 0x4e5   : > { %6062 = vmatprep.subr.bf16.mxu1 %v6708_v26 }
 0x4e6   : > { %v5996_v2 = vpop.f32.mrb[40].mxu0  ;;  %6014 = vmatprep.mubr.msk.bf16.mxu1 %vm1365_vm0, %v1327_v1 }
 0x4e7   : > { %v1278_v3 = vpop.f32.mrb[41].mxu0  ;;  %6015 = vmatmul.mubr.msk.bf16.gmra.mrb[36].mxu1 %vm1365_vm0, %v1328_v0  ;;  %v1319_v5 = vmax.f32 %v5996_v2, 0.0 }
 0x4e8   : > { %v5997_v4 = vpop.f32.mrb[42].mxu0  ;;  %v1317_v8 = vmax.f32 %v1278_v3, 0.0  ;;  %6063 = vmatpush3.bf16.msra.mxu1 %v6708_v26  ;;  %v6843_v26 = vld [vmem:[%s7199_s29 + $0x70] sm:$0xff] }
 0x4e9   : > { %v1320_v6 = vmax.f32 %v5997_v4, 0.0  ;;  %v1281_v7 = vpop.f32.mrb[43].mxu0  ;;  %6064 = vmatprep.subr.bf16.mxu1 %v6709_v27 }
 0x4ea   : > { %v1318_v9 = vmax.f32 %v1281_v7, 0.0 }
 0x4eb   : > { %v1330_v10 = vpack.c.bf16 %v1320_v6, %v1319_v5  ;;  %v6838_v5 = vld [vmem:[%s7199_s29 + $0x40] sm:$0xff] }
 0x4ec   : > { %v1329_v11 = vpack.c.bf16 %v1318_v9, %v1317_v8  ;;  %6065 = vmatpush3.bf16.msra.mxu1 %v6709_v27  ;;  %v6839_v8 = vld [vmem:[%s7199_s29 + $0x50] sm:$0xff] }
 0x4ed   : > { %6066 = vmatprep.subr.bf16.mxu1 %v6710_v28 }
 0x4ee   : > { %v6000_v12 = vpop.f32.mrb[44].mxu0  ;;  %6018 = vmatprep.mubr.msk.bf16.mxu1 %vm1365_vm0, %v1329_v11 }
 0x4ef   : > { %v1294_v13 = vpop.f32.mrb[45].mxu0  ;;  %6019 = vmatmul.mubr.msk.bf16.gmra.mrb[40].mxu1 %vm1365_vm0, %v1330_v10  ;;  %v1323_v15 = vmax.f32 %v6000_v12, 0.0  ;;  %v6840_v10 = vld [vmem:[%s7199_s29 + $0x58] sm:$0xff] }
 0x4f0   : > { %v6001_v14 = vpop.f32.mrb[46].mxu0  ;;  %v1321_v18 = vmax.f32 %v1294_v13, 0.0  ;;  %6067 = vmatpush3.bf16.msra.mxu1 %v6710_v28  ;;  %v6841_v13 = vld [vmem:[%s7199_s29 + $0x48] sm:$0xff]  ;;  %v6844_v28 = vld [vmem:[%s7199_s29 + $0x78] sm:$0xff] }
 0x4f1   : > { %v1324_v16 = vmax.f32 %v6001_v14, 0.0  ;;  %v1297_v17 = vpop.f32.mrb[47].mxu0  ;;  %6068 = vmatprep.subr.bf16.mxu1 %v6711_v29 }
 0x4f2   : > { %v1322_v19 = vmax.f32 %v1297_v17, 0.0 }
 0x4f3   : > { %v1332_v20 = vpack.c.bf16 %v1324_v16, %v1323_v15 }
 0x4f4   : > { %v1331_v21 = vpack.c.bf16 %v1322_v19, %v1321_v18  ;;  %6069 = vmatpush3.bf16.msra.mxu1 %v6711_v29 }
 0x4f6   : > { %6022 = vmatprep.mubr.msk.bf16.mxu1 %vm1365_vm0, %v1331_v21 }
 0x4f7   : > { %6023 = vmatmul.mubr.msk.bf16.gmra.mrb[44].mxu1 %vm1365_vm0, %v1332_v20 }
 0x5b2   : > { %v6012_v30 = vpop.f32.mrb[32].mxu1 }
 0x5b3   : > { %v1424_v31 = vpop.f32.mrb[33].mxu1  ;;  %v1489_v36 = vadd.f32 %v6831_v35, %v6012_v30 }
 0x5b4   : > { %v1487_v33 = vadd.f32 %v6830_v32, %v1424_v31  ;;  %v6013_v34 = vpop.f32.mrb[34].mxu1  ;;  %v6845_v31 = vld [vmem:[%s7199_s29 + $0x68] sm:$0xff] }
 0x5b5   : > { %v1490_v39 = vadd.f32 %v6832_v38, %v6013_v34  ;;  %v1427_v40 = vpop.f32.mrb[35].mxu1  ;;  %v7289_v46 = vadd.f32 %v7275_v37, %v1489_v36 }
 0x5b6   : > { %v1488_v42 = vadd.f32 %v6833_v41, %v1427_v40  ;;  %v7283_v44 = vadd.f32 %v7275_v37, %v1487_v33  ;;  %v6712_v40 = vld [vmem:[#allocation7 + $0xf0] sm:$0xff]   ;;  %v6713_v41 = vld [vmem:[#allocation7 + $0xf8] sm:$0xff]  }
 0x5b7   : > { %v7280_v43 = vadd.f32 %v7275_v37, %v1490_v39  ;;  %6070 = vmatprep.subr.bf16.mxu1 %v6712_v40 }
 0x5b8   : > { %v7286_v45 = vadd.f32 %v7275_v37, %v1488_v42  ;;  %6071 = vmatpush3.bf16.msra.mxu1 %v6712_v40  ;;  %v6714_v42 = vld [vmem:[#allocation7 + $0x100] sm:$0xff]  }
 0x5b9   : > { %v1527_v49 = vpack.c.bf16 %v7280_v43, %v7289_v46  ;;  %6072 = vmatprep.subr.bf16.mxu1 %v6713_v41  ;;  %6090 = vmatprep.subr.bf16.mxu0 %v6714_v42 }
 0x5ba   : > { %v6016_v47 = vpop.f32.mrb[36].mxu1  ;;  %v1526_v48 = vpack.c.bf16 %v7286_v45, %v7283_v44 }
 0x5bb   : > { %v1440_v50 = vpop.f32.mrb[37].mxu1  ;;  %v1493_v55 = vadd.f32 %v6835_v54, %v6016_v47  ;;  %v6715_v47 = vld [vmem:[#allocation7 + $0x108] sm:$0xff]  }
 0x5bc   : > { %v1491_v52 = vadd.f32 %v6834_v51, %v1440_v50  ;;  %v6017_v53 = vpop.f32.mrb[38].mxu1  ;;  %6042 = vmatprep.mubr.bf16.mxu0 %v1526_v48  ;;  %6073 = vmatpush3.bf16.msra.mxu1 %v6713_v41  ;;  %v6717_v48 = vld [vmem:[#allocation7 + $0x118] sm:$0xff]   ;;  %v6719_v50 = vld [vmem:[#allocation7 + $0x128] sm:$0xff]  }
 0x5bd   : > { %v1494_v57 = vadd.f32 %v6836_v56, %v6017_v53  ;;  %v1443_v58 = vpop.f32.mrb[39].mxu1  ;;  %6043 = vmatmul.mubr.bf16.vlgmr.msra.gmra.mrb[48].mxu0 %v1527_v49  ;;  %v7309_v0 = vadd.f32 %v7275_v37, %v1493_v55  ;;  %v6718_v49 = vld [vmem:[#allocation7 + $0x120] sm:$0xff]   ;;  %v5213_v51 = vld [vmem:[#allocation5 + $0x1] ss:$0 sm:$0xff] }
 0x5be   : > { %v1492_v60 = vadd.f32 %v6837_v59, %v1443_v58  ;;  %v7303_v62 = vadd.f32 %v7275_v37, %v1491_v52  ;;  %6091 = vmatpush3.bf16.msra.mxu0 %v6714_v42 }
 0x5bf   : > { %v7300_v61 = vadd.f32 %v7275_v37, %v1494_v57  ;;  %6092 = vmatprep.subr.bf16.mxu0 %v6715_v47 }
 0x5c0   : > { %v7306_v63 = vadd.f32 %v7275_v37, %v1492_v60 }
 0x5c1   : > { %v1529_v4 = vpack.c.bf16 %v7300_v61, %v7309_v0 }
 0x5c2   : > { %v6020_v1 = vpop.f32.mrb[40].mxu1  ;;  %v1528_v2 = vpack.c.bf16 %v7306_v63, %v7303_v62  ;;  %6093 = vmatpush3.bf16.msra.mxu0 %v6715_v47 }
 0x5c3   : > { %v1456_v3 = vpop.f32.mrb[41].mxu1  ;;  %v1497_v9 = vadd.f32 %v6839_v8, %v6020_v1 }
 0x5c4   : > { %v1495_v6 = vadd.f32 %v6838_v5, %v1456_v3  ;;  %v6021_v7 = vpop.f32.mrb[42].mxu1  ;;  %6046 = vmatprep.mubr.bf16.mxu0 %v1528_v2 }
 0x5c5   : > { %v1498_v11 = vadd.f32 %v6840_v10, %v6021_v7  ;;  %v1459_v12 = vpop.f32.mrb[43].mxu1  ;;  %6047 = vmatmul.mubr.bf16.gmra.mrb[52].mxu0 %v1529_v4  ;;  %v7329_v18 = vadd.f32 %v7275_v37, %v1497_v9 }
 0x5c6   : > { %v1496_v14 = vadd.f32 %v6841_v13, %v1459_v12  ;;  %v7323_v16 = vadd.f32 %v7275_v37, %v1495_v6 }
 0x5c7   : > { %v7320_v15 = vadd.f32 %v7275_v37, %v1498_v11 }
 0x5c8   : > { %v7326_v17 = vadd.f32 %v7275_v37, %v1496_v14 }
 0x5c9   : > { %v1531_v22 = vpack.c.bf16 %v7320_v15, %v7329_v18 }
 0x5ca   : > { %v6024_v19 = vpop.f32.mrb[44].mxu1  ;;  %v1530_v20 = vpack.c.bf16 %v7326_v17, %v7323_v16 }
 0x5cb   : > { %v1472_v21 = vpop.f32.mrb[45].mxu1  ;;  %v1501_v27 = vadd.f32 %v6843_v26, %v6024_v19 }
 0x5cc   : > { %v1499_v24 = vadd.f32 %v6842_v23, %v1472_v21  ;;  %v6025_v25 = vpop.f32.mrb[46].mxu1  ;;  %6050 = vmatprep.mubr.bf16.mxu0 %v1530_v20 }
 0x5cd   : > { %v1502_v29 = vadd.f32 %v6844_v28, %v6025_v25  ;;  %v1475_v30 = vpop.f32.mrb[47].mxu1  ;;  %6051 = vmatmul.mubr.bf16.gmra.mrb[56].mxu0 %v1531_v22  ;;  %v7349_v36 = vadd.f32 %v7275_v37, %v1501_v27 }
 0x5ce   : > { %v1500_v32 = vadd.f32 %v6845_v31, %v1475_v30  ;;  %v7343_v34 = vadd.f32 %v7275_v37, %v1499_v24 }
 0x5cf   : > { %v7340_v33 = vadd.f32 %v7275_v37, %v1502_v29 }
 0x5d0   : > { %v7346_v35 = vadd.f32 %v7275_v37, %v1500_v32  ;;  %v6716_v37 = vld [vmem:[#allocation7 + $0x110] sm:$0xff]  }
 0x5d1   : > { %v1533_v39 = vpack.c.bf16 %v7340_v33, %v7349_v36  ;;  %6094 = vmatprep.subr.bf16.mxu0 %v6716_v37 }
 0x5d2   : > { %v1532_v38 = vpack.c.bf16 %v7346_v35, %v7343_v34  ;;  %6095 = vmatpush3.bf16.msra.mxu0 %v6716_v37 }
 0x5d3   : > { %6096 = vmatprep.subr.bf16.mxu0 %v6717_v48 }
 0x5d4   : > { %6054 = vmatprep.mubr.bf16.mxu0 %v1532_v38 }
 0x5d5   : > { %6055 = vmatmul.mubr.bf16.gmra.mrb[60].mxu0 %v1533_v39 }
 0x5d6   : > { %6097 = vmatpush3.bf16.msra.mxu0 %v6717_v48 }
 0x5d7   : > { %6098 = vmatprep.subr.bf16.mxu0 %v6718_v49 }
 0x5da   : > { %6099 = vmatpush3.bf16.msra.mxu0 %v6718_v49 }
 0x5db   : > { %6100 = vmatprep.subr.bf16.mxu0 %v6719_v50 }
 0x5de   : > { %6101 = vmatpush3.bf16.msra.mxu0 %v6719_v50 }
 0x690   : > { %v6044_v52 = vpop.f32.mrb[48].mxu0 }
 0x691   : > { %v1650_v53 = vadd.f32 %v6044_v52, %v5213_v51  ;;  %v1641_v54 = vpop.f32.mrb[49].mxu0 }
 0x692   : > { %v1642_v55 = vadd.f32 %v5213_v51, %v1641_v54  ;;  %v6045_v56 = vpop.f32.mrb[50].mxu0 }
 0x693   : > { %v1653_v57 = vadd.f32 %v6045_v56, %v5213_v51  ;;  %v1644_v58 = vpop.f32.mrb[51].mxu0  ;;  %v1706_v60 = vmax.f32 %v1650_v53, 0.0 }
 0x694   : > { %v1645_v59 = vadd.f32 %v5213_v51, %v1644_v58  ;;  %v1704_v2 = vmax.f32 %v1642_v55, 0.0 }
 0x695   : > { %v1707_v1 = vmax.f32 %v1653_v57, 0.0 }
 0x696   : > { %v1705_v3 = vmax.f32 %v1645_v59, 0.0 }
 0x697   : > { %v1721_v4 = vpack.c.bf16 %v1707_v1, %v1706_v60  ;;  %v6720_v1 = vld [vmem:[#allocation7 + $0x130] sm:$0xff]  }
 0x698   : > { %v1720_v5 = vpack.c.bf16 %v1705_v3, %v1704_v2  ;;  %v6048_v6 = vpop.f32.mrb[52].mxu0  ;;  %6102 = vmatprep.subr.bf16.mxu0 %v6720_v1  ;;  %v6721_v2 = vld [vmem:[#allocation7 + $0x138] sm:$0xff]   ;;  %v6722_v3 = vld [vmem:[#allocation7 + $0x140] sm:$0xff]  }
 0x699   : > { %v1666_v7 = vadd.f32 %v6048_v6, %v5213_v51  ;;  %v1657_v8 = vpop.f32.mrb[53].mxu0  ;;  %6103 = vmatpush3.bf16.msra.mxu0 %v6720_v1  ;;  %6122 = vmatprep.subr.bf16.mxu1 %v6722_v3  ;;  %v6726_v6 = vld [vmem:[#allocation7 + $0x160] sm:$0xff]  }
 0x69a   : > { %v1658_v9 = vadd.f32 %v5213_v51, %v1657_v8  ;;  %v6049_v10 = vpop.f32.mrb[54].mxu0  ;;  %6074 = vmatprep.mubr.bf16.mxu1 %v1720_v5  ;;  %6104 = vmatprep.subr.bf16.mxu0 %v6721_v2  ;;  %v6725_v5 = vld [vmem:[#allocation7 + $0x158] sm:$0xff]  }
 0x69b   : > { %v1669_v11 = vadd.f32 %v6049_v10, %v5213_v51  ;;  %v1660_v12 = vpop.f32.mrb[55].mxu0  ;;  %6075 = vmatmul.mubr.bf16.vlgmr.msra.gmra.mrb[48].mxu1 %v1721_v4  ;;  %v1710_v14 = vmax.f32 %v1666_v7, 0.0  ;;  %v6723_v4 = vld [vmem:[#allocation7 + $0x148] sm:$0xff]   ;;  %v5223_v8 = vld [vmem:[%s7762_s4 + $0x3] ss:$0 sm:$0xff] }
 0x69c   : > { %v1661_v13 = vadd.f32 %v5213_v51, %v1660_v12  ;;  %v1708_v20 = vmax.f32 %v1658_v9, 0.0  ;;  %6123 = vmatpush3.bf16.msra.mxu1 %v6722_v3  ;;  %v6727_v7 = vld [vmem:[#allocation7 + $0x168] sm:$0xff]  }
 0x69d   : > { %v1711_v19 = vmax.f32 %v1669_v11, 0.0  ;;  %6105 = vmatpush3.bf16.msra.mxu0 %v6721_v2  ;;  %6124 = vmatprep.subr.bf16.mxu1 %v6723_v4 }
 0x69e   : > { %v1709_v21 = vmax.f32 %v1661_v13, 0.0 }
 0x69f   : > { %v1723_v22 = vpack.c.bf16 %v1711_v19, %v1710_v14 }
 0x6a0   : > { %v1722_v23 = vpack.c.bf16 %v1709_v21, %v1708_v20  ;;  %v6052_v24 = vpop.f32.mrb[56].mxu0  ;;  %6125 = vmatpush3.bf16.msra.mxu1 %v6723_v4 }
 0x6a1   : > { %v1682_v25 = vadd.f32 %v6052_v24, %v5213_v51  ;;  %v1673_v26 = vpop.f32.mrb[57].mxu0 }
 0x6a2   : > { %v1674_v27 = vadd.f32 %v5213_v51, %v1673_v26  ;;  %v6053_v28 = vpop.f32.mrb[58].mxu0  ;;  %6078 = vmatprep.mubr.bf16.mxu1 %v1722_v23 }
 0x6a3   : > { %v1685_v29 = vadd.f32 %v6053_v28, %v5213_v51  ;;  %v1676_v30 = vpop.f32.mrb[59].mxu0  ;;  %6079 = vmatmul.mubr.bf16.gmra.mrb[52].mxu1 %v1723_v22  ;;  %v1714_v32 = vmax.f32 %v1682_v25, 0.0 }
 0x6a4   : > { %v1677_v31 = vadd.f32 %v5213_v51, %v1676_v30  ;;  %v1712_v39 = vmax.f32 %v1674_v27, 0.0 }
 0x6a5   : > { %v1715_v38 = vmax.f32 %v1685_v29, 0.0 }
 0x6a6   : > { %v1713_v40 = vmax.f32 %v1677_v31, 0.0 }
 0x6a7   : > { %v1725_v41 = vpack.c.bf16 %v1715_v38, %v1714_v32 }
 0x6a8   : > { %v1724_v42 = vpack.c.bf16 %v1713_v40, %v1712_v39  ;;  %v6056_v47 = vpop.f32.mrb[60].mxu0 }
 0x6a9   : > { %v1698_v37 = vadd.f32 %v6056_v47, %v5213_v51  ;;  %v1689_v48 = vpop.f32.mrb[61].mxu0 }
 0x6aa   : > { %v1690_v49 = vadd.f32 %v5213_v51, %v1689_v48  ;;  %v6057_v50 = vpop.f32.mrb[62].mxu0  ;;  %6082 = vmatprep.mubr.bf16.mxu1 %v1724_v42 }
 0x6ab   : > { %v1701_v52 = vadd.f32 %v6057_v50, %v5213_v51  ;;  %v1692_v53 = vpop.f32.mrb[63].mxu0  ;;  %6083 = vmatmul.mubr.bf16.gmra.mrb[56].mxu1 %v1725_v41  ;;  %v1718_v55 = vmax.f32 %v1698_v37, 0.0 }
 0x6ac   : > { %v1693_v54 = vadd.f32 %v5213_v51, %v1692_v53  ;;  %v1716_v57 = vmax.f32 %v1690_v49, 0.0  ;;  %v6724_v51 = vld [vmem:[#allocation7 + $0x150] sm:$0xff]  }
 0x6ad   : > { %v1719_v56 = vmax.f32 %v1701_v52, 0.0  ;;  %6126 = vmatprep.subr.bf16.mxu1 %v6724_v51 }
 0x6ae   : > { %v1717_v58 = vmax.f32 %v1693_v54, 0.0  ;;  %6127 = vmatpush3.bf16.msra.mxu1 %v6724_v51 }
 0x6af   : > { %v1727_v59 = vpack.c.bf16 %v1719_v56, %v1718_v55  ;;  %6128 = vmatprep.subr.bf16.mxu1 %v6725_v5 }
 0x6b0   : > { %v1726_v60 = vpack.c.bf16 %v1717_v58, %v1716_v57 }
 0x6b2   : > { %6086 = vmatprep.mubr.bf16.mxu1 %v1726_v60  ;;  %6129 = vmatpush3.bf16.msra.mxu1 %v6725_v5 }
 0x6b3   : > { %6087 = vmatmul.mubr.bf16.gmra.mrb[60].mxu1 %v1727_v59  ;;  %6130 = vmatprep.subr.bf16.mxu1 %v6726_v6 }
 0x6b6   : > { %6131 = vmatpush3.bf16.msra.mxu1 %v6726_v6 }
 0x6b7   : > { %6132 = vmatprep.subr.bf16.mxu1 %v6727_v7 }
 0x6ba   : > { %6133 = vmatpush3.bf16.msra.mxu1 %v6727_v7 }
 0x76e   : > { %v6076_v9 = vpop.f32.mrb[48].mxu1 }
 0x76f   : > { %v1844_v10 = vadd.f32 %v6076_v9, %v5223_v8  ;;  %v1835_v11 = vpop.f32.mrb[49].mxu1 }
 0x770   : > { %v1836_v12 = vadd.f32 %v5223_v8, %v1835_v11  ;;  %v6077_v13 = vpop.f32.mrb[50].mxu1 }
 0x771   : > { %v1847_v14 = vadd.f32 %v6077_v13, %v5223_v8  ;;  %v1838_v19 = vpop.f32.mrb[51].mxu1  ;;  %v1900_v21 = vmax.f32 %v1844_v10, 0.0 }
 0x772   : > { %v1839_v20 = vadd.f32 %v5223_v8, %v1838_v19  ;;  %v1898_v23 = vmax.f32 %v1836_v12, 0.0 }
 0x773   : > { %v1901_v22 = vmax.f32 %v1847_v14, 0.0 }
 0x774   : > { %v1899_v24 = vmax.f32 %v1839_v20, 0.0 }
 0x775   : > { %v1915_v25 = vpack.c.bf16 %v1901_v22, %v1900_v21  ;;  %v6728_v22 = vld [vmem:[#allocation7 + $0x170] sm:$0xff]  }
 0x776   : > { %v1914_v26 = vpack.c.bf16 %v1899_v24, %v1898_v23  ;;  %v6080_v27 = vpop.f32.mrb[52].mxu1  ;;  %6134 = vmatprep.subr.bf16.mxu1 %v6728_v22  ;;  %v6729_v23 = vld [vmem:[#allocation7 + $0x178] sm:$0xff]  }
 0x777   : > { %v1860_v28 = vadd.f32 %v6080_v27, %v5223_v8  ;;  %v1851_v29 = vpop.f32.mrb[53].mxu1  ;;  %6135 = vmatpush3.bf16.msra.mxu1 %v6728_v22  ;;  %v6730_v24 = vld [vmem:[%s7763_s5 + $0x40] sm:$0xff]  }
 0x778   : > { %v1852_v30 = vadd.f32 %v5223_v8, %v1851_v29  ;;  %v6081_v31 = vpop.f32.mrb[54].mxu1  ;;  %6106 = vmatprep.mubr.bf16.mxu0 %v1914_v26  ;;  %6136 = vmatprep.subr.bf16.mxu1 %v6729_v23  ;;  %v6733_v26 = vld [vmem:[%s7763_s5 + $0x58] sm:$0xff]   ;;  %v6734_v27 = vld [vmem:[%s7763_s5 + $0x60] sm:$0xff]  }
 0x779   : > { %v1863_v32 = vadd.f32 %v6081_v31, %v5223_v8  ;;  %v1854_v38 = vpop.f32.mrb[55].mxu1  ;;  %6107 = vmatmul.mubr.bf16.vlgmr.msra.gmra.mrb[64].mxu0 %v1915_v25  ;;  %v1904_v40 = vmax.f32 %v1860_v28, 0.0  ;;  %6154 = vmatprep.subr.bf16.mxu0 %v6730_v24  ;;  %v6732_v25 = vld [vmem:[%s7763_s5 + $0x50] sm:$0xff]   ;;  %v6735_v28 = vld [vmem:[%s7763_s5 + $0x68] sm:$0xff]   ;;  %v5233_v29 = vld [vmem:[%s7762_s4 + $0x4] ss:$0 sm:$0xff] }
 0x77a   : > { %v1855_v39 = vadd.f32 %v5223_v8, %v1854_v38  ;;  %v1902_v42 = vmax.f32 %v1852_v30, 0.0  ;;  %6155 = vmatpush3.bf16.msra.mxu0 %v6730_v24 }
 0x77b   : > { %v1905_v41 = vmax.f32 %v1863_v32, 0.0  ;;  %6137 = vmatpush3.bf16.msra.mxu1 %v6729_v23 }
 0x77c   : > { %v1903_v47 = vmax.f32 %v1855_v39, 0.0 }
 0x77d   : > { %v1917_v37 = vpack.c.bf16 %v1905_v41, %v1904_v40 }
 0x77e   : > { %v1916_v48 = vpack.c.bf16 %v1903_v47, %v1902_v42  ;;  %v6084_v49 = vpop.f32.mrb[56].mxu1 }
 0x77f   : > { %v1876_v50 = vadd.f32 %v6084_v49, %v5223_v8  ;;  %v1867_v52 = vpop.f32.mrb[57].mxu1 }
 0x780   : > { %v1868_v53 = vadd.f32 %v5223_v8, %v1867_v52  ;;  %v6085_v54 = vpop.f32.mrb[58].mxu1  ;;  %6110 = vmatprep.mubr.bf16.mxu0 %v1916_v48 }
 0x781   : > { %v1879_v55 = vadd.f32 %v6085_v54, %v5223_v8  ;;  %v1870_v56 = vpop.f32.mrb[59].mxu1  ;;  %6111 = vmatmul.mubr.bf16.gmra.mrb[68].mxu0 %v1917_v37  ;;  %v1908_v58 = vmax.f32 %v1876_v50, 0.0 }
 0x782   : > { %v1871_v57 = vadd.f32 %v5223_v8, %v1870_v56  ;;  %v1906_v60 = vmax.f32 %v1868_v53, 0.0 }
 0x783   : > { %v1909_v59 = vmax.f32 %v1879_v55, 0.0 }
 0x784   : > { %v1907_v1 = vmax.f32 %v1871_v57, 0.0 }
 0x785   : > { %v1919_v2 = vpack.c.bf16 %v1909_v59, %v1908_v58 }
 0x786   : > { %v1918_v3 = vpack.c.bf16 %v1907_v1, %v1906_v60  ;;  %v6088_v4 = vpop.f32.mrb[60].mxu1 }
 0x787   : > { %v1892_v51 = vadd.f32 %v6088_v4, %v5223_v8  ;;  %v1883_v5 = vpop.f32.mrb[61].mxu1 }
 0x788   : > { %v1884_v6 = vadd.f32 %v5223_v8, %v1883_v5  ;;  %v6089_v7 = vpop.f32.mrb[62].mxu1  ;;  %6114 = vmatprep.mubr.bf16.mxu0 %v1918_v3 }
 0x789   : > { %v1895_v9 = vadd.f32 %v6089_v7, %v5223_v8  ;;  %v1886_v10 = vpop.f32.mrb[63].mxu1  ;;  %6115 = vmatmul.mubr.bf16.gmra.mrb[72].mxu0 %v1919_v2  ;;  %v1912_v12 = vmax.f32 %v1892_v51, 0.0 }
 0x78a   : > { %v1887_v11 = vadd.f32 %v5223_v8, %v1886_v10  ;;  %v1910_v14 = vmax.f32 %v1884_v6, 0.0  ;;  %v6731_v8 = vld [vmem:[%s7763_s5 + $0x48] sm:$0xff]  }
 0x78b   : > { %v1913_v13 = vmax.f32 %v1895_v9, 0.0  ;;  %6156 = vmatprep.subr.bf16.mxu0 %v6731_v8 }
 0x78c   : > { %v1911_v19 = vmax.f32 %v1887_v11, 0.0  ;;  %6157 = vmatpush3.bf16.msra.mxu0 %v6731_v8 }
 0x78d   : > { %v1921_v20 = vpack.c.bf16 %v1913_v13, %v1912_v12  ;;  %6158 = vmatprep.subr.bf16.mxu0 %v6732_v25 }
 0x78e   : > { %v1920_v21 = vpack.c.bf16 %v1911_v19, %v1910_v14 }
 0x790   : > { %6118 = vmatprep.mubr.bf16.mxu0 %v1920_v21  ;;  %6159 = vmatpush3.bf16.msra.mxu0 %v6732_v25 }
 0x791   : > { %6119 = vmatmul.mubr.bf16.gmra.mrb[76].mxu0 %v1921_v20  ;;  %6160 = vmatprep.subr.bf16.mxu0 %v6733_v26 }
 0x794   : > { %6161 = vmatpush3.bf16.msra.mxu0 %v6733_v26 }
 0x795   : > { %6162 = vmatprep.subr.bf16.mxu0 %v6734_v27 }
 0x798   : > { %6163 = vmatpush3.bf16.msra.mxu0 %v6734_v27 }
 0x799   : > { %6164 = vmatprep.subr.bf16.mxu0 %v6735_v28 }
 0x79c   : > { %6165 = vmatpush3.bf16.msra.mxu0 %v6735_v28 }
 0x84c   : > { %v6108_v30 = vpop.f32.mrb[64].mxu0 }
 0x84d   : > { %v2038_v31 = vadd.f32 %v6108_v30, %v5233_v29  ;;  %v2029_v32 = vpop.f32.mrb[65].mxu0 }
 0x84e   : > { %v2030_v38 = vadd.f32 %v5233_v29, %v2029_v32  ;;  %v6109_v39 = vpop.f32.mrb[66].mxu0 }
 0x84f   : > { %v2041_v40 = vadd.f32 %v6109_v39, %v5233_v29  ;;  %v2032_v41 = vpop.f32.mrb[67].mxu0  ;;  %v2094_v47 = vmax.f32 %v2038_v31, 0.0 }
 0x850   : > { %v2033_v42 = vadd.f32 %v5233_v29, %v2032_v41  ;;  %v2092_v48 = vmax.f32 %v2030_v38, 0.0 }
 0x851   : > { %v2095_v37 = vmax.f32 %v2041_v40, 0.0 }
 0x852   : > { %v2093_v49 = vmax.f32 %v2033_v42, 0.0 }
 0x853   : > { %v2109_v50 = vpack.c.bf16 %v2095_v37, %v2094_v47  ;;  %v6736_v37 = vld [vmem:[%s7763_s5 + $0x70] sm:$0xff]  }
 0x854   : > { %v2108_v52 = vpack.c.bf16 %v2093_v49, %v2092_v48  ;;  %v6112_v53 = vpop.f32.mrb[68].mxu0  ;;  %6166 = vmatprep.subr.bf16.mxu0 %v6736_v37  ;;  %v6737_v48 = vld [vmem:[%s7763_s5 + $0x78] sm:$0xff]   ;;  %v6739_v49 = vld [vmem:[%s7764_s6 + $0x28] sm:$0xff]  }
 0x855   : > { %v2054_v54 = vadd.f32 %v6112_v53, %v5233_v29  ;;  %v2045_v55 = vpop.f32.mrb[69].mxu0  ;;  %6167 = vmatpush3.bf16.msra.mxu0 %v6736_v37 }
 0x856   : > { %v2046_v56 = vadd.f32 %v5233_v29, %v2045_v55  ;;  %v6113_v57 = vpop.f32.mrb[70].mxu0  ;;  %6138 = vmatprep.mubr.bf16.mxu1 %v2108_v52  ;;  %6168 = vmatprep.subr.bf16.mxu0 %v6737_v48  ;;  %v5243_v52 = vld [vmem:[%s7762_s4 + $0x5] ss:$0 sm:$0xff] }
 0x857   : > { %v2057_v58 = vadd.f32 %v6113_v57, %v5233_v29  ;;  %v2048_v59 = vpop.f32.mrb[71].mxu0  ;;  %6139 = vmatmul.mubr.bf16.vlgmr.msra.gmra.mrb[64].mxu1 %v2109_v50  ;;  %v2098_v1 = vmax.f32 %v2054_v54, 0.0  ;;  %v6740_v50 = vld [vmem:[%s7764_s6 + $0x30] sm:$0xff]  }
 0x858   : > { %v2049_v60 = vadd.f32 %v5233_v29, %v2048_v59  ;;  %v2096_v3 = vmax.f32 %v2046_v56, 0.0 }
 0x859   : > { %v2099_v2 = vmax.f32 %v2057_v58, 0.0  ;;  %6169 = vmatpush3.bf16.msra.mxu0 %v6737_v48 }
 0x85a   : > { %v2097_v4 = vmax.f32 %v2049_v60, 0.0 }
 0x85b   : > { %v2111_v51 = vpack.c.bf16 %v2099_v2, %v2098_v1 }
 0x85c   : > { %v2110_v5 = vpack.c.bf16 %v2097_v4, %v2096_v3  ;;  %v6116_v6 = vpop.f32.mrb[72].mxu0 }
 0x85d   : > { %v2070_v7 = vadd.f32 %v6116_v6, %v5233_v29  ;;  %v2061_v9 = vpop.f32.mrb[73].mxu0 }
 0x85e   : > { %v2062_v10 = vadd.f32 %v5233_v29, %v2061_v9  ;;  %v6117_v11 = vpop.f32.mrb[74].mxu0  ;;  %6142 = vmatprep.mubr.bf16.mxu1 %v2110_v5 }
 0x85f   : > { %v2073_v12 = vadd.f32 %v6117_v11, %v5233_v29  ;;  %v2064_v13 = vpop.f32.mrb[75].mxu0  ;;  %6143 = vmatmul.mubr.bf16.gmra.mrb[68].mxu1 %v2111_v51  ;;  %v2102_v19 = vmax.f32 %v2070_v7, 0.0 }
 0x860   : > { %v2065_v14 = vadd.f32 %v5233_v29, %v2064_v13  ;;  %v2100_v21 = vmax.f32 %v2062_v10, 0.0 }
 0x861   : > { %v2103_v20 = vmax.f32 %v2073_v12, 0.0 }
 0x862   : > { %v2101_v22 = vmax.f32 %v2065_v14, 0.0 }
 0x863   : > { %v2113_v23 = vpack.c.bf16 %v2103_v20, %v2102_v19 }
 0x864   : > { %v2112_v24 = vpack.c.bf16 %v2101_v22, %v2100_v21  ;;  %v6120_v8 = vpop.f32.mrb[76].mxu0 }
 0x865   : > { %v2086_v25 = vadd.f32 %v6120_v8, %v5233_v29  ;;  %v2077_v26 = vpop.f32.mrb[77].mxu0 }
 0x866   : > { %v2078_v27 = vadd.f32 %v5233_v29, %v2077_v26  ;;  %v6121_v28 = vpop.f32.mrb[78].mxu0  ;;  %6146 = vmatprep.mubr.bf16.mxu1 %v2112_v24 }
 0x867   : > { %v2089_v30 = vadd.f32 %v6121_v28, %v5233_v29  ;;  %v2080_v31 = vpop.f32.mrb[79].mxu0  ;;  %6147 = vmatmul.mubr.bf16.gmra.mrb[72].mxu1 %v2113_v23  ;;  %v2106_v38 = vmax.f32 %v2086_v25, 0.0 }
 0x868   : > { %v2081_v32 = vadd.f32 %v5233_v29, %v2080_v31  ;;  %v2104_v40 = vmax.f32 %v2078_v27, 0.0  ;;  %v6738_v29 = vld [vmem:[%s7764_s6 + $0x20] sm:$0xff]  }
 0x869   : > { %v2107_v39 = vmax.f32 %v2089_v30, 0.0  ;;  %6186 = vmatprep.subr.bf16.mxu1 %v6738_v29 }
 0x86a   : > { %v2105_v41 = vmax.f32 %v2081_v32, 0.0  ;;  %6187 = vmatpush3.bf16.msra.mxu1 %v6738_v29 }
 0x86b   : > { %v2115_v42 = vpack.c.bf16 %v2107_v39, %v2106_v38  ;;  %6188 = vmatprep.subr.bf16.mxu1 %v6739_v49 }
 0x86c   : > { %v2114_v47 = vpack.c.bf16 %v2105_v41, %v2104_v40 }
 0x86e   : > { %6150 = vmatprep.mubr.bf16.mxu1 %v2114_v47  ;;  %6189 = vmatpush3.bf16.msra.mxu1 %v6739_v49 }
 0x86f   : > { %6151 = vmatmul.mubr.bf16.gmra.mrb[76].mxu1 %v2115_v42  ;;  %6190 = vmatprep.subr.bf16.mxu1 %v6740_v50 }
 0x872   : > { %6191 = vmatpush3.bf16.msra.mxu1 %v6740_v50 }
 0x92a   : > { %v6140_v53 = vpop.f32.mrb[64].mxu1 }
 0x92b   : > { %v2232_v54 = vadd.f32 %v6140_v53, %v5243_v52  ;;  %v2223_v55 = vpop.f32.mrb[65].mxu1 }
 0x92c   : > { %v2224_v56 = vadd.f32 %v5243_v52, %v2223_v55  ;;  %v6141_v57 = vpop.f32.mrb[66].mxu1 }
 0x92d   : > { %v2235_v58 = vadd.f32 %v6141_v57, %v5243_v52  ;;  %v2226_v59 = vpop.f32.mrb[67].mxu1  ;;  %v2288_v1 = vmax.f32 %v2232_v54, 0.0 }
 0x92e   : > { %v2227_v60 = vadd.f32 %v5243_v52, %v2226_v59  ;;  %v2286_v3 = vmax.f32 %v2224_v56, 0.0 }
 0x92f   : > { %v2289_v2 = vmax.f32 %v2235_v58, 0.0 }
 0x930   : > { %v2287_v4 = vmax.f32 %v2227_v60, 0.0 }
 0x931   : > { %v2303_v51 = vpack.c.bf16 %v2289_v2, %v2288_v1  ;;  %v6741_v2 = vld [vmem:[%s7764_s6 + $0x38] sm:$0xff]  }
 0x932   : > { %v2302_v5 = vpack.c.bf16 %v2287_v4, %v2286_v3  ;;  %v6144_v6 = vpop.f32.mrb[68].mxu1  ;;  %6192 = vmatprep.subr.bf16.mxu1 %v6741_v2  ;;  %v6742_v3 = vld [vmem:[#allocation2 + $0x80] sm:$0xff]   ;;  %v6743_v4 = vld [vmem:[#allocation2 + $0x88] sm:$0xff]  }
 0x933   : > { %v2248_v7 = vadd.f32 %v6144_v6, %v5243_v52  ;;  %v2239_v9 = vpop.f32.mrb[69].mxu1  ;;  %6193 = vmatpush3.bf16.msra.mxu1 %v6741_v2  ;;  %6210 = vmatprep.subr.bf16.mxu0 %v6742_v3  ;;  %v6747_v6 = vld [vmem:[#allocation2 + $0xa8] sm:$0xff]   ;;  %v6749_v2 = vld [vmem:[#allocation2 + $0xb8] sm:$0xff]  }
 0x934   : > { %v2240_v10 = vadd.f32 %v5243_v52, %v2239_v9  ;;  %v6145_v11 = vpop.f32.mrb[70].mxu1  ;;  %6170 = vmatprep.mubr.bf16.mxu0 %v2302_v5  ;;  %v6746_v5 = vld [vmem:[#allocation2 + $0xa0] sm:$0xff]  }
 0x935   : > { %v2251_v12 = vadd.f32 %v6145_v11, %v5243_v52  ;;  %v2242_v13 = vpop.f32.mrb[71].mxu1  ;;  %6171 = vmatmul.mubr.bf16.vlgmr.msra.gmra.mrb[80].mxu0 %v2303_v51  ;;  %v2292_v19 = vmax.f32 %v2248_v7, 0.0  ;;  %v6745_v51 = vld [vmem:[#allocation2 + $0x98] sm:$0xff]  }
 0x936   : > { %v2243_v14 = vadd.f32 %v5243_v52, %v2242_v13  ;;  %v2290_v21 = vmax.f32 %v2240_v10, 0.0  ;;  %6211 = vmatpush3.bf16.msra.mxu0 %v6742_v3  ;;  %v6750_v3 = vld [vmem:[#allocation7 + $0x180] sm:$0xff]  }
 0x937   : > { %v2293_v20 = vmax.f32 %v2251_v12, 0.0  ;;  %6212 = vmatprep.subr.bf16.mxu0 %v6743_v4  ;;  %6242 = vmatprep.subr.bf16.mxu1 %v6750_v3 }
 0x938   : > { %v2291_v22 = vmax.f32 %v2243_v14, 0.0 }
 0x939   : > { %v2305_v23 = vpack.c.bf16 %v2293_v20, %v2292_v19 }
 0x93a   : > { %v2304_v24 = vpack.c.bf16 %v2291_v22, %v2290_v21  ;;  %v6148_v8 = vpop.f32.mrb[72].mxu1  ;;  %6213 = vmatpush3.bf16.msra.mxu0 %v6743_v4  ;;  %v6751_v4 = vld [vmem:[#allocation7 + $0x188] sm:$0xff]  }
 0x93b   : > { %v2264_v25 = vadd.f32 %v6148_v8, %v5243_v52  ;;  %v2255_v26 = vpop.f32.mrb[73].mxu1 }
 0x93c   : > { %v2256_v27 = vadd.f32 %v5243_v52, %v2255_v26  ;;  %v6149_v28 = vpop.f32.mrb[74].mxu1  ;;  %6174 = vmatprep.mubr.bf16.mxu0 %v2304_v24 }
 0x93d   : > { %v2267_v30 = vadd.f32 %v6149_v28, %v5243_v52  ;;  %v2258_v31 = vpop.f32.mrb[75].mxu1  ;;  %6175 = vmatmul.mubr.bf16.gmra.mrb[84].mxu0 %v2305_v23  ;;  %v2296_v38 = vmax.f32 %v2264_v25, 0.0 }
 0x93e   : > { %v2259_v32 = vadd.f32 %v5243_v52, %v2258_v31  ;;  %v2294_v40 = vmax.f32 %v2256_v27, 0.0 }
 0x93f   : > { %v2297_v39 = vmax.f32 %v2267_v30, 0.0 }
 0x940   : > { %v2295_v41 = vmax.f32 %v2259_v32, 0.0 }
 0x941   : > { %v2307_v42 = vpack.c.bf16 %v2297_v39, %v2296_v38 }
 0x942   : > { %v2306_v47 = vpack.c.bf16 %v2295_v41, %v2294_v40  ;;  %v6152_v37 = vpop.f32.mrb[76].mxu1 }
 0x943   : > { %v2280_v48 = vadd.f32 %v6152_v37, %v5243_v52  ;;  %v2271_v29 = vpop.f32.mrb[77].mxu1 }
 0x944   : > { %v2272_v49 = vadd.f32 %v5243_v52, %v2271_v29  ;;  %v6153_v50 = vpop.f32.mrb[78].mxu1  ;;  %6178 = vmatprep.mubr.bf16.mxu0 %v2306_v47 }
 0x945   : > { %v2283_v53 = vadd.f32 %v6153_v50, %v5243_v52  ;;  %v2274_v54 = vpop.f32.mrb[79].mxu1  ;;  %6179 = vmatmul.mubr.bf16.gmra.mrb[88].mxu0 %v2307_v42  ;;  %v2300_v56 = vmax.f32 %v2280_v48, 0.0 }
 0x946   : > { %v2275_v55 = vadd.f32 %v5243_v52, %v2274_v54  ;;  %v2298_v58 = vmax.f32 %v2272_v49, 0.0  ;;  %v6744_v52 = vld [vmem:[#allocation2 + $0x90] sm:$0xff]  }
 0x947   : > { %v2301_v57 = vmax.f32 %v2283_v53, 0.0  ;;  %6214 = vmatprep.subr.bf16.mxu0 %v6744_v52 }
 0x948   : > { %v2299_v59 = vmax.f32 %v2275_v55, 0.0  ;;  %6215 = vmatpush3.bf16.msra.mxu0 %v6744_v52  ;;  %v6752_v52 = vld [vmem:[#allocation7 + $0x190] sm:$0xff]  }
 0x949   : > { %v2309_v60 = vpack.c.bf16 %v2301_v57, %v2300_v56  ;;  %6216 = vmatprep.subr.bf16.mxu0 %v6745_v51 }
 0x94a   : > { %v2308_v1 = vpack.c.bf16 %v2299_v59, %v2298_v58 }
 0x94c   : > { %6182 = vmatprep.mubr.bf16.mxu0 %v2308_v1  ;;  %6217 = vmatpush3.bf16.msra.mxu0 %v6745_v51  ;;  %v6748_v1 = vld [vmem:[#allocation2 + $0xb0] sm:$0xff]   ;;  %v6753_v51 = vld [vmem:[#allocation7 + $0x198] sm:$0xff]  }
 0x94d   : > { %6183 = vmatmul.mubr.bf16.gmra.mrb[92].mxu0 %v2309_v60  ;;  %6218 = vmatprep.subr.bf16.mxu0 %v6746_v5 }
 0x950   : > { %6219 = vmatpush3.bf16.msra.mxu0 %v6746_v5  ;;  %v6754_v5 = vld [vmem:[#allocation7 + $0x1a0] sm:$0xff]  }
 0x951   : > { %6220 = vmatprep.subr.bf16.mxu0 %v6747_v6 }
 0x954   : > { %6221 = vmatpush3.bf16.msra.mxu0 %v6747_v6  ;;  %v6755_v6 = vld [vmem:[#allocation7 + $0x1a8] sm:$0xff]  }
 0x955   : > { %6222 = vmatprep.subr.bf16.mxu0 %v6748_v1 }
 0x958   : > { %6223 = vmatpush3.bf16.msra.mxu0 %v6748_v1 }
 0x959   : > { %6224 = vmatprep.subr.bf16.mxu0 %v6749_v2 }
 0x95c   : > { %6225 = vmatpush3.bf16.msra.mxu0 %v6749_v2 }
 0xa08   : > { %v6172_v7 = vpop.f32.mrb[80].mxu0 }
 0xa09   : > { %v2409_v9 = vpop.f32.mrb[81].mxu0  ;;  %v2474_v11 = vmax.f32 %v6172_v7, 0.0 }
 0xa0a   : > { %v6173_v10 = vpop.f32.mrb[82].mxu0  ;;  %v2472_v14 = vmax.f32 %v2409_v9, 0.0 }
 0xa0b   : > { %v2475_v12 = vmax.f32 %v6173_v10, 0.0  ;;  %v2412_v13 = vpop.f32.mrb[83].mxu0 }
 0xa0c   : > { %v2473_v19 = vmax.f32 %v2412_v13, 0.0  ;;  %v5297_v13 = vld [vmem:[%s7765_s7 + $0x1] ss:$0 sm:$0xff] }
 0xa0d   : > { %v2489_v20 = vpack.c.bf16 %v2475_v12, %v2474_v11 }
 0xa0e   : > { %v2488_v21 = vpack.c.bf16 %v2473_v19, %v2472_v14 }
 0xa10   : > { %v6176_v22 = vpop.f32.mrb[84].mxu0  ;;  %6194 = vmatprep.mubr.msk.bf16.mxu1 %vm1365_vm0, %v2488_v21 }
 0xa11   : > { %v2425_v23 = vpop.f32.mrb[85].mxu0  ;;  %6195 = vmatmul.mubr.msk.bf16.vlgmr.msra.gmra.mrb[80].mxu1 %vm1365_vm0, %v2489_v20  ;;  %v2478_v8 = vmax.f32 %v6176_v22, 0.0 }
 0xa12   : > { %v6177_v24 = vpop.f32.mrb[86].mxu0  ;;  %v2476_v27 = vmax.f32 %v2425_v23, 0.0  ;;  %6243 = vmatpush3.bf16.msra.mxu1 %v6750_v3 }
 0xa13   : > { %v2479_v25 = vmax.f32 %v6177_v24, 0.0  ;;  %v2428_v26 = vpop.f32.mrb[87].mxu0  ;;  %6244 = vmatprep.subr.bf16.mxu1 %v6751_v4 }
 0xa14   : > { %v2477_v28 = vmax.f32 %v2428_v26, 0.0 }
 0xa15   : > { %v2491_v30 = vpack.c.bf16 %v2479_v25, %v2478_v8 }
 0xa16   : > { %v2490_v31 = vpack.c.bf16 %v2477_v28, %v2476_v27  ;;  %6245 = vmatpush3.bf16.msra.mxu1 %v6751_v4  ;;  %v6758_v4 = vld [vmem:[#allocation7 + $0x1c0] sm:$0xff]  }
 0xa17   : > { %6246 = vmatprep.subr.bf16.mxu1 %v6752_v52  ;;  %6274 = vmatprep.subr.bf16.mxu0 %v6758_v4 }
 0xa18   : > { %v6180_v32 = vpop.f32.mrb[88].mxu0  ;;  %6198 = vmatprep.mubr.msk.bf16.mxu1 %vm1365_vm0, %v2490_v31 }
 0xa19   : > { %v2441_v38 = vpop.f32.mrb[89].mxu0  ;;  %6199 = vmatmul.mubr.msk.bf16.gmra.mrb[84].mxu1 %vm1365_vm0, %v2491_v30  ;;  %v2482_v40 = vmax.f32 %v6180_v32, 0.0 }
 0xa1a   : > { %v6181_v39 = vpop.f32.mrb[90].mxu0  ;;  %v2480_v47 = vmax.f32 %v2441_v38, 0.0  ;;  %6247 = vmatpush3.bf16.msra.mxu1 %v6752_v52  ;;  %v6759_v52 = vld [vmem:[#allocation7 + $0x1c8] sm:$0xff]  }
 0xa1b   : > { %v2483_v41 = vmax.f32 %v6181_v39, 0.0  ;;  %v2444_v42 = vpop.f32.mrb[91].mxu0  ;;  %6248 = vmatprep.subr.bf16.mxu1 %v6753_v51 }
 0xa1c   : > { %v2481_v37 = vmax.f32 %v2444_v42, 0.0 }
 0xa1d   : > { %v2493_v48 = vpack.c.bf16 %v2483_v41, %v2482_v40 }
 0xa1e   : > { %v2492_v29 = vpack.c.bf16 %v2481_v37, %v2480_v47  ;;  %6249 = vmatpush3.bf16.msra.mxu1 %v6753_v51  ;;  %v6760_v51 = vld [vmem:[#allocation7 + $0x1d0] sm:$0xff]  }
 0xa1f   : > { %6250 = vmatprep.subr.bf16.mxu1 %v6754_v5 }
 0xa20   : > { %v6184_v49 = vpop.f32.mrb[92].mxu0  ;;  %6202 = vmatprep.mubr.msk.bf16.mxu1 %vm1365_vm0, %v2492_v29 }
 0xa21   : > { %v2457_v50 = vpop.f32.mrb[93].mxu0  ;;  %6203 = vmatmul.mubr.msk.bf16.gmra.mrb[88].mxu1 %vm1365_vm0, %v2493_v48  ;;  %v2486_v54 = vmax.f32 %v6184_v49, 0.0 }
 0xa22   : > { %v6185_v53 = vpop.f32.mrb[94].mxu0  ;;  %v2484_v57 = vmax.f32 %v2457_v50, 0.0  ;;  %6251 = vmatpush3.bf16.msra.mxu1 %v6754_v5  ;;  %v6761_v5 = vld [vmem:[#allocation7 + $0x1d8] sm:$0xff]  }
 0xa23   : > { %v2487_v55 = vmax.f32 %v6185_v53, 0.0  ;;  %v2460_v56 = vpop.f32.mrb[95].mxu0  ;;  %6252 = vmatprep.subr.bf16.mxu1 %v6755_v6 }
 0xa24   : > { %v2485_v58 = vmax.f32 %v2460_v56, 0.0 }
 0xa25   : > { %v2495_v59 = vpack.c.bf16 %v2487_v55, %v2486_v54 }
 0xa26   : > { %v2494_v60 = vpack.c.bf16 %v2485_v58, %v2484_v57  ;;  %6253 = vmatpush3.bf16.msra.mxu1 %v6755_v6  ;;  %v6762_v6 = vld [vmem:[#allocation7 + $0x1e0] sm:$0xff]  }
 0xa28   : > { %6206 = vmatprep.mubr.msk.bf16.mxu1 %vm1365_vm0, %v2494_v60 }
 0xa29   : > { %6207 = vmatmul.mubr.msk.bf16.gmra.mrb[92].mxu1 %vm1365_vm0, %v2495_v59 }
 0xae4   : > { %v6196_v7 = vpop.f32.mrb[80].mxu1 }
 0xae5   : > { %v2587_v9 = vpop.f32.mrb[81].mxu1  ;;  %v2652_v12 = vadd.f32 %v6196_v7, %v7289_v46  ;;  %v6763_v7 = vld [vmem:[#allocation7 + $0x1e8] sm:$0xff]  }
 0xae6   : > { %v2650_v10 = vadd.f32 %v2587_v9, %v7283_v44  ;;  %v6197_v11 = vpop.f32.mrb[82].mxu1  ;;  %v5298_v9 = vld [vmem:[#allocation5 + $0x2] ss:$0 sm:$0xff] }
 0xae7   : > { %v2653_v14 = vadd.f32 %v6197_v11, %v7280_v43  ;;  %v2590_v19 = vpop.f32.mrb[83].mxu1  ;;  %v7421_v24 = vadd.f32 %v5297_v13, %v2652_v12 }
 0xae8   : > { %v2651_v20 = vadd.f32 %v2590_v19, %v7286_v45  ;;  %v7417_v22 = vadd.f32 %v5297_v13, %v2650_v10 }
 0xae9   : > { %v7415_v21 = vadd.f32 %v5297_v13, %v2653_v14 }
 0xaea   : > { %v7419_v23 = vadd.f32 %v5297_v13, %v2651_v20 }
 0xaeb   : > { %v2691_v8 = vpack.c.bf16 %v7415_v21, %v7421_v24 }
 0xaec   : > { %v6200_v44 = vpop.f32.mrb[84].mxu1  ;;  %v2690_v46 = vpack.c.bf16 %v7419_v23, %v7417_v22 }
 0xaed   : > { %v2603_v25 = vpop.f32.mrb[85].mxu1  ;;  %v2656_v45 = vadd.f32 %v6200_v44, %v7309_v0 }
 0xaee   : > { %v2654_v43 = vadd.f32 %v2603_v25, %v7303_v62  ;;  %v6201_v26 = vpop.f32.mrb[86].mxu1  ;;  %6226 = vmatprep.mubr.bf16.mxu0 %v2690_v46 }
 0xaef   : > { %v2657_v27 = vadd.f32 %v6201_v26, %v7300_v61  ;;  %v2606_v28 = vpop.f32.mrb[87].mxu1  ;;  %6227 = vmatmul.mubr.bf16.vlgmr.msra.gmra.mrb[96].mxu0 %v2691_v8  ;;  %v7437_v39 = vadd.f32 %v5297_v13, %v2656_v45 }
 0xaf0   : > { %v2655_v30 = vadd.f32 %v2606_v28, %v7306_v63  ;;  %v7433_v32 = vadd.f32 %v5297_v13, %v2654_v43  ;;  %6275 = vmatpush3.bf16.msra.mxu0 %v6758_v4 }
 0xaf1   : > { %v7431_v31 = vadd.f32 %v5297_v13, %v2657_v27  ;;  %6276 = vmatprep.subr.bf16.mxu0 %v6759_v52 }
 0xaf2   : > { %v7435_v38 = vadd.f32 %v5297_v13, %v2655_v30 }
 0xaf3   : > { %v2693_v61 = vpack.c.bf16 %v7431_v31, %v7437_v39 }
 0xaf4   : > { %v6204_v40 = vpop.f32.mrb[88].mxu1  ;;  %v2692_v62 = vpack.c.bf16 %v7435_v38, %v7433_v32  ;;  %6277 = vmatpush3.bf16.msra.mxu0 %v6759_v52 }
 0xaf5   : > { %v2619_v41 = vpop.f32.mrb[89].mxu1  ;;  %v2660_v63 = vadd.f32 %v6204_v40, %v7329_v18  ;;  %6278 = vmatprep.subr.bf16.mxu0 %v6760_v51 }
 0xaf6   : > { %v2658_v0 = vadd.f32 %v2619_v41, %v7323_v16  ;;  %v6205_v42 = vpop.f32.mrb[90].mxu1  ;;  %6230 = vmatprep.mubr.bf16.mxu0 %v2692_v62 }
 0xaf7   : > { %v2661_v47 = vadd.f32 %v6205_v42, %v7320_v15  ;;  %v2622_v37 = vpop.f32.mrb[91].mxu1  ;;  %6231 = vmatmul.mubr.bf16.gmra.mrb[100].mxu0 %v2693_v61  ;;  %v7453_v53 = vadd.f32 %v5297_v13, %v2660_v63 }
 0xaf8   : > { %v2659_v48 = vadd.f32 %v2622_v37, %v7326_v17  ;;  %v7449_v49 = vadd.f32 %v5297_v13, %v2658_v0  ;;  %6279 = vmatpush3.bf16.msra.mxu0 %v6760_v51 }
 0xaf9   : > { %v7447_v29 = vadd.f32 %v5297_v13, %v2661_v47  ;;  %6280 = vmatprep.subr.bf16.mxu0 %v6761_v5 }
 0xafa   : > { %v7451_v50 = vadd.f32 %v5297_v13, %v2659_v48 }
 0xafb   : > { %v2695_v15 = vpack.c.bf16 %v7447_v29, %v7453_v53 }
 0xafc   : > { %v6208_v54 = vpop.f32.mrb[92].mxu1  ;;  %v2694_v16 = vpack.c.bf16 %v7451_v50, %v7449_v49  ;;  %6281 = vmatpush3.bf16.msra.mxu0 %v6761_v5 }
 0xafd   : > { %v2635_v55 = vpop.f32.mrb[93].mxu1  ;;  %v2664_v17 = vadd.f32 %v6208_v54, %v7349_v36  ;;  %6282 = vmatprep.subr.bf16.mxu0 %v6762_v6 }
 0xafe   : > { %v2662_v18 = vadd.f32 %v2635_v55, %v7343_v34  ;;  %v6209_v56 = vpop.f32.mrb[94].mxu1  ;;  %6234 = vmatprep.mubr.bf16.mxu0 %v2694_v16 }
 0xaff   : > { %v2665_v57 = vadd.f32 %v6209_v56, %v7340_v33  ;;  %v2638_v58 = vpop.f32.mrb[95].mxu1  ;;  %6235 = vmatmul.mubr.bf16.gmra.mrb[104].mxu0 %v2695_v15  ;;  %v7469_v3 = vadd.f32 %v5297_v13, %v2664_v17  ;;  %v6756_v33 = vld [vmem:[#allocation7 + $0x1b0] sm:$0xff]  }
 0xb00   : > { %v2663_v59 = vadd.f32 %v2638_v58, %v7346_v35  ;;  %v7465_v1 = vadd.f32 %v5297_v13, %v2662_v18  ;;  %6254 = vmatprep.subr.bf16.mxu1 %v6756_v33  ;;  %v6757_v35 = vld [vmem:[#allocation7 + $0x1b8] sm:$0xff]   ;;  %6283 = vmatpush3.bf16.msra.mxu0 %v6762_v6 }
 0xb01   : > { %v7463_v60 = vadd.f32 %v5297_v13, %v2665_v57  ;;  %6255 = vmatpush3.bf16.msra.mxu1 %v6756_v33  ;;  %6284 = vmatprep.subr.bf16.mxu0 %v6763_v7 }
 0xb02   : > { %v7467_v2 = vadd.f32 %v5297_v13, %v2663_v59  ;;  %6256 = vmatprep.subr.bf16.mxu1 %v6757_v35 }
 0xb03   : > { %v2697_v36 = vpack.c.bf16 %v7463_v60, %v7469_v3 }
 0xb04   : > { %v2696_v34 = vpack.c.bf16 %v7467_v2, %v7465_v1  ;;  %6285 = vmatpush3.bf16.msra.mxu0 %v6763_v7 }
 0xb05   : > { %6257 = vmatpush3.bf16.msra.mxu1 %v6757_v35 }
 0xb06   : > { %6238 = vmatprep.mubr.bf16.mxu0 %v2696_v34 }
 0xb07   : > { %6239 = vmatmul.mubr.bf16.gmra.mrb[108].mxu0 %v2697_v36 }
 0xbc2   : > { %v6228_v10 = vpop.f32.mrb[96].mxu0 }
 0xbc3   : > { %v2814_v11 = vadd.f32 %v6228_v10, %v5298_v9  ;;  %v2805_v12 = vpop.f32.mrb[97].mxu0 }
 0xbc4   : > { %v2806_v13 = vadd.f32 %v5298_v9, %v2805_v12  ;;  %v6229_v14 = vpop.f32.mrb[98].mxu0 }
 0xbc5   : > { %v2817_v19 = vadd.f32 %v6229_v14, %v5298_v9  ;;  %v2808_v20 = vpop.f32.mrb[99].mxu0  ;;  %v2870_v46 = vmax.f32 %v2814_v11, 0.0 }
 0xbc6   : > { %v2809_v44 = vadd.f32 %v5298_v9, %v2808_v20  ;;  %v2868_v25 = vmax.f32 %v2806_v13, 0.0 }
 0xbc7   : > { %v2871_v8 = vmax.f32 %v2817_v19, 0.0 }
 0xbc8   : > { %v2869_v43 = vmax.f32 %v2809_v44, 0.0 }
 0xbc9   : > { %v2885_v26 = vpack.c.bf16 %v2871_v8, %v2870_v46  ;;  %v6764_v8 = vld [vmem:[#allocation7 + $0x1f0] sm:$0xff]  }
 0xbca   : > { %v2884_v45 = vpack.c.bf16 %v2869_v43, %v2868_v25  ;;  %v6232_v27 = vpop.f32.mrb[100].mxu0  ;;  %6286 = vmatprep.subr.bf16.mxu0 %v6764_v8  ;;  %v6765_v25 = vld [vmem:[#allocation7 + $0x1f8] sm:$0xff]   ;;  %v6766_v43 = vld [vmem:[#allocation7 + $0x200] sm:$0xff]  }
 0xbcb   : > { %v2830_v28 = vadd.f32 %v6232_v27, %v5298_v9  ;;  %v2821_v30 = vpop.f32.mrb[101].mxu0  ;;  %6287 = vmatpush3.bf16.msra.mxu0 %v6764_v8  ;;  %6306 = vmatprep.subr.bf16.mxu1 %v6766_v43  ;;  %v6770_v27 = vld [vmem:[#allocation7 + $0x220] sm:$0xff]  }
 0xbcc   : > { %v2822_v40 = vadd.f32 %v5298_v9, %v2821_v30  ;;  %v6233_v62 = vpop.f32.mrb[102].mxu0  ;;  %6258 = vmatprep.mubr.bf16.mxu1 %v2884_v45  ;;  %6288 = vmatprep.subr.bf16.mxu0 %v6765_v25  ;;  %v6769_v45 = vld [vmem:[#allocation7 + $0x218] sm:$0xff]   ;;  %v5308_v30 = vld [vmem:[%s7762_s4 + $0x6] ss:$0 sm:$0xff] }
 0xbcd   : > { %v2833_v41 = vadd.f32 %v6233_v62, %v5298_v9  ;;  %v2824_v61 = vpop.f32.mrb[103].mxu0  ;;  %6259 = vmatmul.mubr.bf16.vlgmr.msra.gmra.mrb[96].mxu1 %v2885_v26  ;;  %v2874_v42 = vmax.f32 %v2830_v28, 0.0  ;;  %v6767_v26 = vld [vmem:[#allocation7 + $0x208] sm:$0xff]  }
 0xbce   : > { %v2825_v0 = vadd.f32 %v5298_v9, %v2824_v61  ;;  %v2872_v47 = vmax.f32 %v2822_v40, 0.0  ;;  %6307 = vmatpush3.bf16.msra.mxu1 %v6766_v43  ;;  %v6771_v28 = vld [vmem:[#allocation7 + $0x228] sm:$0xff]  }
 0xbcf   : > { %v2875_v63 = vmax.f32 %v2833_v41, 0.0  ;;  %6289 = vmatpush3.bf16.msra.mxu0 %v6765_v25  ;;  %6308 = vmatprep.subr.bf16.mxu1 %v6767_v26 }
 0xbd0   : > { %v2873_v37 = vmax.f32 %v2825_v0, 0.0 }
 0xbd1   : > { %v2887_v48 = vpack.c.bf16 %v2875_v63, %v2874_v42 }
 0xbd2   : > { %v2886_v54 = vpack.c.bf16 %v2873_v37, %v2872_v47  ;;  %v6236_v16 = vpop.f32.mrb[104].mxu0  ;;  %6309 = vmatpush3.bf16.msra.mxu1 %v6767_v26 }
 0xbd3   : > { %v2846_v55 = vadd.f32 %v6236_v16, %v5298_v9  ;;  %v2837_v15 = vpop.f32.mrb[105].mxu0 }
 0xbd4   : > { %v2838_v18 = vadd.f32 %v5298_v9, %v2837_v15  ;;  %v6237_v56 = vpop.f32.mrb[106].mxu0  ;;  %6262 = vmatprep.mubr.bf16.mxu1 %v2886_v54 }
 0xbd5   : > { %v2849_v17 = vadd.f32 %v6237_v56, %v5298_v9  ;;  %v2840_v57 = vpop.f32.mrb[107].mxu0  ;;  %6263 = vmatmul.mubr.bf16.gmra.mrb[100].mxu1 %v2887_v48  ;;  %v2878_v59 = vmax.f32 %v2846_v55, 0.0 }
 0xbd6   : > { %v2841_v58 = vadd.f32 %v5298_v9, %v2840_v57  ;;  %v2876_v36 = vmax.f32 %v2838_v18, 0.0 }
 0xbd7   : > { %v2879_v34 = vmax.f32 %v2849_v17, 0.0 }
 0xbd8   : > { %v2877_v33 = vmax.f32 %v2841_v58, 0.0 }
 0xbd9   : > { %v2889_v35 = vpack.c.bf16 %v2879_v34, %v2878_v59 }
 0xbda   : > { %v2888_v4 = vpack.c.bf16 %v2877_v33, %v2876_v36  ;;  %v6240_v52 = vpop.f32.mrb[108].mxu0 }
 0xbdb   : > { %v2862_v51 = vadd.f32 %v6240_v52, %v5298_v9  ;;  %v2853_v5 = vpop.f32.mrb[109].mxu0 }
 0xbdc   : > { %v2854_v6 = vadd.f32 %v5298_v9, %v2853_v5  ;;  %v6241_v7 = vpop.f32.mrb[110].mxu0  ;;  %6266 = vmatprep.mubr.bf16.mxu1 %v2888_v4 }
 0xbdd   : > { %v2865_v10 = vadd.f32 %v6241_v7, %v5298_v9  ;;  %v2856_v11 = vpop.f32.mrb[111].mxu0  ;;  %6267 = vmatmul.mubr.bf16.gmra.mrb[104].mxu1 %v2889_v35  ;;  %v2882_v13 = vmax.f32 %v2862_v51, 0.0 }
 0xbde   : > { %v2857_v12 = vadd.f32 %v5298_v9, %v2856_v11  ;;  %v2880_v19 = vmax.f32 %v2854_v6, 0.0  ;;  %v6768_v9 = vld [vmem:[#allocation7 + $0x210] sm:$0xff]  }
 0xbdf   : > { %v2883_v14 = vmax.f32 %v2865_v10, 0.0  ;;  %6310 = vmatprep.subr.bf16.mxu1 %v6768_v9 }
 0xbe0   : > { %v2881_v20 = vmax.f32 %v2857_v12, 0.0  ;;  %6311 = vmatpush3.bf16.msra.mxu1 %v6768_v9 }
 0xbe1   : > { %v2891_v44 = vpack.c.bf16 %v2883_v14, %v2882_v13  ;;  %6312 = vmatprep.subr.bf16.mxu1 %v6769_v45 }
 0xbe2   : > { %v2890_v46 = vpack.c.bf16 %v2881_v20, %v2880_v19 }
 0xbe4   : > { %6270 = vmatprep.mubr.bf16.mxu1 %v2890_v46  ;;  %6313 = vmatpush3.bf16.msra.mxu1 %v6769_v45 }
 0xbe5   : > { %6271 = vmatmul.mubr.bf16.gmra.mrb[108].mxu1 %v2891_v44  ;;  %6314 = vmatprep.subr.bf16.mxu1 %v6770_v27 }
 0xbe8   : > { %6315 = vmatpush3.bf16.msra.mxu1 %v6770_v27 }
 0xbe9   : > { %6316 = vmatprep.subr.bf16.mxu1 %v6771_v28 }
 0xbec   : > { %6317 = vmatpush3.bf16.msra.mxu1 %v6771_v28 }
 0xca0   : > { %v6260_v40 = vpop.f32.mrb[96].mxu1 }
 0xca1   : > { %v3008_v62 = vadd.f32 %v6260_v40, %v5308_v30  ;;  %v2999_v41 = vpop.f32.mrb[97].mxu1 }
 0xca2   : > { %v3000_v61 = vadd.f32 %v5308_v30, %v2999_v41  ;;  %v6261_v0 = vpop.f32.mrb[98].mxu1 }
 0xca3   : > { %v3011_v42 = vadd.f32 %v6261_v0, %v5308_v30  ;;  %v3002_v63 = vpop.f32.mrb[99].mxu1  ;;  %v3064_v37 = vmax.f32 %v3008_v62, 0.0 }
 0xca4   : > { %v3003_v47 = vadd.f32 %v5308_v30, %v3002_v63  ;;  %v3062_v54 = vmax.f32 %v3000_v61, 0.0 }
 0xca5   : > { %v3065_v48 = vmax.f32 %v3011_v42, 0.0 }
 0xca6   : > { %v3063_v16 = vmax.f32 %v3003_v47, 0.0 }
 0xca7   : > { %v3079_v55 = vpack.c.bf16 %v3065_v48, %v3064_v37  ;;  %v6772_v48 = vld [vmem:[#allocation7 + $0x230] sm:$0xff]  }
 0xca8   : > { %v3078_v15 = vpack.c.bf16 %v3063_v16, %v3062_v54  ;;  %v6264_v18 = vpop.f32.mrb[100].mxu1  ;;  %6318 = vmatprep.subr.bf16.mxu1 %v6772_v48  ;;  %v6773_v54 = vld [vmem:[#allocation7 + $0x238] sm:$0xff]  }
 0xca9   : > { %v3024_v56 = vadd.f32 %v6264_v18, %v5308_v30  ;;  %v3015_v17 = vpop.f32.mrb[101].mxu1  ;;  %6319 = vmatpush3.bf16.msra.mxu1 %v6772_v48  ;;  %v6774_v16 = vld [vmem:[%s7763_s5 + $0x80] sm:$0xff]  }
 0xcaa   : > { %v3016_v57 = vadd.f32 %v5308_v30, %v3015_v17  ;;  %v6265_v58 = vpop.f32.mrb[102].mxu1  ;;  %6290 = vmatprep.mubr.bf16.mxu0 %v3078_v15  ;;  %6320 = vmatprep.subr.bf16.mxu1 %v6773_v54  ;;  %v6777_v15 = vld [vmem:[%s7763_s5 + $0x98] sm:$0xff]   ;;  %v6778_v18 = vld [vmem:[%s7763_s5 + $0xa0] sm:$0xff]  }
 0xcab   : > { %v3027_v59 = vadd.f32 %v6265_v58, %v5308_v30  ;;  %v3018_v34 = vpop.f32.mrb[103].mxu1  ;;  %6291 = vmatmul.mubr.bf16.vlgmr.msra.gmra.mrb[112].mxu0 %v3079_v55  ;;  %v3068_v33 = vmax.f32 %v3024_v56, 0.0  ;;  %6338 = vmatprep.subr.bf16.mxu0 %v6774_v16  ;;  %v6776_v55 = vld [vmem:[%s7763_s5 + $0x90] sm:$0xff]   ;;  %v6779_v56 = vld [vmem:[%s7763_s5 + $0xa8] sm:$0xff]   ;;  %v5318_v17 = vld [vmem:[%s7762_s4 + $0x7] ss:$0 sm:$0xff] }
 0xcac   : > { %v3019_v36 = vadd.f32 %v5308_v30, %v3018_v34  ;;  %v3066_v4 = vmax.f32 %v3016_v57, 0.0  ;;  %6339 = vmatpush3.bf16.msra.mxu0 %v6774_v16 }
 0xcad   : > { %v3069_v35 = vmax.f32 %v3027_v59, 0.0  ;;  %6321 = vmatpush3.bf16.msra.mxu1 %v6773_v54 }
 0xcae   : > { %v3067_v52 = vmax.f32 %v3019_v36, 0.0 }
 0xcaf   : > { %v3081_v51 = vpack.c.bf16 %v3069_v35, %v3068_v33 }
 0xcb0   : > { %v3080_v5 = vpack.c.bf16 %v3067_v52, %v3066_v4  ;;  %v6268_v6 = vpop.f32.mrb[104].mxu1 }
 0xcb1   : > { %v3040_v7 = vadd.f32 %v6268_v6, %v5308_v30  ;;  %v3031_v10 = vpop.f32.mrb[105].mxu1 }
 0xcb2   : > { %v3032_v11 = vadd.f32 %v5308_v30, %v3031_v10  ;;  %v6269_v12 = vpop.f32.mrb[106].mxu1  ;;  %6294 = vmatprep.mubr.bf16.mxu0 %v3080_v5 }
 0xcb3   : > { %v3043_v13 = vadd.f32 %v6269_v12, %v5308_v30  ;;  %v3034_v14 = vpop.f32.mrb[107].mxu1  ;;  %6295 = vmatmul.mubr.bf16.gmra.mrb[116].mxu0 %v3081_v51  ;;  %v3072_v20 = vmax.f32 %v3040_v7, 0.0 }
 0xcb4   : > { %v3035_v19 = vadd.f32 %v5308_v30, %v3034_v14  ;;  %v3070_v46 = vmax.f32 %v3032_v11, 0.0 }
 0xcb5   : > { %v3073_v44 = vmax.f32 %v3043_v13, 0.0 }
 0xcb6   : > { %v3071_v8 = vmax.f32 %v3035_v19, 0.0 }
 0xcb7   : > { %v3083_v25 = vpack.c.bf16 %v3073_v44, %v3072_v20 }
 0xcb8   : > { %v3082_v43 = vpack.c.bf16 %v3071_v8, %v3070_v46  ;;  %v6272_v26 = vpop.f32.mrb[108].mxu1 }
 0xcb9   : > { %v3056_v9 = vadd.f32 %v6272_v26, %v5308_v30  ;;  %v3047_v45 = vpop.f32.mrb[109].mxu1 }
 0xcba   : > { %v3048_v27 = vadd.f32 %v5308_v30, %v3047_v45  ;;  %v6273_v28 = vpop.f32.mrb[110].mxu1  ;;  %6298 = vmatprep.mubr.bf16.mxu0 %v3082_v43 }
 0xcbb   : > { %v3059_v40 = vadd.f32 %v6273_v28, %v5308_v30  ;;  %v3050_v62 = vpop.f32.mrb[111].mxu1  ;;  %6299 = vmatmul.mubr.bf16.gmra.mrb[120].mxu0 %v3083_v25  ;;  %v3076_v61 = vmax.f32 %v3056_v9, 0.0 }
 0xcbc   : > { %v3051_v41 = vadd.f32 %v5308_v30, %v3050_v62  ;;  %v3074_v42 = vmax.f32 %v3048_v27, 0.0  ;;  %v6775_v30 = vld [vmem:[%s7763_s5 + $0x88] sm:$0xff]  }
 0xcbd   : > { %v3077_v0 = vmax.f32 %v3059_v40, 0.0  ;;  %6340 = vmatprep.subr.bf16.mxu0 %v6775_v30 }
 0xcbe   : > { %v3075_v63 = vmax.f32 %v3051_v41, 0.0  ;;  %6341 = vmatpush3.bf16.msra.mxu0 %v6775_v30 }
 0xcbf   : > { %v3085_v47 = vpack.c.bf16 %v3077_v0, %v3076_v61  ;;  %6342 = vmatprep.subr.bf16.mxu0 %v6776_v55 }
 0xcc0   : > { %v3084_v37 = vpack.c.bf16 %v3075_v63, %v3074_v42 }
 0xcc2   : > { %6302 = vmatprep.mubr.bf16.mxu0 %v3084_v37  ;;  %6343 = vmatpush3.bf16.msra.mxu0 %v6776_v55 }
 0xcc3   : > { %6303 = vmatmul.mubr.bf16.gmra.mrb[124].mxu0 %v3085_v47  ;;  %6344 = vmatprep.subr.bf16.mxu0 %v6777_v15 }
 0xcc6   : > { %6345 = vmatpush3.bf16.msra.mxu0 %v6777_v15 }
 0xcc7   : > { %6346 = vmatprep.subr.bf16.mxu0 %v6778_v18 }
 0xcca   : > { %6347 = vmatpush3.bf16.msra.mxu0 %v6778_v18 }
 0xccb   : > { %6348 = vmatprep.subr.bf16.mxu0 %v6779_v56 }
 0xcce   : > { %6349 = vmatpush3.bf16.msra.mxu0 %v6779_v56 }
 0xd7e   : > { %v6292_v57 = vpop.f32.mrb[112].mxu0 }
 0xd7f   : > { %v3202_v58 = vadd.f32 %v6292_v57, %v5318_v17  ;;  %v3193_v59 = vpop.f32.mrb[113].mxu0 }
 0xd80   : > { %v3194_v34 = vadd.f32 %v5318_v17, %v3193_v59  ;;  %v6293_v36 = vpop.f32.mrb[114].mxu0 }
 0xd81   : > { %v3205_v33 = vadd.f32 %v6293_v36, %v5318_v17  ;;  %v3196_v35 = vpop.f32.mrb[115].mxu0  ;;  %v3258_v52 = vmax.f32 %v3202_v58, 0.0 }
 0xd82   : > { %v3197_v4 = vadd.f32 %v5318_v17, %v3196_v35  ;;  %v3256_v5 = vmax.f32 %v3194_v34, 0.0 }
 0xd83   : > { %v3259_v51 = vmax.f32 %v3205_v33, 0.0 }
 0xd84   : > { %v3257_v6 = vmax.f32 %v3197_v4, 0.0 }
 0xd85   : > { %v3273_v7 = vpack.c.bf16 %v3259_v51, %v3258_v52  ;;  %v6780_v51 = vld [vmem:[%s7763_s5 + $0xb0] sm:$0xff]  }
 0xd86   : > { %v3272_v10 = vpack.c.bf16 %v3257_v6, %v3256_v5  ;;  %v6296_v11 = vpop.f32.mrb[116].mxu0  ;;  %6350 = vmatprep.subr.bf16.mxu0 %v6780_v51  ;;  %v6781_v5 = vld [vmem:[%s7763_s5 + $0xb8] sm:$0xff]   ;;  %v6783_v6 = vld [vmem:[%s7764_s6 + $0x48] sm:$0xff]  }
 0xd87   : > { %v3218_v12 = vadd.f32 %v6296_v11, %v5318_v17  ;;  %v3209_v13 = vpop.f32.mrb[117].mxu0  ;;  %6351 = vmatpush3.bf16.msra.mxu0 %v6780_v51 }
 0xd88   : > { %v3210_v14 = vadd.f32 %v5318_v17, %v3209_v13  ;;  %v6297_v19 = vpop.f32.mrb[118].mxu0  ;;  %6322 = vmatprep.mubr.bf16.mxu1 %v3272_v10  ;;  %6352 = vmatprep.subr.bf16.mxu0 %v6781_v5  ;;  %v5328_v10 = vld [vmem:[%s7762_s4 + $0x8] ss:$0 sm:$0xff] }
 0xd89   : > { %v3221_v20 = vadd.f32 %v6297_v19, %v5318_v17  ;;  %v3212_v44 = vpop.f32.mrb[119].mxu0  ;;  %6323 = vmatmul.mubr.bf16.vlgmr.msra.gmra.mrb[112].mxu1 %v3273_v7  ;;  %v3262_v8 = vmax.f32 %v3218_v12, 0.0  ;;  %v6784_v7 = vld [vmem:[%s7764_s6 + $0x50] sm:$0xff]  }
 0xd8a   : > { %v3213_v46 = vadd.f32 %v5318_v17, %v3212_v44  ;;  %v3260_v43 = vmax.f32 %v3210_v14, 0.0 }
 0xd8b   : > { %v3263_v25 = vmax.f32 %v3221_v20, 0.0  ;;  %6353 = vmatpush3.bf16.msra.mxu0 %v6781_v5 }
 0xd8c   : > { %v3261_v26 = vmax.f32 %v3213_v46, 0.0 }
 0xd8d   : > { %v3275_v9 = vpack.c.bf16 %v3263_v25, %v3262_v8 }
 0xd8e   : > { %v3274_v45 = vpack.c.bf16 %v3261_v26, %v3260_v43  ;;  %v6300_v27 = vpop.f32.mrb[120].mxu0 }
 0xd8f   : > { %v3234_v28 = vadd.f32 %v6300_v27, %v5318_v17  ;;  %v3225_v40 = vpop.f32.mrb[121].mxu0 }
 0xd90   : > { %v3226_v62 = vadd.f32 %v5318_v17, %v3225_v40  ;;  %v6301_v41 = vpop.f32.mrb[122].mxu0  ;;  %6326 = vmatprep.mubr.bf16.mxu1 %v3274_v45 }
 0xd91   : > { %v3237_v61 = vadd.f32 %v6301_v41, %v5318_v17  ;;  %v3228_v0 = vpop.f32.mrb[123].mxu0  ;;  %6327 = vmatmul.mubr.bf16.gmra.mrb[116].mxu1 %v3275_v9  ;;  %v3266_v63 = vmax.f32 %v3234_v28, 0.0 }
 0xd92   : > { %v3229_v42 = vadd.f32 %v5318_v17, %v3228_v0  ;;  %v3264_v37 = vmax.f32 %v3226_v62, 0.0 }
 0xd93   : > { %v3267_v47 = vmax.f32 %v3237_v61, 0.0 }
 0xd94   : > { %v3265_v48 = vmax.f32 %v3229_v42, 0.0 }
 0xd95   : > { %v3277_v54 = vpack.c.bf16 %v3267_v47, %v3266_v63 }
 0xd96   : > { %v3276_v16 = vpack.c.bf16 %v3265_v48, %v3264_v37  ;;  %v6304_v30 = vpop.f32.mrb[124].mxu0 }
 0xd97   : > { %v3250_v55 = vadd.f32 %v6304_v30, %v5318_v17  ;;  %v3241_v15 = vpop.f32.mrb[125].mxu0 }
 0xd98   : > { %v3242_v18 = vadd.f32 %v5318_v17, %v3241_v15  ;;  %v6305_v56 = vpop.f32.mrb[126].mxu0  ;;  %6330 = vmatprep.mubr.bf16.mxu1 %v3276_v16 }
 0xd99   : > { %v3253_v57 = vadd.f32 %v6305_v56, %v5318_v17  ;;  %v3244_v58 = vpop.f32.mrb[127].mxu0  ;;  %6331 = vmatmul.mubr.bf16.gmra.mrb[120].mxu1 %v3277_v54  ;;  %v3270_v34 = vmax.f32 %v3250_v55, 0.0 }
 0xd9a   : > { %v3245_v59 = vadd.f32 %v5318_v17, %v3244_v58  ;;  %v3268_v33 = vmax.f32 %v3242_v18, 0.0  ;;  %v6782_v17 = vld [vmem:[%s7764_s6 + $0x40] sm:$0xff]  }
 0xd9b   : > { %v3271_v36 = vmax.f32 %v3253_v57, 0.0  ;;  %6370 = vmatprep.subr.bf16.mxu1 %v6782_v17 }
 0xd9c   : > { %v3269_v35 = vmax.f32 %v3245_v59, 0.0  ;;  %6371 = vmatpush3.bf16.msra.mxu1 %v6782_v17 }
 0xd9d   : > { %v3279_v4 = vpack.c.bf16 %v3271_v36, %v3270_v34  ;;  %6372 = vmatprep.subr.bf16.mxu1 %v6783_v6 }
 0xd9e   : > { %v3278_v52 = vpack.c.bf16 %v3269_v35, %v3268_v33 }
 0xda0   : > { %6334 = vmatprep.mubr.bf16.mxu1 %v3278_v52  ;;  %6373 = vmatpush3.bf16.msra.mxu1 %v6783_v6 }
 0xda1   : > { %6335 = vmatmul.mubr.bf16.gmra.mrb[124].mxu1 %v3279_v4  ;;  %6374 = vmatprep.subr.bf16.mxu1 %v6784_v7 }
 0xda4   : > { %6375 = vmatpush3.bf16.msra.mxu1 %v6784_v7 }
 0xe5c   : > { %v6324_v11 = vpop.f32.mrb[112].mxu1 }
 0xe5d   : > { %v3396_v12 = vadd.f32 %v6324_v11, %v5328_v10  ;;  %v3387_v13 = vpop.f32.mrb[113].mxu1 }
 0xe5e   : > { %v3388_v14 = vadd.f32 %v5328_v10, %v3387_v13  ;;  %v6325_v19 = vpop.f32.mrb[114].mxu1 }
 0xe5f   : > { %v3399_v20 = vadd.f32 %v6325_v19, %v5328_v10  ;;  %v3390_v44 = vpop.f32.mrb[115].mxu1  ;;  %v3452_v8 = vmax.f32 %v3396_v12, 0.0 }
 0xe60   : > { %v3391_v46 = vadd.f32 %v5328_v10, %v3390_v44  ;;  %v3450_v43 = vmax.f32 %v3388_v14, 0.0 }
 0xe61   : > { %v3453_v25 = vmax.f32 %v3399_v20, 0.0 }
 0xe62   : > { %v3451_v26 = vmax.f32 %v3391_v46, 0.0 }
 0xe63   : > { %v3467_v9 = vpack.c.bf16 %v3453_v25, %v3452_v8  ;;  %v6785_v25 = vld [vmem:[%s7764_s6 + $0x58] sm:$0xff]  }
 0xe64   : > { %v3466_v45 = vpack.c.bf16 %v3451_v26, %v3450_v43  ;;  %v6328_v27 = vpop.f32.mrb[116].mxu1  ;;  %6376 = vmatprep.subr.bf16.mxu1 %v6785_v25  ;;  %v6786_v43 = vld [vmem:[#allocation2 + $0xc0] sm:$0xff]   ;;  %v6787_v26 = vld [vmem:[#allocation2 + $0xc8] sm:$0xff]  }
 0xe65   : > { %v3412_v28 = vadd.f32 %v6328_v27, %v5328_v10  ;;  %v3403_v40 = vpop.f32.mrb[117].mxu1  ;;  %6377 = vmatpush3.bf16.msra.mxu1 %v6785_v25  ;;  %6394 = vmatprep.subr.bf16.mxu0 %v6786_v43  ;;  %v6791_v27 = vld [vmem:[#allocation2 + $0xe8] sm:$0xff]   ;;  %v6793_v25 = vld [vmem:[#allocation2 + $0xf8] sm:$0xff]  }
 0xe66   : > { %v3404_v62 = vadd.f32 %v5328_v10, %v3403_v40  ;;  %v6329_v41 = vpop.f32.mrb[118].mxu1  ;;  %6354 = vmatprep.mubr.bf16.mxu0 %v3466_v45  ;;  %v6790_v45 = vld [vmem:[#allocation2 + $0xe0] sm:$0xff]  }
 0xe67   : > { %v3415_v61 = vadd.f32 %v6329_v41, %v5328_v10  ;;  %v3406_v0 = vpop.f32.mrb[119].mxu1  ;;  %6355 = vmatmul.mubr.bf16.vlgmr.msra.gmra.mrb[128].mxu0 %v3467_v9  ;;  %v3456_v63 = vmax.f32 %v3412_v28, 0.0  ;;  %v6789_v9 = vld [vmem:[#allocation2 + $0xd8] sm:$0xff]  }
 0xe68   : > { %v3407_v42 = vadd.f32 %v5328_v10, %v3406_v0  ;;  %v3454_v37 = vmax.f32 %v3404_v62, 0.0  ;;  %6395 = vmatpush3.bf16.msra.mxu0 %v6786_v43  ;;  %v6794_v43 = vld [vmem:[#allocation7 + $0x240] sm:$0xff]  }
 0xe69   : > { %v3457_v47 = vmax.f32 %v3415_v61, 0.0  ;;  %6396 = vmatprep.subr.bf16.mxu0 %v6787_v26  ;;  %6426 = vmatprep.subr.bf16.mxu1 %v6794_v43 }
 0xe6a   : > { %v3455_v48 = vmax.f32 %v3407_v42, 0.0 }
 0xe6b   : > { %v3469_v54 = vpack.c.bf16 %v3457_v47, %v3456_v63 }
 0xe6c   : > { %v3468_v16 = vpack.c.bf16 %v3455_v48, %v3454_v37  ;;  %v6332_v30 = vpop.f32.mrb[120].mxu1  ;;  %6397 = vmatpush3.bf16.msra.mxu0 %v6787_v26  ;;  %v6795_v26 = vld [vmem:[#allocation7 + $0x248] sm:$0xff]  }
 0xe6d   : > { %v3428_v55 = vadd.f32 %v6332_v30, %v5328_v10  ;;  %v3419_v15 = vpop.f32.mrb[121].mxu1 }
 0xe6e   : > { %v3420_v18 = vadd.f32 %v5328_v10, %v3419_v15  ;;  %v6333_v56 = vpop.f32.mrb[122].mxu1  ;;  %6358 = vmatprep.mubr.bf16.mxu0 %v3468_v16 }
 0xe6f   : > { %v3431_v57 = vadd.f32 %v6333_v56, %v5328_v10  ;;  %v3422_v58 = vpop.f32.mrb[123].mxu1  ;;  %6359 = vmatmul.mubr.bf16.gmra.mrb[132].mxu0 %v3469_v54  ;;  %v3460_v34 = vmax.f32 %v3428_v55, 0.0 }
 0xe70   : > { %v3423_v59 = vadd.f32 %v5328_v10, %v3422_v58  ;;  %v3458_v33 = vmax.f32 %v3420_v18, 0.0 }
 0xe71   : > { %v3461_v36 = vmax.f32 %v3431_v57, 0.0 }
 0xe72   : > { %v3459_v35 = vmax.f32 %v3423_v59, 0.0 }
 0xe73   : > { %v3471_v4 = vpack.c.bf16 %v3461_v36, %v3460_v34 }
 0xe74   : > { %v3470_v52 = vpack.c.bf16 %v3459_v35, %v3458_v33  ;;  %v6336_v51 = vpop.f32.mrb[124].mxu1 }
 0xe75   : > { %v3444_v5 = vadd.f32 %v6336_v51, %v5328_v10  ;;  %v3435_v17 = vpop.f32.mrb[125].mxu1 }
 0xe76   : > { %v3436_v6 = vadd.f32 %v5328_v10, %v3435_v17  ;;  %v6337_v7 = vpop.f32.mrb[126].mxu1  ;;  %6362 = vmatprep.mubr.bf16.mxu0 %v3470_v52 }
 0xe77   : > { %v3447_v11 = vadd.f32 %v6337_v7, %v5328_v10  ;;  %v3438_v12 = vpop.f32.mrb[127].mxu1  ;;  %6363 = vmatmul.mubr.bf16.gmra.mrb[136].mxu0 %v3471_v4  ;;  %v3464_v14 = vmax.f32 %v3444_v5, 0.0 }
 0xe78   : > { %v3439_v13 = vadd.f32 %v5328_v10, %v3438_v12  ;;  %v3462_v20 = vmax.f32 %v3436_v6, 0.0  ;;  %v6788_v10 = vld [vmem:[#allocation2 + $0xd0] sm:$0xff]  }
 0xe79   : > { %v3465_v19 = vmax.f32 %v3447_v11, 0.0  ;;  %6398 = vmatprep.subr.bf16.mxu0 %v6788_v10 }
 0xe7a   : > { %v3463_v44 = vmax.f32 %v3439_v13, 0.0  ;;  %6399 = vmatpush3.bf16.msra.mxu0 %v6788_v10  ;;  %v6796_v10 = vld [vmem:[#allocation7 + $0x250] sm:$0xff]  }
 0xe7b   : > { %v3473_v46 = vpack.c.bf16 %v3465_v19, %v3464_v14  ;;  %6400 = vmatprep.subr.bf16.mxu0 %v6789_v9 }
 0xe7c   : > { %v3472_v8 = vpack.c.bf16 %v3463_v44, %v3462_v20 }
 0xe7e   : > { %6366 = vmatprep.mubr.bf16.mxu0 %v3472_v8  ;;  %6401 = vmatpush3.bf16.msra.mxu0 %v6789_v9  ;;  %v6792_v8 = vld [vmem:[#allocation2 + $0xf0] sm:$0xff]   ;;  %v6797_v9 = vld [vmem:[#allocation7 + $0x258] sm:$0xff]  }
 0xe7f   : > { %6367 = vmatmul.mubr.bf16.gmra.mrb[140].mxu0 %v3473_v46  ;;  %6402 = vmatprep.subr.bf16.mxu0 %v6790_v45 }
 0xe82   : > { %6403 = vmatpush3.bf16.msra.mxu0 %v6790_v45  ;;  %v6798_v45 = vld [vmem:[#allocation7 + $0x260] sm:$0xff]  }
 0xe83   : > { %6404 = vmatprep.subr.bf16.mxu0 %v6791_v27 }
 0xe86   : > { %6405 = vmatpush3.bf16.msra.mxu0 %v6791_v27  ;;  %v6799_v27 = vld [vmem:[#allocation7 + $0x268] sm:$0xff]  }
 0xe87   : > { %6406 = vmatprep.subr.bf16.mxu0 %v6792_v8 }
 0xe8a   : > { %6407 = vmatpush3.bf16.msra.mxu0 %v6792_v8 }
 0xe8b   : > { %6408 = vmatprep.subr.bf16.mxu0 %v6793_v25 }
 0xe8e   : > { %6409 = vmatpush3.bf16.msra.mxu0 %v6793_v25 }
 0xf3a   : > { %v6356_v28 = vpop.f32.mrb[128].mxu0 }
 0xf3b   : > { %v3573_v40 = vpop.f32.mrb[129].mxu0  ;;  %v3638_v41 = vmax.f32 %v6356_v28, 0.0 }
 0xf3c   : > { %v6357_v62 = vpop.f32.mrb[130].mxu0  ;;  %v3636_v42 = vmax.f32 %v3573_v40, 0.0 }
 0xf3d   : > { %v3639_v61 = vmax.f32 %v6357_v62, 0.0  ;;  %v3576_v0 = vpop.f32.mrb[131].mxu0 }
 0xf3e   : > { %v3637_v63 = vmax.f32 %v3576_v0, 0.0  ;;  %v5382_v0 = vld [vmem:[%s7765_s7 + $0x2] ss:$0 sm:$0xff] }
 0xf3f   : > { %v3653_v47 = vpack.c.bf16 %v3639_v61, %v3638_v41 }
 0xf40   : > { %v3652_v37 = vpack.c.bf16 %v3637_v63, %v3636_v42 }
 0xf42   : > { %v6360_v48 = vpop.f32.mrb[132].mxu0  ;;  %6378 = vmatprep.mubr.msk.bf16.mxu1 %vm1365_vm0, %v3652_v37 }
 0xf43   : > { %v3589_v54 = vpop.f32.mrb[133].mxu0  ;;  %6379 = vmatmul.mubr.msk.bf16.vlgmr.msra.gmra.mrb[128].mxu1 %vm1365_vm0, %v3653_v47  ;;  %v3642_v30 = vmax.f32 %v6360_v48, 0.0 }
 0xf44   : > { %v6361_v16 = vpop.f32.mrb[134].mxu0  ;;  %v3640_v18 = vmax.f32 %v3589_v54, 0.0  ;;  %6427 = vmatpush3.bf16.msra.mxu1 %v6794_v43 }
 0xf45   : > { %v3643_v55 = vmax.f32 %v6361_v16, 0.0  ;;  %v3592_v15 = vpop.f32.mrb[135].mxu0  ;;  %6428 = vmatprep.subr.bf16.mxu1 %v6795_v26 }
 0xf46   : > { %v3641_v56 = vmax.f32 %v3592_v15, 0.0 }
 0xf47   : > { %v3655_v57 = vpack.c.bf16 %v3643_v55, %v3642_v30 }
 0xf48   : > { %v3654_v58 = vpack.c.bf16 %v3641_v56, %v3640_v18  ;;  %6429 = vmatpush3.bf16.msra.mxu1 %v6795_v26  ;;  %v6802_v26 = vld [vmem:[#allocation7 + $0x280] sm:$0xff]  }
 0xf49   : > { %6430 = vmatprep.subr.bf16.mxu1 %v6796_v10  ;;  %6458 = vmatprep.subr.bf16.mxu0 %v6802_v26 }
 0xf4a   : > { %v6364_v59 = vpop.f32.mrb[136].mxu0  ;;  %6382 = vmatprep.mubr.msk.bf16.mxu1 %vm1365_vm0, %v3654_v58 }
 0xf4b   : > { %v3605_v34 = vpop.f32.mrb[137].mxu0  ;;  %6383 = vmatmul.mubr.msk.bf16.gmra.mrb[132].mxu1 %vm1365_vm0, %v3655_v57  ;;  %v3646_v33 = vmax.f32 %v6364_v59, 0.0 }
 0xf4c   : > { %v6365_v36 = vpop.f32.mrb[138].mxu0  ;;  %v3644_v52 = vmax.f32 %v3605_v34, 0.0  ;;  %6431 = vmatpush3.bf16.msra.mxu1 %v6796_v10  ;;  %v6803_v10 = vld [vmem:[#allocation7 + $0x288] sm:$0xff]  }
 0xf4d   : > { %v3647_v35 = vmax.f32 %v6365_v36, 0.0  ;;  %v3608_v4 = vpop.f32.mrb[139].mxu0  ;;  %6432 = vmatprep.subr.bf16.mxu1 %v6797_v9 }
 0xf4e   : > { %v3645_v51 = vmax.f32 %v3608_v4, 0.0 }
 0xf4f   : > { %v3657_v5 = vpack.c.bf16 %v3647_v35, %v3646_v33 }
 0xf50   : > { %v3656_v17 = vpack.c.bf16 %v3645_v51, %v3644_v52  ;;  %6433 = vmatpush3.bf16.msra.mxu1 %v6797_v9  ;;  %v6804_v9 = vld [vmem:[#allocation7 + $0x290] sm:$0xff]  }
 0xf51   : > { %6434 = vmatprep.subr.bf16.mxu1 %v6798_v45 }
 0xf52   : > { %v6368_v6 = vpop.f32.mrb[140].mxu0  ;;  %6386 = vmatprep.mubr.msk.bf16.mxu1 %vm1365_vm0, %v3656_v17 }
 0xf53   : > { %v3621_v7 = vpop.f32.mrb[141].mxu0  ;;  %6387 = vmatmul.mubr.msk.bf16.gmra.mrb[136].mxu1 %vm1365_vm0, %v3657_v5  ;;  %v3650_v12 = vmax.f32 %v6368_v6, 0.0 }
 0xf54   : > { %v6369_v11 = vpop.f32.mrb[142].mxu0  ;;  %v3648_v19 = vmax.f32 %v3621_v7, 0.0  ;;  %6435 = vmatpush3.bf16.msra.mxu1 %v6798_v45  ;;  %v6805_v45 = vld [vmem:[#allocation7 + $0x298] sm:$0xff]  }
 0xf55   : > { %v3651_v13 = vmax.f32 %v6369_v11, 0.0  ;;  %v3624_v14 = vpop.f32.mrb[143].mxu0  ;;  %6436 = vmatprep.subr.bf16.mxu1 %v6799_v27 }
 0xf56   : > { %v3649_v20 = vmax.f32 %v3624_v14, 0.0 }
 0xf57   : > { %v3659_v44 = vpack.c.bf16 %v3651_v13, %v3650_v12 }
 0xf58   : > { %v3658_v46 = vpack.c.bf16 %v3649_v20, %v3648_v19  ;;  %6437 = vmatpush3.bf16.msra.mxu1 %v6799_v27  ;;  %v6806_v27 = vld [vmem:[#allocation7 + $0x2a0] sm:$0xff]  }
 0xf5a   : > { %6390 = vmatprep.mubr.msk.bf16.mxu1 %vm1365_vm0, %v3658_v46 }
 0xf5b   : > { %6391 = vmatmul.mubr.msk.bf16.gmra.mrb[140].mxu1 %vm1365_vm0, %v3659_v44 }
0x1016   : > { %v6380_v28 = vpop.f32.mrb[128].mxu1 }
0x1017   : > { %v3751_v40 = vpop.f32.mrb[129].mxu1  ;;  %v3816_v61 = vadd.f32 %v6380_v28, %v7421_v24  ;;  %v6807_v28 = vld [vmem:[#allocation7 + $0x2a8] sm:$0xff]  }
0x1018   : > { %v3814_v62 = vadd.f32 %v3751_v40, %v7417_v22  ;;  %v6381_v41 = vpop.f32.mrb[130].mxu1  ;;  %v5383_v40 = vld [vmem:[#allocation5 + $0x3] ss:$0 sm:$0xff] }
0x1019   : > { %v3817_v42 = vadd.f32 %v6381_v41, %v7415_v21  ;;  %v3754_v63 = vpop.f32.mrb[131].mxu1  ;;  %v7541_v16 = vadd.f32 %v5382_v0, %v3816_v61 }
0x101a   : > { %v3815_v47 = vadd.f32 %v3754_v63, %v7419_v23  ;;  %v7537_v48 = vadd.f32 %v5382_v0, %v3814_v62 }
0x101b   : > { %v7535_v37 = vadd.f32 %v5382_v0, %v3817_v42 }
0x101c   : > { %v7539_v54 = vadd.f32 %v5382_v0, %v3815_v47 }
0x101d   : > { %v3855_v30 = vpack.c.bf16 %v7535_v37, %v7541_v16 }
0x101e   : > { %v6384_v22 = vpop.f32.mrb[132].mxu1  ;;  %v3854_v24 = vpack.c.bf16 %v7539_v54, %v7537_v48 }
0x101f   : > { %v3767_v55 = vpop.f32.mrb[133].mxu1  ;;  %v3820_v23 = vadd.f32 %v6384_v22, %v7437_v39 }
0x1020   : > { %v3818_v21 = vadd.f32 %v3767_v55, %v7433_v32  ;;  %v6385_v15 = vpop.f32.mrb[134].mxu1  ;;  %6410 = vmatprep.mubr.bf16.mxu0 %v3854_v24 }
0x1021   : > { %v3821_v18 = vadd.f32 %v6385_v15, %v7431_v31  ;;  %v3770_v56 = vpop.f32.mrb[135].mxu1  ;;  %6411 = vmatmul.mubr.bf16.vlgmr.msra.gmra.mrb[144].mxu0 %v3855_v30  ;;  %v7557_v36 = vadd.f32 %v5382_v0, %v3820_v23 }
0x1022   : > { %v3819_v57 = vadd.f32 %v3770_v56, %v7435_v38  ;;  %v7553_v59 = vadd.f32 %v5382_v0, %v3818_v21  ;;  %6459 = vmatpush3.bf16.msra.mxu0 %v6802_v26 }
0x1023   : > { %v7551_v58 = vadd.f32 %v5382_v0, %v3821_v18  ;;  %6460 = vmatprep.subr.bf16.mxu0 %v6803_v10 }
0x1024   : > { %v7555_v34 = vadd.f32 %v5382_v0, %v3819_v57 }
0x1025   : > { %v3857_v31 = vpack.c.bf16 %v7551_v58, %v7557_v36 }
0x1026   : > { %v6388_v33 = vpop.f32.mrb[136].mxu1  ;;  %v3856_v32 = vpack.c.bf16 %v7555_v34, %v7553_v59  ;;  %6461 = vmatpush3.bf16.msra.mxu0 %v6803_v10 }
0x1027   : > { %v3783_v35 = vpop.f32.mrb[137].mxu1  ;;  %v3824_v38 = vadd.f32 %v6388_v33, %v7453_v53  ;;  %6462 = vmatprep.subr.bf16.mxu0 %v6804_v9 }
0x1028   : > { %v3822_v39 = vadd.f32 %v3783_v35, %v7449_v49  ;;  %v6389_v4 = vpop.f32.mrb[138].mxu1  ;;  %6414 = vmatprep.mubr.bf16.mxu0 %v3856_v32 }
0x1029   : > { %v3825_v52 = vadd.f32 %v6389_v4, %v7447_v29  ;;  %v3786_v51 = vpop.f32.mrb[139].mxu1  ;;  %6415 = vmatmul.mubr.bf16.gmra.mrb[148].mxu0 %v3857_v31  ;;  %v7573_v11 = vadd.f32 %v5382_v0, %v3824_v38 }
0x102a   : > { %v3823_v5 = vadd.f32 %v3786_v51, %v7451_v50  ;;  %v7569_v6 = vadd.f32 %v5382_v0, %v3822_v39  ;;  %6463 = vmatpush3.bf16.msra.mxu0 %v6804_v9 }
0x102b   : > { %v7567_v17 = vadd.f32 %v5382_v0, %v3825_v52  ;;  %6464 = vmatprep.subr.bf16.mxu0 %v6805_v45 }
0x102c   : > { %v7571_v7 = vadd.f32 %v5382_v0, %v3823_v5 }
0x102d   : > { %v3859_v29 = vpack.c.bf16 %v7567_v17, %v7573_v11 }
0x102e   : > { %v6392_v12 = vpop.f32.mrb[140].mxu1  ;;  %v3858_v49 = vpack.c.bf16 %v7571_v7, %v7569_v6  ;;  %6465 = vmatpush3.bf16.msra.mxu0 %v6805_v45 }
0x102f   : > { %v3799_v13 = vpop.f32.mrb[141].mxu1  ;;  %v3828_v50 = vadd.f32 %v6392_v12, %v7469_v3  ;;  %6466 = vmatprep.subr.bf16.mxu0 %v6806_v27 }
0x1030   : > { %v3826_v53 = vadd.f32 %v3799_v13, %v7465_v1  ;;  %v6393_v14 = vpop.f32.mrb[142].mxu1  ;;  %6418 = vmatprep.mubr.bf16.mxu0 %v3858_v49 }
0x1031   : > { %v3829_v19 = vadd.f32 %v6393_v14, %v7463_v60  ;;  %v3802_v20 = vpop.f32.mrb[143].mxu1  ;;  %6419 = vmatmul.mubr.bf16.gmra.mrb[152].mxu0 %v3859_v29  ;;  %v7589_v43 = vadd.f32 %v5382_v0, %v3828_v50  ;;  %v6800_v60 = vld [vmem:[#allocation7 + $0x270] sm:$0xff]  }
0x1032   : > { %v3827_v44 = vadd.f32 %v3802_v20, %v7467_v2  ;;  %v7585_v8 = vadd.f32 %v5382_v0, %v3826_v53  ;;  %6438 = vmatprep.subr.bf16.mxu1 %v6800_v60  ;;  %v6801_v2 = vld [vmem:[#allocation7 + $0x278] sm:$0xff]   ;;  %6467 = vmatpush3.bf16.msra.mxu0 %v6806_v27 }
0x1033   : > { %v7583_v46 = vadd.f32 %v5382_v0, %v3829_v19  ;;  %6439 = vmatpush3.bf16.msra.mxu1 %v6800_v60  ;;  %6468 = vmatprep.subr.bf16.mxu0 %v6807_v28 }
0x1034   : > { %v7587_v25 = vadd.f32 %v5382_v0, %v3827_v44  ;;  %6440 = vmatprep.subr.bf16.mxu1 %v6801_v2 }
0x1035   : > { %v3861_v3 = vpack.c.bf16 %v7583_v46, %v7589_v43 }
0x1036   : > { %v3860_v1 = vpack.c.bf16 %v7587_v25, %v7585_v8  ;;  %6469 = vmatpush3.bf16.msra.mxu0 %v6807_v28 }
0x1037   : > { %6441 = vmatpush3.bf16.msra.mxu1 %v6801_v2 }
0x1038   : > { %6422 = vmatprep.mubr.bf16.mxu0 %v3860_v1 }
0x1039   : > { %6423 = vmatmul.mubr.bf16.gmra.mrb[156].mxu0 %v3861_v3 }
0x10f4   : > { %v6412_v62 = vpop.f32.mrb[144].mxu0 }
0x10f5   : > { %v3978_v41 = vadd.f32 %v6412_v62, %v5383_v40  ;;  %v3969_v61 = vpop.f32.mrb[145].mxu0 }
0x10f6   : > { %v3970_v0 = vadd.f32 %v5383_v40, %v3969_v61  ;;  %v6413_v42 = vpop.f32.mrb[146].mxu0 }
0x10f7   : > { %v3981_v63 = vadd.f32 %v6413_v42, %v5383_v40  ;;  %v3972_v47 = vpop.f32.mrb[147].mxu0  ;;  %v4034_v24 = vmax.f32 %v3978_v41, 0.0 }
0x10f8   : > { %v3973_v22 = vadd.f32 %v5383_v40, %v3972_v47  ;;  %v4032_v55 = vmax.f32 %v3970_v0, 0.0 }
0x10f9   : > { %v4035_v30 = vmax.f32 %v3981_v63, 0.0 }
0x10fa   : > { %v4033_v21 = vmax.f32 %v3973_v22, 0.0 }
0x10fb   : > { %v4049_v15 = vpack.c.bf16 %v4035_v30, %v4034_v24  ;;  %v6808_v30 = vld [vmem:[#allocation7 + $0x2b0] sm:$0xff]  }
0x10fc   : > { %v4048_v23 = vpack.c.bf16 %v4033_v21, %v4032_v55  ;;  %v6416_v18 = vpop.f32.mrb[148].mxu0  ;;  %6470 = vmatprep.subr.bf16.mxu0 %v6808_v30  ;;  %v6809_v55 = vld [vmem:[#allocation7 + $0x2b8] sm:$0xff]   ;;  %v6810_v21 = vld [vmem:[#allocation7 + $0x2c0] sm:$0xff]  }
0x10fd   : > { %v3994_v56 = vadd.f32 %v6416_v18, %v5383_v40  ;;  %v3985_v57 = vpop.f32.mrb[149].mxu0  ;;  %6471 = vmatpush3.bf16.msra.mxu0 %v6808_v30  ;;  %6490 = vmatprep.subr.bf16.mxu1 %v6810_v21  ;;  %v6814_v18 = vld [vmem:[#allocation7 + $0x2e0] sm:$0xff]  }
0x10fe   : > { %v3986_v33 = vadd.f32 %v5383_v40, %v3985_v57  ;;  %v6417_v32 = vpop.f32.mrb[150].mxu0  ;;  %6442 = vmatprep.mubr.bf16.mxu1 %v4048_v23  ;;  %6472 = vmatprep.subr.bf16.mxu0 %v6809_v55  ;;  %v6813_v23 = vld [vmem:[#allocation7 + $0x2d8] sm:$0xff]   ;;  %v5393_v57 = vld [vmem:[%s7762_s4 + $0x9] ss:$0 sm:$0xff] }
0x10ff   : > { %v3997_v35 = vadd.f32 %v6417_v32, %v5383_v40  ;;  %v3988_v31 = vpop.f32.mrb[151].mxu0  ;;  %6443 = vmatmul.mubr.bf16.vlgmr.msra.gmra.mrb[144].mxu1 %v4049_v15  ;;  %v4038_v4 = vmax.f32 %v3994_v56, 0.0  ;;  %v6811_v15 = vld [vmem:[#allocation7 + $0x2c8] sm:$0xff]  }
0x1100   : > { %v3989_v39 = vadd.f32 %v5383_v40, %v3988_v31  ;;  %v4036_v52 = vmax.f32 %v3986_v33, 0.0  ;;  %6491 = vmatpush3.bf16.msra.mxu1 %v6810_v21  ;;  %v6815_v56 = vld [vmem:[#allocation7 + $0x2e8] sm:$0xff]  }
0x1101   : > { %v4039_v38 = vmax.f32 %v3997_v35, 0.0  ;;  %6473 = vmatpush3.bf16.msra.mxu0 %v6809_v55  ;;  %6492 = vmatprep.subr.bf16.mxu1 %v6811_v15 }
0x1102   : > { %v4037_v51 = vmax.f32 %v3989_v39, 0.0 }
0x1103   : > { %v4051_v5 = vpack.c.bf16 %v4039_v38, %v4038_v4 }
0x1104   : > { %v4050_v12 = vpack.c.bf16 %v4037_v51, %v4036_v52  ;;  %v6420_v49 = vpop.f32.mrb[152].mxu0  ;;  %6493 = vmatpush3.bf16.msra.mxu1 %v6811_v15 }
0x1105   : > { %v4010_v13 = vadd.f32 %v6420_v49, %v5383_v40  ;;  %v4001_v29 = vpop.f32.mrb[153].mxu0 }
0x1106   : > { %v4002_v53 = vadd.f32 %v5383_v40, %v4001_v29  ;;  %v6421_v14 = vpop.f32.mrb[154].mxu0  ;;  %6446 = vmatprep.mubr.bf16.mxu1 %v4050_v12 }
0x1107   : > { %v4013_v50 = vadd.f32 %v6421_v14, %v5383_v40  ;;  %v4004_v19 = vpop.f32.mrb[155].mxu0  ;;  %6447 = vmatmul.mubr.bf16.gmra.mrb[148].mxu1 %v4051_v5  ;;  %v4042_v44 = vmax.f32 %v4010_v13, 0.0 }
0x1108   : > { %v4005_v20 = vadd.f32 %v5383_v40, %v4004_v19  ;;  %v4040_v3 = vmax.f32 %v4002_v53, 0.0 }
0x1109   : > { %v4043_v1 = vmax.f32 %v4013_v50, 0.0 }
0x110a   : > { %v4041_v60 = vmax.f32 %v4005_v20, 0.0 }
0x110b   : > { %v4053_v2 = vpack.c.bf16 %v4043_v1, %v4042_v44 }
0x110c   : > { %v4052_v26 = vpack.c.bf16 %v4041_v60, %v4040_v3  ;;  %v6424_v10 = vpop.f32.mrb[156].mxu0 }
0x110d   : > { %v4026_v9 = vadd.f32 %v6424_v10, %v5383_v40  ;;  %v4017_v45 = vpop.f32.mrb[157].mxu0 }
0x110e   : > { %v4018_v27 = vadd.f32 %v5383_v40, %v4017_v45  ;;  %v6425_v28 = vpop.f32.mrb[158].mxu0  ;;  %6450 = vmatprep.mubr.bf16.mxu1 %v4052_v26 }
0x110f   : > { %v4029_v62 = vadd.f32 %v6425_v28, %v5383_v40  ;;  %v4020_v41 = vpop.f32.mrb[159].mxu0  ;;  %6451 = vmatmul.mubr.bf16.gmra.mrb[152].mxu1 %v4053_v2  ;;  %v4046_v0 = vmax.f32 %v4026_v9, 0.0 }
0x1110   : > { %v4021_v61 = vadd.f32 %v5383_v40, %v4020_v41  ;;  %v4044_v63 = vmax.f32 %v4018_v27, 0.0  ;;  %v6812_v40 = vld [vmem:[#allocation7 + $0x2d0] sm:$0xff]  }
0x1111   : > { %v4047_v42 = vmax.f32 %v4029_v62, 0.0  ;;  %6494 = vmatprep.subr.bf16.mxu1 %v6812_v40 }
0x1112   : > { %v4045_v47 = vmax.f32 %v4021_v61, 0.0  ;;  %6495 = vmatpush3.bf16.msra.mxu1 %v6812_v40 }
0x1113   : > { %v4055_v22 = vpack.c.bf16 %v4047_v42, %v4046_v0  ;;  %6496 = vmatprep.subr.bf16.mxu1 %v6813_v23 }
0x1114   : > { %v4054_v24 = vpack.c.bf16 %v4045_v47, %v4044_v63 }
0x1116   : > { %6454 = vmatprep.mubr.bf16.mxu1 %v4054_v24  ;;  %6497 = vmatpush3.bf16.msra.mxu1 %v6813_v23 }
0x1117   : > { %6455 = vmatmul.mubr.bf16.gmra.mrb[156].mxu1 %v4055_v22  ;;  %6498 = vmatprep.subr.bf16.mxu1 %v6814_v18 }
0x111a   : > { %6499 = vmatpush3.bf16.msra.mxu1 %v6814_v18 }
0x111b   : > { %6500 = vmatprep.subr.bf16.mxu1 %v6815_v56 }
0x111e   : > { %6501 = vmatpush3.bf16.msra.mxu1 %v6815_v56 }
0x11d2   : > { %v6444_v33 = vpop.f32.mrb[144].mxu1 }
0x11d3   : > { %v4172_v32 = vadd.f32 %v6444_v33, %v5393_v57  ;;  %v4163_v35 = vpop.f32.mrb[145].mxu1 }
0x11d4   : > { %v4164_v31 = vadd.f32 %v5393_v57, %v4163_v35  ;;  %v6445_v39 = vpop.f32.mrb[146].mxu1 }
0x11d5   : > { %v4175_v4 = vadd.f32 %v6445_v39, %v5393_v57  ;;  %v4166_v38 = vpop.f32.mrb[147].mxu1  ;;  %v4228_v51 = vmax.f32 %v4172_v32, 0.0 }
0x11d6   : > { %v4167_v52 = vadd.f32 %v5393_v57, %v4166_v38  ;;  %v4226_v12 = vmax.f32 %v4164_v31, 0.0 }
0x11d7   : > { %v4229_v5 = vmax.f32 %v4175_v4, 0.0 }
0x11d8   : > { %v4227_v49 = vmax.f32 %v4167_v52, 0.0 }
0x11d9   : > { %v4243_v13 = vpack.c.bf16 %v4229_v5, %v4228_v51  ;;  %v6816_v5 = vld [vmem:[#allocation7 + $0x2f0] sm:$0xff]  }
0x11da   : > { %v4242_v29 = vpack.c.bf16 %v4227_v49, %v4226_v12  ;;  %v6448_v53 = vpop.f32.mrb[148].mxu1  ;;  %6502 = vmatprep.subr.bf16.mxu1 %v6816_v5  ;;  %v6817_v12 = vld [vmem:[#allocation7 + $0x2f8] sm:$0xff]  }
0x11db   : > { %v4188_v14 = vadd.f32 %v6448_v53, %v5393_v57  ;;  %v4179_v50 = vpop.f32.mrb[149].mxu1  ;;  %6503 = vmatpush3.bf16.msra.mxu1 %v6816_v5  ;;  %v6818_v49 = vld [vmem:[%s7763_s5 + $0xc0] sm:$0xff]  }
0x11dc   : > { %v4180_v19 = vadd.f32 %v5393_v57, %v4179_v50  ;;  %v6449_v20 = vpop.f32.mrb[150].mxu1  ;;  %6474 = vmatprep.mubr.bf16.mxu0 %v4242_v29  ;;  %6504 = vmatprep.subr.bf16.mxu1 %v6817_v12  ;;  %v6821_v29 = vld [vmem:[%s7763_s5 + $0xd8] sm:$0xff]   ;;  %v6822_v53 = vld [vmem:[%s7763_s5 + $0xe0] sm:$0xff]   ;;  %v5403_v50 = vld [vmem:[%s7762_s4 + $0xa] ss:$0 sm:$0xff] }
0x11dd   : > { %v4191_v44 = vadd.f32 %v6449_v20, %v5393_v57  ;;  %v4182_v1 = vpop.f32.mrb[151].mxu1  ;;  %6475 = vmatmul.mubr.bf16.vlgmr.msra.gmra.mrb[160].mxu0 %v4243_v13  ;;  %v4232_v60 = vmax.f32 %v4188_v14, 0.0  ;;  %6522 = vmatprep.subr.bf16.mxu0 %v6818_v49  ;;  %v6820_v13 = vld [vmem:[%s7763_s5 + $0xd0] sm:$0xff]   ;;  %v6823_v14 = vld [vmem:[%s7763_s5 + $0xe8] sm:$0xff]  }
0x11de   : > { %v4183_v3 = vadd.f32 %v5393_v57, %v4182_v1  ;;  %v4230_v26 = vmax.f32 %v4180_v19, 0.0  ;;  %6523 = vmatpush3.bf16.msra.mxu0 %v6818_v49 }
0x11df   : > { %v4233_v2 = vmax.f32 %v4191_v44, 0.0  ;;  %6505 = vmatpush3.bf16.msra.mxu1 %v6817_v12 }
0x11e0   : > { %v4231_v10 = vmax.f32 %v4183_v3, 0.0 }
0x11e1   : > { %v4245_v9 = vpack.c.bf16 %v4233_v2, %v4232_v60 }
0x11e2   : > { %v4244_v45 = vpack.c.bf16 %v4231_v10, %v4230_v26  ;;  %v6452_v27 = vpop.f32.mrb[152].mxu1 }
0x11e3   : > { %v4204_v28 = vadd.f32 %v6452_v27, %v5393_v57  ;;  %v4195_v62 = vpop.f32.mrb[153].mxu1 }
0x11e4   : > { %v4196_v41 = vadd.f32 %v5393_v57, %v4195_v62  ;;  %v6453_v61 = vpop.f32.mrb[154].mxu1  ;;  %6478 = vmatprep.mubr.bf16.mxu0 %v4244_v45 }
0x11e5   : > { %v4207_v0 = vadd.f32 %v6453_v61, %v5393_v57  ;;  %v4198_v42 = vpop.f32.mrb[155].mxu1  ;;  %6479 = vmatmul.mubr.bf16.gmra.mrb[164].mxu0 %v4245_v9  ;;  %v4236_v47 = vmax.f32 %v4204_v28, 0.0 }
0x11e6   : > { %v4199_v63 = vadd.f32 %v5393_v57, %v4198_v42  ;;  %v4234_v24 = vmax.f32 %v4196_v41, 0.0 }
0x11e7   : > { %v4237_v22 = vmax.f32 %v4207_v0, 0.0 }
0x11e8   : > { %v4235_v30 = vmax.f32 %v4199_v63, 0.0 }
0x11e9   : > { %v4247_v55 = vpack.c.bf16 %v4237_v22, %v4236_v47 }
0x11ea   : > { %v4246_v21 = vpack.c.bf16 %v4235_v30, %v4234_v24  ;;  %v6456_v15 = vpop.f32.mrb[156].mxu1 }
0x11eb   : > { %v4220_v40 = vadd.f32 %v6456_v15, %v5393_v57  ;;  %v4211_v23 = vpop.f32.mrb[157].mxu1 }
0x11ec   : > { %v4212_v18 = vadd.f32 %v5393_v57, %v4211_v23  ;;  %v6457_v56 = vpop.f32.mrb[158].mxu1  ;;  %6482 = vmatprep.mubr.bf16.mxu0 %v4246_v21 }
0x11ed   : > { %v4223_v33 = vadd.f32 %v6457_v56, %v5393_v57  ;;  %v4214_v32 = vpop.f32.mrb[159].mxu1  ;;  %6483 = vmatmul.mubr.bf16.gmra.mrb[168].mxu0 %v4247_v55  ;;  %v4240_v31 = vmax.f32 %v4220_v40, 0.0 }
0x11ee   : > { %v4215_v35 = vadd.f32 %v5393_v57, %v4214_v32  ;;  %v4238_v4 = vmax.f32 %v4212_v18, 0.0  ;;  %v6819_v57 = vld [vmem:[%s7763_s5 + $0xc8] sm:$0xff]  }
0x11ef   : > { %v4241_v39 = vmax.f32 %v4223_v33, 0.0  ;;  %6524 = vmatprep.subr.bf16.mxu0 %v6819_v57 }
0x11f0   : > { %v4239_v38 = vmax.f32 %v4215_v35, 0.0  ;;  %6525 = vmatpush3.bf16.msra.mxu0 %v6819_v57 }
0x11f1   : > { %v4249_v52 = vpack.c.bf16 %v4241_v39, %v4240_v31  ;;  %6526 = vmatprep.subr.bf16.mxu0 %v6820_v13 }
0x11f2   : > { %v4248_v51 = vpack.c.bf16 %v4239_v38, %v4238_v4 }
0x11f4   : > { %6486 = vmatprep.mubr.bf16.mxu0 %v4248_v51  ;;  %6527 = vmatpush3.bf16.msra.mxu0 %v6820_v13 }
0x11f5   : > { %6487 = vmatmul.mubr.bf16.gmra.mrb[172].mxu0 %v4249_v52  ;;  %6528 = vmatprep.subr.bf16.mxu0 %v6821_v29 }
0x11f8   : > { %6529 = vmatpush3.bf16.msra.mxu0 %v6821_v29 }
0x11f9   : > { %6530 = vmatprep.subr.bf16.mxu0 %v6822_v53 }
0x11fc   : > { %6531 = vmatpush3.bf16.msra.mxu0 %v6822_v53 }
0x11fd   : > { %6532 = vmatprep.subr.bf16.mxu0 %v6823_v14 }
0x1200   : > { %6533 = vmatpush3.bf16.msra.mxu0 %v6823_v14 }
0x12b0   : > { %v6476_v19 = vpop.f32.mrb[160].mxu0 }
0x12b1   : > { %v4366_v20 = vadd.f32 %v6476_v19, %v5403_v50  ;;  %v4357_v44 = vpop.f32.mrb[161].mxu0 }
0x12b2   : > { %v4358_v1 = vadd.f32 %v5403_v50, %v4357_v44  ;;  %v6477_v3 = vpop.f32.mrb[162].mxu0 }
0x12b3   : > { %v4369_v60 = vadd.f32 %v6477_v3, %v5403_v50  ;;  %v4360_v2 = vpop.f32.mrb[163].mxu0  ;;  %v4422_v10 = vmax.f32 %v4366_v20, 0.0 }
0x12b4   : > { %v4361_v26 = vadd.f32 %v5403_v50, %v4360_v2  ;;  %v4420_v45 = vmax.f32 %v4358_v1, 0.0 }
0x12b5   : > { %v4423_v9 = vmax.f32 %v4369_v60, 0.0 }
0x12b6   : > { %v4421_v27 = vmax.f32 %v4361_v26, 0.0 }
0x12b7   : > { %v4437_v28 = vpack.c.bf16 %v4423_v9, %v4422_v10  ;;  %v6824_v9 = vld [vmem:[%s7763_s5 + $0xf0] sm:$0xff]  }
0x12b8   : > { %v4436_v62 = vpack.c.bf16 %v4421_v27, %v4420_v45  ;;  %v6480_v41 = vpop.f32.mrb[164].mxu0  ;;  %6534 = vmatprep.subr.bf16.mxu0 %v6824_v9  ;;  %v6825_v45 = vld [vmem:[%s7763_s5 + $0xf8] sm:$0xff]   ;;  %v6827_v27 = vld [vmem:[%s7764_s6 + $0x68] sm:$0xff]  }
0x12b9   : > { %v4382_v61 = vadd.f32 %v6480_v41, %v5403_v50  ;;  %v4373_v0 = vpop.f32.mrb[165].mxu0  ;;  %6535 = vmatpush3.bf16.msra.mxu0 %v6824_v9 }
0x12ba   : > { %v4374_v42 = vadd.f32 %v5403_v50, %v4373_v0  ;;  %v6481_v63 = vpop.f32.mrb[166].mxu0  ;;  %6506 = vmatprep.mubr.bf16.mxu1 %v4436_v62  ;;  %6536 = vmatprep.subr.bf16.mxu0 %v6825_v45  ;;  %v5413_v62 = vld [vmem:[%s7762_s4 + $0xb] ss:$0 sm:$0xff] }
0x12bb   : > { %v4385_v47 = vadd.f32 %v6481_v63, %v5403_v50  ;;  %v4376_v22 = vpop.f32.mrb[167].mxu0  ;;  %6507 = vmatmul.mubr.bf16.vlgmr.msra.gmra.mrb[160].mxu1 %v4437_v28  ;;  %v4426_v30 = vmax.f32 %v4382_v61, 0.0  ;;  %v6828_v28 = vld [vmem:[%s7764_s6 + $0x70] sm:$0xff]  }
0x12bc   : > { %v4377_v24 = vadd.f32 %v5403_v50, %v4376_v22  ;;  %v4424_v21 = vmax.f32 %v4374_v42, 0.0 }
0x12bd   : > { %v4427_v55 = vmax.f32 %v4385_v47, 0.0  ;;  %6537 = vmatpush3.bf16.msra.mxu0 %v6825_v45 }
0x12be   : > { %v4425_v15 = vmax.f32 %v4377_v24, 0.0 }
0x12bf   : > { %v4439_v40 = vpack.c.bf16 %v4427_v55, %v4426_v30 }
0x12c0   : > { %v4438_v23 = vpack.c.bf16 %v4425_v15, %v4424_v21  ;;  %v6484_v18 = vpop.f32.mrb[168].mxu0 }
0x12c1   : > { %v4398_v56 = vadd.f32 %v6484_v18, %v5403_v50  ;;  %v4389_v33 = vpop.f32.mrb[169].mxu0 }
0x12c2   : > { %v4390_v32 = vadd.f32 %v5403_v50, %v4389_v33  ;;  %v6485_v35 = vpop.f32.mrb[170].mxu0  ;;  %6510 = vmatprep.mubr.bf16.mxu1 %v4438_v23 }
0x12c3   : > { %v4401_v31 = vadd.f32 %v6485_v35, %v5403_v50  ;;  %v4392_v39 = vpop.f32.mrb[171].mxu0  ;;  %6511 = vmatmul.mubr.bf16.gmra.mrb[164].mxu1 %v4439_v40  ;;  %v4430_v38 = vmax.f32 %v4398_v56, 0.0 }
0x12c4   : > { %v4393_v4 = vadd.f32 %v5403_v50, %v4392_v39  ;;  %v4428_v51 = vmax.f32 %v4390_v32, 0.0 }
0x12c5   : > { %v4431_v52 = vmax.f32 %v4401_v31, 0.0 }
0x12c6   : > { %v4429_v5 = vmax.f32 %v4393_v4, 0.0 }
0x12c7   : > { %v4441_v12 = vpack.c.bf16 %v4431_v52, %v4430_v38 }
0x12c8   : > { %v4440_v49 = vpack.c.bf16 %v4429_v5, %v4428_v51  ;;  %v6488_v57 = vpop.f32.mrb[172].mxu0 }
0x12c9   : > { %v4414_v13 = vadd.f32 %v6488_v57, %v5403_v50  ;;  %v4405_v29 = vpop.f32.mrb[173].mxu0 }
0x12ca   : > { %v4406_v53 = vadd.f32 %v5403_v50, %v4405_v29  ;;  %v6489_v14 = vpop.f32.mrb[174].mxu0  ;;  %6514 = vmatprep.mubr.bf16.mxu1 %v4440_v49 }
0x12cb   : > { %v4417_v19 = vadd.f32 %v6489_v14, %v5403_v50  ;;  %v4408_v20 = vpop.f32.mrb[175].mxu0  ;;  %6515 = vmatmul.mubr.bf16.gmra.mrb[168].mxu1 %v4441_v12  ;;  %v4434_v1 = vmax.f32 %v4414_v13, 0.0 }
0x12cc   : > { %v4409_v44 = vadd.f32 %v5403_v50, %v4408_v20  ;;  %v4432_v60 = vmax.f32 %v4406_v53, 0.0  ;;  %v6826_v50 = vld [vmem:[%s7764_s6 + $0x60] sm:$0xff]  }
0x12cd   : > { %v4435_v3 = vmax.f32 %v4417_v19, 0.0  ;;  %6554 = vmatprep.subr.bf16.mxu1 %v6826_v50 }
0x12ce   : > { %v4433_v2 = vmax.f32 %v4409_v44, 0.0  ;;  %6555 = vmatpush3.bf16.msra.mxu1 %v6826_v50 }
0x12cf   : > { %v4443_v26 = vpack.c.bf16 %v4435_v3, %v4434_v1  ;;  %6556 = vmatprep.subr.bf16.mxu1 %v6827_v27 }
0x12d0   : > { %v4442_v10 = vpack.c.bf16 %v4433_v2, %v4432_v60 }
0x12d2   : > { %6518 = vmatprep.mubr.bf16.mxu1 %v4442_v10  ;;  %6557 = vmatpush3.bf16.msra.mxu1 %v6827_v27 }
0x12d3   : > { %6519 = vmatmul.mubr.bf16.gmra.mrb[172].mxu1 %v4443_v26  ;;  %6558 = vmatprep.subr.bf16.mxu1 %v6828_v28 }
0x12d6   : > { %6559 = vmatpush3.bf16.msra.mxu1 %v6828_v28 }
0x138e   : > { %v6508_v41 = vpop.f32.mrb[160].mxu1 }
0x138f   : > { %v4560_v61 = vadd.f32 %v6508_v41, %v5413_v62  ;;  %v4551_v0 = vpop.f32.mrb[161].mxu1 }
0x1390   : > { %v4552_v42 = vadd.f32 %v5413_v62, %v4551_v0  ;;  %v6509_v63 = vpop.f32.mrb[162].mxu1 }
0x1391   : > { %v4563_v47 = vadd.f32 %v6509_v63, %v5413_v62  ;;  %v4554_v22 = vpop.f32.mrb[163].mxu1  ;;  %v4616_v30 = vmax.f32 %v4560_v61, 0.0 }
0x1392   : > { %v4555_v24 = vadd.f32 %v5413_v62, %v4554_v22  ;;  %v4614_v21 = vmax.f32 %v4552_v42, 0.0 }
0x1393   : > { %v4617_v55 = vmax.f32 %v4563_v47, 0.0 }
0x1394   : > { %v4615_v15 = vmax.f32 %v4555_v24, 0.0 }
0x1395   : > { %v4631_v40 = vpack.c.bf16 %v4617_v55, %v4616_v30  ;;  %v6829_v55 = vld [vmem:[%s7764_s6 + $0x78] sm:$0xff]  }
0x1396   : > { %v4630_v23 = vpack.c.bf16 %v4615_v15, %v4614_v21  ;;  %v6512_v18 = vpop.f32.mrb[164].mxu1  ;;  %6560 = vmatprep.subr.bf16.mxu1 %v6829_v55 }
0x1397   : > { %v4576_v56 = vadd.f32 %v6512_v18, %v5413_v62  ;;  %v4567_v33 = vpop.f32.mrb[165].mxu1  ;;  %6561 = vmatpush3.bf16.msra.mxu1 %v6829_v55 }
0x1398   : > { %v4568_v32 = vadd.f32 %v5413_v62, %v4567_v33  ;;  %v6513_v35 = vpop.f32.mrb[166].mxu1  ;;  %6538 = vmatprep.mubr.bf16.mxu0 %v4630_v23 }
0x1399   : > { %v4579_v31 = vadd.f32 %v6513_v35, %v5413_v62  ;;  %v4570_v39 = vpop.f32.mrb[167].mxu1  ;;  %6539 = vmatmul.mubr.bf16.vlgmr.msra.gmra.mrb[176].mxu0 %v4631_v40  ;;  %v4620_v38 = vmax.f32 %v4576_v56, 0.0 }
0x139a   : > { %v4571_v4 = vadd.f32 %v5413_v62, %v4570_v39  ;;  %v4618_v51 = vmax.f32 %v4568_v32, 0.0 }
0x139b   : > { %v4621_v52 = vmax.f32 %v4579_v31, 0.0 }
0x139c   : > { %v4619_v5 = vmax.f32 %v4571_v4, 0.0 }
0x139d   : > { %v4633_v12 = vpack.c.bf16 %v4621_v52, %v4620_v38 }
0x139e   : > { %v4632_v49 = vpack.c.bf16 %v4619_v5, %v4618_v51  ;;  %v6516_v57 = vpop.f32.mrb[168].mxu1 }
0x139f   : > { %v4592_v13 = vadd.f32 %v6516_v57, %v5413_v62  ;;  %v4583_v29 = vpop.f32.mrb[169].mxu1 }
0x13a0   : > { %v4584_v53 = vadd.f32 %v5413_v62, %v4583_v29  ;;  %v6517_v14 = vpop.f32.mrb[170].mxu1  ;;  %6542 = vmatprep.mubr.bf16.mxu0 %v4632_v49 }
0x13a1   : > { %v4595_v19 = vadd.f32 %v6517_v14, %v5413_v62  ;;  %v4586_v20 = vpop.f32.mrb[171].mxu1  ;;  %6543 = vmatmul.mubr.bf16.gmra.mrb[180].mxu0 %v4633_v12  ;;  %v4624_v1 = vmax.f32 %v4592_v13, 0.0 }
0x13a2   : > { %v4587_v44 = vadd.f32 %v5413_v62, %v4586_v20  ;;  %v4622_v60 = vmax.f32 %v4584_v53, 0.0 }
0x13a3   : > { %v4625_v3 = vmax.f32 %v4595_v19, 0.0 }
0x13a4   : > { %v4623_v2 = vmax.f32 %v4587_v44, 0.0 }
0x13a5   : > { %v4635_v26 = vpack.c.bf16 %v4625_v3, %v4624_v1 }
0x13a6   : > { %v4634_v10 = vpack.c.bf16 %v4623_v2, %v4622_v60  ;;  %v6520_v9 = vpop.f32.mrb[172].mxu1 }
0x13a7   : > { %v4608_v45 = vadd.f32 %v6520_v9, %v5413_v62  ;;  %v4599_v50 = vpop.f32.mrb[173].mxu1 }
0x13a8   : > { %v4600_v27 = vadd.f32 %v5413_v62, %v4599_v50  ;;  %v6521_v28 = vpop.f32.mrb[174].mxu1  ;;  %6546 = vmatprep.mubr.bf16.mxu0 %v4634_v10 }
0x13a9   : > { %v4611_v41 = vadd.f32 %v6521_v28, %v5413_v62  ;;  %v4602_v61 = vpop.f32.mrb[175].mxu1  ;;  %6547 = vmatmul.mubr.bf16.gmra.mrb[184].mxu0 %v4635_v26  ;;  %v4628_v42 = vmax.f32 %v4608_v45, 0.0 }
0x13aa   : > { %v4603_v0 = vadd.f32 %v5413_v62, %v4602_v61  ;;  %v4626_v47 = vmax.f32 %v4600_v27, 0.0 }
0x13ab   : > { %v4629_v63 = vmax.f32 %v4611_v41, 0.0 }
0x13ac   : > { %v4627_v22 = vmax.f32 %v4603_v0, 0.0 }
0x13ad   : > { %v4637_v24 = vpack.c.bf16 %v4629_v63, %v4628_v42  ;;  %v7654_v42 = vld [vmem:[%s7765_s7 + $0x3] ss:$0 sm:$0xff] }
0x13ae   : > { %v4636_v30 = vpack.c.bf16 %v4627_v22, %v4626_v47 }
0x13b0   : > { %6550 = vmatprep.mubr.bf16.mxu0 %v4636_v30 }
0x13b1   : > { %6551 = vmatmul.mubr.bf16.gmra.mrb[188].mxu0 %v4637_v24 }
0x146c   : > { %v6540_v21 = vpop.f32.mrb[176].mxu0 }
0x146d   : > { %v4737_v15 = vpop.f32.mrb[177].mxu0  ;;  %v4802_v23 = vmax.f32 %v6540_v21, 0.0 }
0x146e   : > { %v6541_v40 = vpop.f32.mrb[178].mxu0  ;;  %v4800_v56 = vmax.f32 %v4737_v15, 0.0 }
0x146f   : > { %v4803_v18 = vmax.f32 %v6541_v40, 0.0  ;;  %v4740_v62 = vpop.f32.mrb[179].mxu0 }
0x1470   : > { %v4801_v33 = vmax.f32 %v4740_v62, 0.0 }
0x1471   : > { %v4817_v32 = vpack.c.bf16 %v4803_v18, %v4802_v23 }
0x1472   : > { %v4816_v35 = vpack.c.bf16 %v4801_v33, %v4800_v56 }
0x1474   : > { %v6544_v31 = vpop.f32.mrb[180].mxu0  ;;  %6562 = vmatprep.mubr.msk.bf16.mxu1 %vm1365_vm0, %v4816_v35 }
0x1475   : > { %v4753_v39 = vpop.f32.mrb[181].mxu0  ;;  %6563 = vmatmul.mubr.msk.bf16.vlgmr.msra.gmra.mrb[176].mxu1 %vm1365_vm0, %v4817_v32  ;;  %v4806_v38 = vmax.f32 %v6544_v31, 0.0 }
0x1476   : > { %v6545_v4 = vpop.f32.mrb[182].mxu0  ;;  %v4804_v5 = vmax.f32 %v4753_v39, 0.0 }
0x1477   : > { %v4807_v52 = vmax.f32 %v6545_v4, 0.0  ;;  %v4756_v51 = vpop.f32.mrb[183].mxu0 }
0x1478   : > { %v4805_v12 = vmax.f32 %v4756_v51, 0.0 }
0x1479   : > { %v4819_v49 = vpack.c.bf16 %v4807_v52, %v4806_v38 }
0x147a   : > { %v4818_v57 = vpack.c.bf16 %v4805_v12, %v4804_v5 }
0x147c   : > { %v6548_v13 = vpop.f32.mrb[184].mxu0  ;;  %6566 = vmatprep.mubr.msk.bf16.mxu1 %vm1365_vm0, %v4818_v57 }
0x147d   : > { %v4769_v29 = vpop.f32.mrb[185].mxu0  ;;  %6567 = vmatmul.mubr.msk.bf16.gmra.mrb[180].mxu1 %vm1365_vm0, %v4819_v49  ;;  %v4810_v14 = vmax.f32 %v6548_v13, 0.0 }
0x147e   : > { %v6549_v53 = vpop.f32.mrb[186].mxu0  ;;  %v4808_v44 = vmax.f32 %v4769_v29, 0.0 }
0x147f   : > { %v4811_v19 = vmax.f32 %v6549_v53, 0.0  ;;  %v4772_v20 = vpop.f32.mrb[187].mxu0 }
0x1480   : > { %v4809_v1 = vmax.f32 %v4772_v20, 0.0 }
0x1481   : > { %v4821_v3 = vpack.c.bf16 %v4811_v19, %v4810_v14 }
0x1482   : > { %v4820_v60 = vpack.c.bf16 %v4809_v1, %v4808_v44 }
0x1484   : > { %v6552_v2 = vpop.f32.mrb[188].mxu0  ;;  %6570 = vmatprep.mubr.msk.bf16.mxu1 %vm1365_vm0, %v4820_v60 }
0x1485   : > { %v4785_v26 = vpop.f32.mrb[189].mxu0  ;;  %6571 = vmatmul.mubr.msk.bf16.gmra.mrb[184].mxu1 %vm1365_vm0, %v4821_v3  ;;  %v4814_v9 = vmax.f32 %v6552_v2, 0.0 }
0x1486   : > { %v6553_v10 = vpop.f32.mrb[190].mxu0  ;;  %v4812_v27 = vmax.f32 %v4785_v26, 0.0 }
0x1487   : > { %v4815_v45 = vmax.f32 %v6553_v10, 0.0  ;;  %v4788_v50 = vpop.f32.mrb[191].mxu0 }
0x1488   : > { %v4813_v28 = vmax.f32 %v4788_v50, 0.0 }
0x1489   : > { %v4823_v41 = vpack.c.bf16 %v4815_v45, %v4814_v9 }
0x148a   : > { %v4822_v61 = vpack.c.bf16 %v4813_v28, %v4812_v27 }
0x148c   : > { %6574 = vmatprep.mubr.msk.bf16.mxu1 %vm1365_vm0, %v4822_v61 }
0x148d   : > { %6575 = vmatmul.mubr.msk.bf16.gmra.mrb[188].mxu1 %vm1365_vm0, %v4823_v41 }
0x1548   : > { %v6564_v0 = vpop.f32.mrb[176].mxu1 }
0x1549   : > { %v4980_v63 = vadd.f32 %v6564_v0, %v7541_v16  ;;  %v4915_v47 = vpop.f32.mrb[177].mxu1 }
0x154a   : > { %v4978_v22 = vadd.f32 %v4915_v47, %v7537_v48  ;;  %v6565_v24 = vpop.f32.mrb[178].mxu1 }
0x154b   : > { %v5004_v30 = vadd.f32 %v7654_v42, %v4980_v63  ;;  %v4981_v55 = vadd.f32 %v6565_v24, %v7535_v37  ;;  %v4918_v21 = vpop.f32.mrb[179].mxu1 }
0x154c   : > { %v5002_v15 = vadd.f32 %v7654_v42, %v4978_v22  ;;  %v4979_v40 = vadd.f32 %v4918_v21, %v7539_v54 }
0x154d   : > { %5020 = vst [vmem:[%s7662_s2 + $0x10] sm:$0xff] %v5004_v30  ;;  %v5005_v48 = vadd.f32 %v7654_v42, %v4981_v55 }
0x154e   : > { %5018 = vst [vmem:[%s7662_s2] sm:$0xff] %v5002_v15  ;;  %v5003_v16 = vadd.f32 %v7654_v42, %v4979_v40 }
0x154f   : > { %5021 = vst [vmem:[%s7662_s2 + $0x18] sm:$0xff] %v5005_v48 }
0x1550   : > { %5019 = vst [vmem:[%s7662_s2 + $0x8] sm:$0xff] %v5003_v16  ;;  %v6568_v37 = vpop.f32.mrb[180].mxu1 }
0x1551   : > { %v4984_v54 = vadd.f32 %v6568_v37, %v7557_v36  ;;  %v4931_v23 = vpop.f32.mrb[181].mxu1 }
0x1552   : > { %v4982_v18 = vadd.f32 %v4931_v23, %v7553_v59  ;;  %v6569_v62 = vpop.f32.mrb[182].mxu1 }
0x1553   : > { %v5008_v56 = vadd.f32 %v7654_v42, %v4984_v54  ;;  %v4985_v33 = vadd.f32 %v6569_v62, %v7551_v58  ;;  %v4934_v32 = vpop.f32.mrb[183].mxu1 }
0x1554   : > { %v5006_v35 = vadd.f32 %v7654_v42, %v4982_v18  ;;  %v4983_v31 = vadd.f32 %v4934_v32, %v7555_v34 }
0x1555   : > { %5024 = vst [vmem:[%s7662_s2 + $0x30] sm:$0xff] %v5008_v56  ;;  %v5009_v39 = vadd.f32 %v7654_v42, %v4985_v33 }
0x1556   : > { %5022 = vst [vmem:[%s7662_s2 + $0x20] sm:$0xff] %v5006_v35  ;;  %v5007_v36 = vadd.f32 %v7654_v42, %v4983_v31 }
0x1557   : > { %5025 = vst [vmem:[%s7662_s2 + $0x38] sm:$0xff] %v5009_v39 }
0x1558   : > { %5023 = vst [vmem:[%s7662_s2 + $0x28] sm:$0xff] %v5007_v36  ;;  %v6572_v59 = vpop.f32.mrb[184].mxu1 }
0x1559   : > { %v4988_v58 = vadd.f32 %v6572_v59, %v7573_v11  ;;  %v4947_v4 = vpop.f32.mrb[185].mxu1 }
0x155a   : > { %v4986_v38 = vadd.f32 %v4947_v4, %v7569_v6  ;;  %v6573_v52 = vpop.f32.mrb[186].mxu1 }
0x155b   : > { %v5012_v34 = vadd.f32 %v7654_v42, %v4988_v58  ;;  %v4989_v51 = vadd.f32 %v6573_v52, %v7567_v17  ;;  %v4950_v5 = vpop.f32.mrb[187].mxu1 }
0x155c   : > { %v5010_v12 = vadd.f32 %v7654_v42, %v4986_v38  ;;  %v4987_v49 = vadd.f32 %v4950_v5, %v7571_v7 }
0x155d   : > { %5028 = vst [vmem:[%s7662_s2 + $0x50] sm:$0xff] %v5012_v34  ;;  %v5013_v57 = vadd.f32 %v7654_v42, %v4989_v51 }
0x155e   : > { %5026 = vst [vmem:[%s7662_s2 + $0x40] sm:$0xff] %v5010_v12  ;;  %v5011_v11 = vadd.f32 %v7654_v42, %v4987_v49 }
0x155f   : > { %5029 = vst [vmem:[%s7662_s2 + $0x58] sm:$0xff] %v5013_v57 }
0x1560   : > { %5027 = vst [vmem:[%s7662_s2 + $0x48] sm:$0xff] %v5011_v11  ;;  %v6576_v6 = vpop.f32.mrb[188].mxu1 }
0x1561   : > { %v4992_v13 = vadd.f32 %v6576_v6, %v7589_v43  ;;  %v4963_v17 = vpop.f32.mrb[189].mxu1 }
0x1562   : > { %v4990_v29 = vadd.f32 %v4963_v17, %v7585_v8  ;;  %v6577_v53 = vpop.f32.mrb[190].mxu1 }
0x1563   : > { %v5016_v7 = vadd.f32 %v7654_v42, %v4992_v13  ;;  %v4993_v14 = vadd.f32 %v6577_v53, %v7583_v46  ;;  %v4966_v19 = vpop.f32.mrb[191].mxu1 }
0x1564   : > { %v5014_v20 = vadd.f32 %v7654_v42, %v4990_v29  ;;  %v4991_v44 = vadd.f32 %v4966_v19, %v7587_v25 }
0x1565   : > { %5032 = vst [vmem:[%s7662_s2 + $0x70] sm:$0xff] %v5016_v7  ;;  %v5017_v43 = vadd.f32 %v7654_v42, %v4993_v14 }
0x1566   : > { %5030 = vst [vmem:[%s7662_s2 + $0x60] sm:$0xff] %v5014_v20  ;;  %v5015_v46 = vadd.f32 %v7654_v42, %v4991_v44 }
0x1567   : > { %5033 = vst [vmem:[%s7662_s2 + $0x78] sm:$0xff] %v5017_v43 }
0x1568   : > { %5031 = vst [vmem:[%s7662_s2 + $0x68] sm:$0xff] %v5015_v46 }
0x1569   : > { %6943 = shalt.err (!%p6940_p11)
}
0x156a   : > { %s6944_s13 = scalar_lea.hbm %s7707_s11, 2048  ;;  %s6948_s19 = scalar_lea.hbm %s7766_s8, 4096 }
0x156b   : > { %p6945_p13 = scmp.ne.s32.totalorder %s7707_s11, %s6944_s13  ;;  %p6949_p6 = scmp.lt.u32.totalorder %s7707_s11, %s7766_s8 }
0x156c   : > { %p6950_p9 = scmp.lt.u32.totalorder %s6948_s19, %s6944_s13  ;;  %p6952_p12 = scmp.lt.u32.totalorder %s6944_s13, %s7707_s11 }
0x156d   : > { %p6946_p5 = pnand %p6945_p13, %p7788_p1 }
0x156e   : > { %p6951_p10 = por %p6950_p9, %p6949_p6 }
0x156f   : > { %p6947_p0 = pneg %p6946_p5 }
0x1570   : > { %p6953_p2 = por %p6952_p12, %p6951_p10 }
0x1572   : > { %p6954_p3 = pnand %p6953_p2, %p6947_p0 }
0x1574   : > { %6957 = shalt.err (!%p6954_p3)
}
0x1575   : > { %s7010_s23 = smov 128   ;;  %s7011_s2 = smov 8  }
0x1576   : > { %6590 = dma.vmem_to_hbm [thread:$0]  (%p7788_p1), %s7709_s20, 2048, %s7707_s11, %s7717_s9, %s7010_s23, %s7010_s23, %s7011_s2  }
0x1577 PF: > { %p6612_p4 = scmp.ge.s32.totalorder %s7000_s30, 2  ;;  %s5063_s17 = sand.u32 1, %s6988_s27  }
0x1578   : > { %p7789_p7 = scmp.ne.s32.totalorder %s7778_s16, 0  ;;  %s5064_s12 = scalar_lea.sflag [#allocation4], %s5063_s17 }
0x157a   : > { %p6603_p8 = pnand %p6612_p4, %p7789_p7 }
0x157c   : > { %6983 = dma.done.wait (!%p6603_p8), %s5064_s12, 2048  }
0x157d   : > { %6985 = vsyncadd (!%p6603_p8), %s5064_s12, 4294965248  ;;  %s7790_s30 = sld [smem:[#allocation13_spill]]  ;;  %s7791_s29 = sld [smem:[#allocation12_spill]] }
0x157e   : > { %s7792_s24 = sld [smem:[#allocation14_spill]]  ;;  %s7793_s27 = smov %s6992_s28 }
0x1583   : > { %p20_p11 = scmp.ge.s32.totalorder %s7790_s30, 4   ;;  %s7794_s28 = smov %s7791_s29 }
0x1584   : > { %s7795_s29 = smov %s7792_s24 }
0x1585   :  { %22 = sbr.rel (!%p20_p11) target bundleno = 7 (0x7), region = 137 }
0x158c   :  { %5069 = vsyncpa [#allocation3], 1 }
0x158d   :  { %5071 = vsyncpa [#allocation3 + $0x1], 1 }
0x158e   :  { %5072 = vsyncpa [#allocation6], 1 }
0x158f   :  { %5073 = vsyncpa [#allocation4], 1 }
0x1590   :  { %5075 = vsyncpa [#allocation4 + $0x1], 1 }

</bundles_post_ra>
